<compile_context>
chip_gen: v6e
topology: v6e:2x2x1
jax: 0.10.0
libtpu: 0.0.40
codegen_flags: <defaults>
</compile_context>

<pallas_src>
import functools

import jax
import jax.numpy as jnp
from jax.experimental import pallas as pl
from jax.experimental.pallas import tpu as pltpu

# ----- scaled-down C2D ResNet-50 architecture ------------------------------
INPUT_CHANNELS = 3
STEM_OUT = 8                   # real model: 64
DEPTHS = (3, 4, 6, 3)          # model_depth = 50
INNER = (8, 16, 32, 64)        # bottleneck inner widths (real: 64,128,256,512)
OUT = (32, 64, 128, 256)       # stage output widths (real: 256,512,1024,2048)
STAGE_STRIDE = (1, 2, 2, 2)
STEM_K, STEM_PAD, STEM_STRIDE = 7, 3, 2
BN_EPS = 1e-5
NEG_PAD = -1.0e30              # max-pool padding (pool input is post-ReLU >= 0; bf16-representable)
LANE = 128
MAX_TM = 512
ACT_DTYPE = jnp.bfloat16       # inter-layer activations / matmul operands
VMEM_LIMIT = 64 * 1024 * 1024


def _rup(x, m):
    return ((x + m - 1) // m) * m


def _largest_tile(mp, maxt):
    """Largest multiple-of-8 divisor of mp that is <= maxt (so no M padding copies are needed)."""
    best = 8
    for t in range(8, min(mp, maxt) + 1, 8):
        if mp % t == 0:
            best = t
    return best


def _cparams(sem):
    return pltpu.CompilerParams(dimension_semantics=sem, vmem_limit_bytes=VMEM_LIMIT)


# ---------------------------- Pallas kernels -------------------------------
def _mm_bn_kernel(a_ref, w_ref, shift_ref, o_ref, *, relu):
    # bf16 operands -> f32 accumulate; f32 BN-shift/ReLU epilogue; bf16 store.
    acc = jnp.dot(a_ref[...], w_ref[...], preferred_element_type=jnp.float32)
    y = acc + shift_ref[...]
    if relu:
        y = jnp.maximum(y, 0.0)
    o_ref[...] = y.astype(o_ref.dtype)


def _mm_bn_res_kernel(a_ref, w_ref, shift_ref, r_ref, o_ref, *, relu):
    acc = jnp.dot(a_ref[...], w_ref[...], preferred_element_type=jnp.float32)
    y = acc + shift_ref[...] + r_ref[...].astype(jnp.float32)
    if relu:
        y = jnp.maximum(y, 0.0)
    o_ref[...] = y.astype(o_ref.dtype)


def _win_conv_kernel(x_ref, w_ref, shift_ref, o_ref, *, k, wp, m_out, relu):
    # x_ref: (lp, Cin_p) resident flattened padded frame (bf16)
    # w_ref: (k*k, Cin_p, Cout_p) per-offset scale-folded weights, resident across the grid.
    # All k*k window offsets are reduced *inside* the kernel (unrolled; offsets are static), with a
    # local f32 accumulator -- no per-offset grid steps, no VMEM-accumulator RMW per offset.
    cout_p = w_ref.shape[2]
    acc = jnp.zeros((m_out, cout_p), jnp.float32)
    for q in range(k * k):
        off = (q // k) * wp + (q % k)                  # static flattened (di, dj) offset
        a = x_ref[pl.ds(off, m_out), :]
        acc = acc + jnp.dot(a, w_ref[q], preferred_element_type=jnp.float32)
    y = acc + shift_ref[...]
    if relu:
        y = jnp.maximum(y, 0.0)
    o_ref[...] = y.astype(o_ref.dtype)


def _win_max_kernel(x_ref, o_ref, *, k, wp, m_out):
    # bf16 max accumulator (max is exact in the input dtype); offsets folded in-kernel.
    r = x_ref[pl.ds(0, m_out), :]
    for q in range(1, k * k):
        off = (q // k) * wp + (q % k)
        r = jnp.maximum(r, x_ref[pl.ds(off, m_out), :])
    o_ref[...] = r.astype(o_ref.dtype)


def _gap_kernel(x_ref, o_ref, acc_ref, *, inv_r, tr):
    # (8, Cp) partial-sum accumulator: lane-dense unmasked stores, no per-step XLU reduce.
    j = pl.program_id(1)

    @pl.when(j == 0)
    def _():
        acc_ref[...] = jnp.zeros_like(acc_ref)

    x = x_ref[...].astype(jnp.float32)
    part = acc_ref[...]
    for s in range(tr // 8):                           # 8-row slab adds: pure VPU work
        part = part + x[s * 8:(s + 1) * 8, :]
    acc_ref[...] = part

    @pl.when(j == pl.num_programs(1) - 1)
    def _():
        o_ref[...] = acc_ref[...] * inv_r


# ------------------------- Pallas call wrappers -----------------------------
def conv1x1_bn(x, p, relu, residual=None, stride=1):
    """x: (N, H, W, Cin_p) bf16; p['w']: (Cin_p, Cout_p) bf16 (BN scale folded), p['shift'] f32."""
    if stride > 1:
        x = x[:, ::stride, ::stride, :]
        if residual is not None:
            residual = residual[:, ::stride, ::stride, :]
    N, H, W, cin_p = x.shape
    cout_p = p["w"].shape[1]
    M = N * H * W
    a = x.reshape(M, cin_p)                            # merges leading dims only: no HBM copy

    Mp = _rup(M, 8)
    TM = _largest_tile(Mp, MAX_TM)
    TN = 256 if (cout_p % 256 == 0) else 128           # 256-wide N tiles when Cout allows (v6e/v7x)
    TN = min(TN, cout_p)
    gm, gn = Mp // TM, cout_p // TN
    # Guarantee >= 2 grid steps whenever splittable (dual-TC sharding + DMA/compute overlap).
    if gm * gn == 1:
        if TM % 16 == 0:
            TM //= 2
        elif TN % 256 == 0:
            TN //= 2
        gm, gn = Mp // TM, cout_p // TN

    if Mp != M:
        a = jnp.pad(a, ((0, Mp - M), (0, 0)))

    in_specs = [
        pl.BlockSpec((TM, cin_p), lambda i, j: (i, 0)),
        pl.BlockSpec((cin_p, TN), lambda i, j: (0, j)),
        pl.BlockSpec((1, TN), lambda i, j: (0, j)),
    ]
    args = [a, p["w"], p["shift"]]
    if residual is None:
        kernel = functools.partial(_mm_bn_kernel, relu=relu)
    else:
        r = residual.reshape(M, cout_p)
        if Mp != M:
            r = jnp.pad(r, ((0, Mp - M), (0, 0)))
        in_specs.append(pl.BlockSpec((TM, TN), lambda i, j: (i, j)))
        args.append(r)
        kernel = functools.partial(_mm_bn_res_kernel, relu=relu)

    out = pl.pallas_call(
        kernel,
        out_shape=jax.ShapeDtypeStruct((Mp, cout_p), ACT_DTYPE),
        grid=(gm, gn),
        in_specs=in_specs,
        out_specs=pl.BlockSpec((TM, TN), lambda i, j: (i, j)),
        compiler_params=_cparams(("parallel", "parallel")),
    )(*args)
    if Mp != M:
        out = out[:M]
    return out.reshape(N, H, W, cout_p)


def conv3x3_bn(x, p, stride, relu):
    """3x3 spatial conv + BN + optional ReLU, no im2col materialization.

    The padded frame (flattened (h,w) -> h*Wp+w) stays resident in VMEM; the 9 window offsets are
    reduced inside the kernel.  Conv geometry is derived from the (static) weight shape."""
    kk = p["w"].shape[0]
    k = int(round(kk ** 0.5))                          # static
    pad = (k - 1) // 2
    N, H, W, cin_p = x.shape
    cout_p = p["w"].shape[2]
    Hp, Wp = H + 2 * pad, W + 2 * pad
    Ho1, Wo1 = Hp - k + 1, Wp - k + 1
    m_out = Ho1 * Wp                                   # stride-1 rows x full padded width

    # single spatial zero-pad (+ k halo rows at the bottom so every flat offset stays in-bounds)
    xp = jnp.pad(x, ((0, 0), (pad, pad + k), (pad, pad), (0, 0)))
    lp = (Hp + k) * Wp
    xf = xp.reshape(N, lp, cin_p)

    out = pl.pallas_call(
        functools.partial(_win_conv_kernel, k=k, wp=Wp, m_out=m_out, relu=relu),
        out_shape=jax.ShapeDtypeStruct((N, m_out, cout_p), ACT_DTYPE),
        grid=(N,),
        in_specs=[
            pl.BlockSpec((None, lp, cin_p), lambda n: (n, 0, 0)),     # resident frame
            pl.BlockSpec((kk, cin_p, cout_p), lambda n: (0, 0, 0)),   # resident full weight
            pl.BlockSpec((1, cout_p), lambda n: (0, 0)),
        ],
        out_specs=pl.BlockSpec((None, m_out, cout_p), lambda n: (n, 0, 0)),
        compiler_params=_cparams(("parallel",)),
    )(xf, p["w"], p["shift"])

    # drop scrap columns and apply the conv stride (only 3 layers have stride 2; see header TODO)
    return out.reshape(N, Ho1, Wp, cout_p)[:, ::stride, :Wo1:stride, :]


def maxpool2d(x, k, stride, pad):
    """Spatial max-pool with the same in-kernel window-fold structure as conv3x3_bn."""
    N, H, W, cp = x.shape
    Hp, Wp = H + 2 * pad, W + 2 * pad
    Ho1, Wo1 = Hp - k + 1, Wp - k + 1
    m_out = Ho1 * Wp
    xp = jnp.pad(x, ((0, 0), (pad, pad + k), (pad, pad), (0, 0)), constant_values=NEG_PAD)
    lp = (Hp + k) * Wp
    xf = xp.reshape(N, lp, cp)
    out = pl.pallas_call(
        functools.partial(_win_max_kernel, k=k, wp=Wp, m_out=m_out),
        out_shape=jax.ShapeDtypeStruct((N, m_out, cp), ACT_DTYPE),
        grid=(N,),
        in_specs=[pl.BlockSpec((None, lp, cp), lambda n: (n, 0, 0))],
        out_specs=pl.BlockSpec((None, m_out, cp), lambda n: (n, 0, 0)),
        compiler_params=_cparams(("parallel",)),
    )(xf)
    return out.reshape(N, Ho1, Wp, cp)[:, ::stride, :Wo1:stride, :]


def stem_conv_bn_relu(x, p):
    """Stem 7x7/s2/p3 conv + BN + ReLU via a cheap im2col on the 3-channel input + fused matmul.

    The im2col matrix has K = 147 (-> 256 lanes), so the MXU contraction has no wasted zero lanes
    and the stride-2 output is produced exactly (no scrap rows/columns)."""
    k, pad, s = STEM_K, STEM_PAD, STEM_STRIDE
    N, H, W, C = x.shape
    Ho = (H + 2 * pad - k) // s + 1
    Wo = (W + 2 * pad - k) // s + 1
    xp = jnp.pad(x, ((0, 0), (pad, pad), (pad, pad), (0, 0)))
    cols = []
    for di in range(k):
        for dj in range(k):
            cols.append(xp[:, di:di + Ho * s:s, dj:dj + Wo * s:s, :])
    patches = jnp.concatenate(cols, axis=-1)           # (N, Ho, Wo, k*k*C) = (.., 147)
    Kp = p["w"].shape[0]
    patches = jnp.pad(patches, ((0, 0), (0, 0), (0, 0), (0, Kp - k * k * C)))
    return conv1x1_bn(patches.astype(ACT_DTYPE), p, relu=True)


def global_avg_pool(x):
    """x: (B, T, H, W, Cp) -> (B, Cp) f32.
    Head AvgPool3d((T,H,W)) followed by AdaptiveAvgPool3d((1,1,1)) composes to an exact global
    mean here (the pooling window tiles the volume exactly)."""
    B, T, H, W, cp = x.shape
    R = T * H * W
    xr = x.reshape(B, R, cp)
    TR = min(512, _rup(R, 8))
    Rp = _rup(R, TR)
    if Rp != R:
        xr = jnp.pad(xr, ((0, 0), (0, Rp - R), (0, 0)))    # zero rows don't change the sum
    out = pl.pallas_call(
        functools.partial(_gap_kernel, inv_r=1.0 / R, tr=TR),
        out_shape=jax.ShapeDtypeStruct((B, 8, cp), jnp.float32),
        grid=(B, Rp // TR),
        in_specs=[pl.BlockSpec((None, TR, cp), lambda b, j: (b, j, 0))],
        out_specs=pl.BlockSpec((None, 8, cp), lambda b, j: (b, 0, 0)),
        scratch_shapes=[pltpu.VMEM((8, cp), jnp.float32)],
        compiler_params=_cparams(("parallel", "arbitrary")),
    )(xr)
    return out.sum(axis=1)                             # tiny final 8-row reduce in the wrapper


# ------------------------------ parameters ----------------------------------
def _init_conv(key, cout, cin, kh, kw):
    fan_in = cin * kh * kw
    bound = 1.0 / float(fan_in) ** 0.5                 # PyTorch default kaiming_uniform(a=sqrt(5))
    return jax.random.uniform(key, (cout, cin, kh, kw), jnp.float32, -bound, bound)


def _bn_scale_shift(c):
    gamma = jnp.ones((c,), jnp.float32)
    beta = jnp.zeros((c,), jnp.float32)
    running_mean = jnp.zeros((c,), jnp.float32)
    running_var = jnp.ones((c,), jnp.float32)
    scale = gamma / jnp.sqrt(running_var + BN_EPS)     # eval-mode BN folded to scale/shift
    shift = beta - running_mean * scale
    return scale, shift


def _pack_matmul(wm, scale, shift, cout):
    """(K, Cout) f32 weight -> lane-padded (K_p, Cout_p) bf16 with BN scale folded + f32 shift."""
    K = wm.shape[0]
    kp, cout_p = _rup(K, LANE), _rup(cout, LANE)
    wm = wm * scale[None, :]
    wm = jnp.pad(wm, ((0, kp - K), (0, cout_p - cout))).astype(ACT_DTYPE)
    sh = jnp.pad(shift, (0, cout_p - cout)).reshape(1, cout_p).astype(jnp.float32)
    return {"w": wm, "shift": sh}


def _pack_conv1x1(w, scale, shift):
    cout = w.shape[0]
    return _pack_matmul(w[:, :, 0, 0].T, scale, shift, cout)


def _pack_stem(w, scale, shift):
    cout, cin, kh, kw = w.shape
    # row order (di, dj, c) must match the im2col stacking order in stem_conv_bn_relu
    wm = jnp.transpose(w, (2, 3, 1, 0)).reshape(kh * kw * cin, cout)
    return _pack_matmul(wm, scale, shift, cout)


def _pack_conv3x3(w, scale, shift):
    cout, cin, kh, kw = w.shape
    cin_p, cout_p = _rup(cin, LANE), _rup(cout, LANE)
    wq = jnp.transpose(w, (2, 3, 1, 0)).reshape(kh * kw, cin, cout) * scale[None, None, :]
    wq = jnp.pad(wq, ((0, 0), (0, cin_p - cin), (0, cout_p - cout))).astype(ACT_DTYPE)
    sh = jnp.pad(shift, (0, cout_p - cout)).reshape(1, cout_p).astype(jnp.float32)
    return {"w": wq, "shift": sh}


def init_params(key):
    keys = iter(jax.random.split(key, 256))
    s, b = _bn_scale_shift(STEM_OUT)
    params = {"stem": _pack_stem(_init_conv(next(keys), STEM_OUT, INPUT_CHANNELS, 7, 7), s, b)}
    stages = []
    in_c = STEM_OUT
    for si in range(4):
        inner, out_c = INNER[si], OUT[si]
        blocks = []
        for bi in range(DEPTHS[si]):
            blk = {}
            ci_a = in_c if bi == 0 else out_c
            if bi == 0:
                ds_, db_ = _bn_scale_shift(out_c)
                blk["down"] = _pack_conv1x1(_init_conv(next(keys), out_c, ci_a, 1, 1), ds_, db_)
            sa, ba = _bn_scale_shift(inner)
            blk["a"] = _pack_conv1x1(_init_conv(next(keys), inner, ci_a, 1, 1), sa, ba)
            sb_, bb_ = _bn_scale_shift(inner)
            blk["b"] = _pack_conv3x3(_init_conv(next(keys), inner, inner, 3, 3), sb_, bb_)
            sc_, bc_ = _bn_scale_shift(out_c)
            blk["c"] = _pack_conv1x1(_init_conv(next(keys), out_c, inner, 1, 1), sc_, bc_)
            blocks.append(blk)
        stages.append(blocks)
        in_c = out_c
    params["stages"] = stages
    return params


# -------------------------------- forward -----------------------------------
def bottleneck_block(x, blk, stride):
    if "down" in blk:
        shortcut = conv1x1_bn(x, blk["down"], relu=False, stride=stride)
    else:
        shortcut = x
    y = conv1x1_bn(x, blk["a"], relu=True)
    y = conv3x3_bn(y, blk["b"], stride=stride, relu=True)
    # conv_c + BN + residual add + final ReLU fused into a single Pallas kernel
    y = conv1x1_bn(y, blk["c"], relu=True, residual=shortcut)
    return y


@jax.jit
def feature_extractor_forward(params, x):
    # x: (B, C, T, H, W) float32, NCTHW like the PyTorch module
    B, C, T, H, W = x.shape
    xf = jnp.transpose(x, (0, 2, 3, 4, 1)).reshape(B * T, H, W, C)   # frames, channels-last
    # stem: Conv(1,7,7)/s(1,2,2)/p(0,3,3) + BN + ReLU + MaxPool(1,3,3)/s(1,2,2)/p(0,1,1)
    xf = stem_conv_bn_relu(xf, params["stem"])
    xf = maxpool2d(xf, 3, 2, 1)
    # res2..res5
    for si, stage in enumerate(params["stages"]):
        for bi, blk in enumerate(stage):
            stride = STAGE_STRIDE[si] if bi == 0 else 1
            xf = bottleneck_block(xf, blk, stride)
    N, Hf, Wf, Cf = xf.shape
    feats = xf.reshape(B, T, Hf, Wf, Cf)
    pooled = global_avg_pool(feats)[:, :OUT[-1]]       # head AvgPool3d + AdaptiveAvgPool3d((1,1,1))
    return pooled.reshape(B, OUT[-1], 1, 1, 1)         # NCTHW output, (B, C, 1, 1, 1)


if __name__ == "__main__":
    key = jax.random.PRNGKey(0)
    pkey, xkey = jax.random.split(key)
    params = init_params(pkey)

    B, T, H, W = 2, 4, 16, 16
    x = jax.random.normal(xkey, (B, INPUT_CHANNELS, T, H, W), jnp.float32)

    out = feature_extractor_forward(params, x)
    out = jax.block_until_ready(out)

    assert out.shape == (B, OUT[-1], 1, 1, 1), out.shape
    assert bool(jnp.all(jnp.isfinite(out)))
    print("KERNEL_OK")
</pallas_src>

<mosaic_0001>
module attributes {stable_mosaic.version = 11 : i64} {
  func.func @_mm_bn_kernel(%arg0: i32, %arg1: i32, %arg2: memref<256x256xbf16, #tpu.memory_space<vmem>>, %arg3: memref<256x128xbf16, #tpu.memory_space<vmem>>, %arg4: memref<1x128xf32, #tpu.memory_space<vmem>>, %arg5: memref<256x128xbf16, #tpu.memory_space<vmem>>) attributes {dimension_semantics = [#tpu.dimension_semantics<parallel>, #tpu.dimension_semantics<parallel>], iteration_bounds = array<i64: 2, 1>, scalar_prefetch = 0 : i64, scratch_operands = 0 : i64, tpu.core_type = #tpu.core_type<tc>, window_params = [{transform_indices = @transform_0, window_bounds = array<i64: 256, 256>}, {transform_indices = @transform_1, window_bounds = array<i64: 256, 128>}, {transform_indices = @transform_2, window_bounds = array<i64: 1, 128>}, {transform_indices = @transform_3, window_bounds = array<i64: 256, 128>}]} {
    %c0 = arith.constant 0 : index
    %c0_0 = arith.constant 0 : index
    %0 = vector.load %arg2[%c0, %c0_0] : memref<256x256xbf16, #tpu.memory_space<vmem>>, vector<256x256xbf16>
    %c0_1 = arith.constant 0 : index
    %c0_2 = arith.constant 0 : index
    %1 = vector.load %arg3[%c0_1, %c0_2] : memref<256x128xbf16, #tpu.memory_space<vmem>>, vector<256x128xbf16>
    %cst = arith.constant dense<0.000000e+00> : vector<256x128xf32>
    %2 = tpu.matmul %0, %1, %cst {dimension_numbers = #tpu.dot_dimension_numbers<[1], [0], [0], [1], [0, 0, 1, 1], [], []>} : vector<256x256xbf16>, vector<256x128xbf16>, vector<256x128xf32> -> vector<256x128xf32>
    %c0_3 = arith.constant 0 : index
    %c0_4 = arith.constant 0 : index
    %3 = vector.load %arg4[%c0_3, %c0_4] : memref<1x128xf32, #tpu.memory_space<vmem>>, vector<1x128xf32>
    %4 = vector.broadcast %3 : vector<1x128xf32> to vector<256x128xf32>
    %5 = arith.addf %2, %4 : vector<256x128xf32>
    %cst_5 = arith.constant 0.000000e+00 : f32
    %6 = vector.broadcast %cst_5 : f32 to vector<256x128xf32>
    %7 = arith.maximumf %5, %6 : vector<256x128xf32>
    %8 = arith.truncf %7 : vector<256x128xf32> to vector<256x128xbf16>
    %c0_6 = arith.constant 0 : index
    %c0_7 = arith.constant 0 : index
    %9 = vector.load %arg5[%c0_6, %c0_7] : memref<256x128xbf16, #tpu.memory_space<vmem>>, vector<256x128xbf16>
    tpu.vector_store %arg5[%c0_6, %c0_7], %8 {strides = array<i32>} : memref<256x128xbf16, #tpu.memory_space<vmem>>, vector<256x128xbf16>,
    return
  }
  func.func @transform_0(%arg0: i32, %arg1: i32) -> (i32, i32) {
    %c0_i32 = arith.constant 0 : i32
    %c0_i32_0 = arith.constant 0 : i32
    return %arg0, %c0_i32 : i32, i32
  }
  func.func @transform_1(%arg0: i32, %arg1: i32) -> (i32, i32) {
    %c0_i32 = arith.constant 0 : i32
    %c0_i32_0 = arith.constant 0 : i32
    return %c0_i32, %arg1 : i32, i32
  }
  func.func @transform_2(%arg0: i32, %arg1: i32) -> (i32, i32) {
    %c0_i32 = arith.constant 0 : i32
    %c0_i32_0 = arith.constant 0 : i32
    return %c0_i32, %arg1 : i32, i32
  }
  func.func @transform_3(%arg0: i32, %arg1: i32) -> (i32, i32) {
    %c0_i32 = arith.constant 0 : i32
    return %arg0, %arg1 : i32, i32
  }
}

module attributes {stable_mosaic.version = 11 : i64} {
  func.func @_win_max_kernel(%arg0: i32, %arg1: memref<1x130x128xbf16, #tpu.memory_space<vmem>>, %arg2: memref<1x80x128xbf16, #tpu.memory_space<vmem>>) attributes {dimension_semantics = [#tpu.dimension_semantics<parallel>], iteration_bounds = array<i64: 8>, scalar_prefetch = 0 : i64, scratch_operands = 0 : i64, tpu.core_type = #tpu.core_type<tc>, window_params = [{transform_indices = @transform_0, window_bounds = array<i64: 1, 130, 128>}, {transform_indices = @transform_1, window_bounds = array<i64: 1, 80, 128>}]} {
    %c0 = arith.constant 0 : index
    %c0_0 = arith.constant 0 : index
    %c0_1 = arith.constant 0 : index
    %0 = vector.load %arg1[%c0, %c0_0, %c0_1] : memref<1x130x128xbf16, #tpu.memory_space<vmem>>, vector<1x80x128xbf16>
    %1 = vector.shape_cast %0 : vector<1x80x128xbf16> to vector<80x128xbf16>
    %c0_2 = arith.constant 0 : index
    %c1 = arith.constant 1 : index
    %c0_3 = arith.constant 0 : index
    %2 = vector.load %arg1[%c0_2, %c1, %c0_3] : memref<1x130x128xbf16, #tpu.memory_space<vmem>>, vector<1x80x128xbf16>
    %3 = vector.shape_cast %2 : vector<1x80x128xbf16> to vector<80x128xbf16>
    %4 = arith.maximumf %1, %3 : vector<80x128xbf16>
    %c0_4 = arith.constant 0 : index
    %c2 = arith.constant 2 : index
    %c0_5 = arith.constant 0 : index
    %5 = vector.load %arg1[%c0_4, %c2, %c0_5] : memref<1x130x128xbf16, #tpu.memory_space<vmem>>, vector<1x80x128xbf16>
    %6 = vector.shape_cast %5 : vector<1x80x128xbf16> to vector<80x128xbf16>
    %7 = arith.maximumf %4, %6 : vector<80x128xbf16>
    %c0_6 = arith.constant 0 : index
    %c10 = arith.constant 10 : index
    %c0_7 = arith.constant 0 : index
    %8 = vector.load %arg1[%c0_6, %c10, %c0_7] : memref<1x130x128xbf16, #tpu.memory_space<vmem>>, vector<1x80x128xbf16>
    %9 = vector.shape_cast %8 : vector<1x80x128xbf16> to vector<80x128xbf16>
    %10 = arith.maximumf %7, %9 : vector<80x128xbf16>
    %c0_8 = arith.constant 0 : index
    %c11 = arith.constant 11 : index
    %c0_9 = arith.constant 0 : index
    %11 = vector.load %arg1[%c0_8, %c11, %c0_9] : memref<1x130x128xbf16, #tpu.memory_space<vmem>>, vector<1x80x128xbf16>
    %12 = vector.shape_cast %11 : vector<1x80x128xbf16> to vector<80x128xbf16>
    %13 = arith.maximumf %10, %12 : vector<80x128xbf16>
    %c0_10 = arith.constant 0 : index
    %c12 = arith.constant 12 : index
    %c0_11 = arith.constant 0 : index
    %14 = vector.load %arg1[%c0_10, %c12, %c0_11] : memref<1x130x128xbf16, #tpu.memory_space<vmem>>, vector<1x80x128xbf16>
    %15 = vector.shape_cast %14 : vector<1x80x128xbf16> to vector<80x128xbf16>
    %16 = arith.maximumf %13, %15 : vector<80x128xbf16>
    %c0_12 = arith.constant 0 : index
    %c20 = arith.constant 20 : index
    %c0_13 = arith.constant 0 : index
    %17 = vector.load %arg1[%c0_12, %c20, %c0_13] : memref<1x130x128xbf16, #tpu.memory_space<vmem>>, vector<1x80x128xbf16>
    %18 = vector.shape_cast %17 : vector<1x80x128xbf16> to vector<80x128xbf16>
    %19 = arith.maximumf %16, %18 : vector<80x128xbf16>
    %c0_14 = arith.constant 0 : index
    %c21 = arith.constant 21 : index
    %c0_15 = arith.constant 0 : index
    %20 = vector.load %arg1[%c0_14, %c21, %c0_15] : memref<1x130x128xbf16, #tpu.memory_space<vmem>>, vector<1x80x128xbf16>
    %21 = vector.shape_cast %20 : vector<1x80x128xbf16> to vector<80x128xbf16>
    %22 = arith.maximumf %19, %21 : vector<80x128xbf16>
    %c0_16 = arith.constant 0 : index
    %c22 = arith.constant 22 : index
    %c0_17 = arith.constant 0 : index
    %23 = vector.load %arg1[%c0_16, %c22, %c0_17] : memref<1x130x128xbf16, #tpu.memory_space<vmem>>, vector<1x80x128xbf16>
    %24 = vector.shape_cast %23 : vector<1x80x128xbf16> to vector<80x128xbf16>
    %25 = arith.maximumf %22, %24 : vector<80x128xbf16>
    %c0_18 = arith.constant 0 : index
    %c0_19 = arith.constant 0 : index
    %c0_20 = arith.constant 0 : index
    %26 = vector.load %arg2[%c0_18, %c0_19, %c0_20] : memref<1x80x128xbf16, #tpu.memory_space<vmem>>, vector<1x80x128xbf16>
    %27 = vector.shape_cast %26 : vector<1x80x128xbf16> to vector<80x128xbf16>
    %28 = vector.shape_cast %25 : vector<80x128xbf16> to vector<1x80x128xbf16>
    tpu.vector_store %arg2[%c0_18, %c0_19, %c0_20], %28 {strides = array<i32>} : memref<1x80x128xbf16, #tpu.memory_space<vmem>>, vector<1x80x128xbf16>,
    return
  }
  func.func @transform_0(%arg0: i32) -> (i32, i32, i32) {
    %c0_i32 = arith.constant 0 : i32
    %c0_i32_0 = arith.constant 0 : i32
    %c0_i32_1 = arith.constant 0 : i32
    return %arg0, %c0_i32, %c0_i32_0 : i32, i32, i32
  }
  func.func @transform_1(%arg0: i32) -> (i32, i32, i32) {
    %c0_i32 = arith.constant 0 : i32
    %c0_i32_0 = arith.constant 0 : i32
    %c0_i32_1 = arith.constant 0 : i32
    return %arg0, %c0_i32, %c0_i32_0 : i32, i32, i32
  }
}

module attributes {stable_mosaic.version = 11 : i64} {
  func.func @_mm_bn_kernel(%arg0: i32, %arg1: i32, %arg2: memref<64x128xbf16, #tpu.memory_space<vmem>>, %arg3: memref<128x128xbf16, #tpu.memory_space<vmem>>, %arg4: memref<1x128xf32, #tpu.memory_space<vmem>>, %arg5: memref<64x128xbf16, #tpu.memory_space<vmem>>) attributes {dimension_semantics = [#tpu.dimension_semantics<parallel>, #tpu.dimension_semantics<parallel>], iteration_bounds = array<i64: 2, 1>, scalar_prefetch = 0 : i64, scratch_operands = 0 : i64, tpu.core_type = #tpu.core_type<tc>, window_params = [{transform_indices = @transform_0, window_bounds = array<i64: 64, 128>}, {transform_indices = @transform_1, window_bounds = array<i64: 128, 128>}, {transform_indices = @transform_2, window_bounds = array<i64: 1, 128>}, {transform_indices = @transform_3, window_bounds = array<i64: 64, 128>}]} {
    %c0 = arith.constant 0 : index
    %c0_0 = arith.constant 0 : index
    %0 = vector.load %arg2[%c0, %c0_0] : memref<64x128xbf16, #tpu.memory_space<vmem>>, vector<64x128xbf16>
    %c0_1 = arith.constant 0 : index
    %c0_2 = arith.constant 0 : index
    %1 = vector.load %arg3[%c0_1, %c0_2] : memref<128x128xbf16, #tpu.memory_space<vmem>>, vector<128x128xbf16>
    %cst = arith.constant dense<0.000000e+00> : vector<64x128xf32>
    %2 = tpu.matmul %0, %1, %cst {dimension_numbers = #tpu.dot_dimension_numbers<[1], [0], [0], [1], [0, 0, 1, 1], [], []>} : vector<64x128xbf16>, vector<128x128xbf16>, vector<64x128xf32> -> vector<64x128xf32>
    %c0_3 = arith.constant 0 : index
    %c0_4 = arith.constant 0 : index
    %3 = vector.load %arg4[%c0_3, %c0_4] : memref<1x128xf32, #tpu.memory_space<vmem>>, vector<1x128xf32>
    %4 = vector.broadcast %3 : vector<1x128xf32> to vector<64x128xf32>
    %5 = arith.addf %2, %4 : vector<64x128xf32>
    %cst_5 = arith.constant 0.000000e+00 : f32
    %6 = vector.broadcast %cst_5 : f32 to vector<64x128xf32>
    %7 = arith.maximumf %5, %6 : vector<64x128xf32>
    %8 = arith.truncf %7 : vector<64x128xf32> to vector<64x128xbf16>
    %c0_6 = arith.constant 0 : index
    %c0_7 = arith.constant 0 : index
    %9 = vector.load %arg5[%c0_6, %c0_7] : memref<64x128xbf16, #tpu.memory_space<vmem>>, vector<64x128xbf16>
    tpu.vector_store %arg5[%c0_6, %c0_7], %8 {strides = array<i32>} : memref<64x128xbf16, #tpu.memory_space<vmem>>, vector<64x128xbf16>,
    return
  }
  func.func @transform_0(%arg0: i32, %arg1: i32) -> (i32, i32) {
    %c0_i32 = arith.constant 0 : i32
    %c0_i32_0 = arith.constant 0 : i32
    return %arg0, %c0_i32 : i32, i32
  }
  func.func @transform_1(%arg0: i32, %arg1: i32) -> (i32, i32) {
    %c0_i32 = arith.constant 0 : i32
    %c0_i32_0 = arith.constant 0 : i32
    return %c0_i32, %arg1 : i32, i32
  }
  func.func @transform_2(%arg0: i32, %arg1: i32) -> (i32, i32) {
    %c0_i32 = arith.constant 0 : i32
    %c0_i32_0 = arith.constant 0 : i32
    return %c0_i32, %arg1 : i32, i32
  }
  func.func @transform_3(%arg0: i32, %arg1: i32) -> (i32, i32) {
    %c0_i32 = arith.constant 0 : i32
    return %arg0, %arg1 : i32, i32
  }
}

module attributes {stable_mosaic.version = 11 : i64} {
  func.func @_mm_bn_kernel(%arg0: i32, %arg1: i32, %arg2: memref<64x128xbf16, #tpu.memory_space<vmem>>, %arg3: memref<128x128xbf16, #tpu.memory_space<vmem>>, %arg4: memref<1x128xf32, #tpu.memory_space<vmem>>, %arg5: memref<64x128xbf16, #tpu.memory_space<vmem>>) attributes {dimension_semantics = [#tpu.dimension_semantics<parallel>, #tpu.dimension_semantics<parallel>], iteration_bounds = array<i64: 2, 1>, scalar_prefetch = 0 : i64, scratch_operands = 0 : i64, tpu.core_type = #tpu.core_type<tc>, window_params = [{transform_indices = @transform_0, window_bounds = array<i64: 64, 128>}, {transform_indices = @transform_1, window_bounds = array<i64: 128, 128>}, {transform_indices = @transform_2, window_bounds = array<i64: 1, 128>}, {transform_indices = @transform_3, window_bounds = array<i64: 64, 128>}]} {
    %c0 = arith.constant 0 : index
    %c0_0 = arith.constant 0 : index
    %0 = vector.load %arg2[%c0, %c0_0] : memref<64x128xbf16, #tpu.memory_space<vmem>>, vector<64x128xbf16>
    %c0_1 = arith.constant 0 : index
    %c0_2 = arith.constant 0 : index
    %1 = vector.load %arg3[%c0_1, %c0_2] : memref<128x128xbf16, #tpu.memory_space<vmem>>, vector<128x128xbf16>
    %cst = arith.constant dense<0.000000e+00> : vector<64x128xf32>
    %2 = tpu.matmul %0, %1, %cst {dimension_numbers = #tpu.dot_dimension_numbers<[1], [0], [0], [1], [0, 0, 1, 1], [], []>} : vector<64x128xbf16>, vector<128x128xbf16>, vector<64x128xf32> -> vector<64x128xf32>
    %c0_3 = arith.constant 0 : index
    %c0_4 = arith.constant 0 : index
    %3 = vector.load %arg4[%c0_3, %c0_4] : memref<1x128xf32, #tpu.memory_space<vmem>>, vector<1x128xf32>
    %4 = vector.broadcast %3 : vector<1x128xf32> to vector<64x128xf32>
    %5 = arith.addf %2, %4 : vector<64x128xf32>
    %6 = arith.truncf %5 : vector<64x128xf32> to vector<64x128xbf16>
    %c0_5 = arith.constant 0 : index
    %c0_6 = arith.constant 0 : index
    %7 = vector.load %arg5[%c0_5, %c0_6] : memref<64x128xbf16, #tpu.memory_space<vmem>>, vector<64x128xbf16>
    tpu.vector_store %arg5[%c0_5, %c0_6], %6 {strides = array<i32>} : memref<64x128xbf16, #tpu.memory_space<vmem>>, vector<64x128xbf16>,
    return
  }
  func.func @transform_0(%arg0: i32, %arg1: i32) -> (i32, i32) {
    %c0_i32 = arith.constant 0 : i32
    %c0_i32_0 = arith.constant 0 : i32
    return %arg0, %c0_i32 : i32, i32
  }
  func.func @transform_1(%arg0: i32, %arg1: i32) -> (i32, i32) {
    %c0_i32 = arith.constant 0 : i32
    %c0_i32_0 = arith.constant 0 : i32
    return %c0_i32, %arg1 : i32, i32
  }
  func.func @transform_2(%arg0: i32, %arg1: i32) -> (i32, i32) {
    %c0_i32 = arith.constant 0 : i32
    %c0_i32_0 = arith.constant 0 : i32
    return %c0_i32, %arg1 : i32, i32
  }
  func.func @transform_3(%arg0: i32, %arg1: i32) -> (i32, i32) {
    %c0_i32 = arith.constant 0 : i32
    return %arg0, %arg1 : i32, i32
  }
}

module attributes {stable_mosaic.version = 11 : i64} {
  func.func @_mm_bn_res_kernel(%arg0: i32, %arg1: i32, %arg2: memref<64x128xbf16, #tpu.memory_space<vmem>>, %arg3: memref<128x128xbf16, #tpu.memory_space<vmem>>, %arg4: memref<1x128xf32, #tpu.memory_space<vmem>>, %arg5: memref<64x128xbf16, #tpu.memory_space<vmem>>, %arg6: memref<64x128xbf16, #tpu.memory_space<vmem>>) attributes {dimension_semantics = [#tpu.dimension_semantics<parallel>, #tpu.dimension_semantics<parallel>], iteration_bounds = array<i64: 2, 1>, scalar_prefetch = 0 : i64, scratch_operands = 0 : i64, tpu.core_type = #tpu.core_type<tc>, window_params = [{transform_indices = @transform_0, window_bounds = array<i64: 64, 128>}, {transform_indices = @transform_1, window_bounds = array<i64: 128, 128>}, {transform_indices = @transform_2, window_bounds = array<i64: 1, 128>}, {transform_indices = @transform_3, window_bounds = array<i64: 64, 128>}, {transform_indices = @transform_4, window_bounds = array<i64: 64, 128>}]} {
    %c0 = arith.constant 0 : index
    %c0_0 = arith.constant 0 : index
    %0 = vector.load %arg2[%c0, %c0_0] : memref<64x128xbf16, #tpu.memory_space<vmem>>, vector<64x128xbf16>
    %c0_1 = arith.constant 0 : index
    %c0_2 = arith.constant 0 : index
    %1 = vector.load %arg3[%c0_1, %c0_2] : memref<128x128xbf16, #tpu.memory_space<vmem>>, vector<128x128xbf16>
    %cst = arith.constant dense<0.000000e+00> : vector<64x128xf32>
    %2 = tpu.matmul %0, %1, %cst {dimension_numbers = #tpu.dot_dimension_numbers<[1], [0], [0], [1], [0, 0, 1, 1], [], []>} : vector<64x128xbf16>, vector<128x128xbf16>, vector<64x128xf32> -> vector<64x128xf32>
    %c0_3 = arith.constant 0 : index
    %c0_4 = arith.constant 0 : index
    %3 = vector.load %arg4[%c0_3, %c0_4] : memref<1x128xf32, #tpu.memory_space<vmem>>, vector<1x128xf32>
    %4 = vector.broadcast %3 : vector<1x128xf32> to vector<64x128xf32>
    %5 = arith.addf %2, %4 : vector<64x128xf32>
    %c0_5 = arith.constant 0 : index
    %c0_6 = arith.constant 0 : index
    %6 = vector.load %arg5[%c0_5, %c0_6] : memref<64x128xbf16, #tpu.memory_space<vmem>>, vector<64x128xbf16>
    %7 = arith.extf %6 : vector<64x128xbf16> to vector<64x128xf32>
    %8 = arith.addf %5, %7 : vector<64x128xf32>
    %cst_7 = arith.constant 0.000000e+00 : f32
    %9 = vector.broadcast %cst_7 : f32 to vector<64x128xf32>
    %10 = arith.maximumf %8, %9 : vector<64x128xf32>
    %11 = arith.truncf %10 : vector<64x128xf32> to vector<64x128xbf16>
    %c0_8 = arith.constant 0 : index
    %c0_9 = arith.constant 0 : index
    %12 = vector.load %arg6[%c0_8, %c0_9] : memref<64x128xbf16, #tpu.memory_space<vmem>>, vector<64x128xbf16>
    tpu.vector_store %arg6[%c0_8, %c0_9], %11 {strides = array<i32>} : memref<64x128xbf16, #tpu.memory_space<vmem>>, vector<64x128xbf16>,
    return
  }
  func.func @transform_0(%arg0: i32, %arg1: i32) -> (i32, i32) {
    %c0_i32 = arith.constant 0 : i32
    %c0_i32_0 = arith.constant 0 : i32
    return %arg0, %c0_i32 : i32, i32
  }
  func.func @transform_1(%arg0: i32, %arg1: i32) -> (i32, i32) {
    %c0_i32 = arith.constant 0 : i32
    %c0_i32_0 = arith.constant 0 : i32
    return %c0_i32, %arg1 : i32, i32
  }
  func.func @transform_2(%arg0: i32, %arg1: i32) -> (i32, i32) {
    %c0_i32 = arith.constant 0 : i32
    %c0_i32_0 = arith.constant 0 : i32
    return %c0_i32, %arg1 : i32, i32
  }
  func.func @transform_3(%arg0: i32, %arg1: i32) -> (i32, i32) {
    %c0_i32 = arith.constant 0 : i32
    return %arg0, %arg1 : i32, i32
  }
  func.func @transform_4(%arg0: i32, %arg1: i32) -> (i32, i32) {
    %c0_i32 = arith.constant 0 : i32
    return %arg0, %arg1 : i32, i32
  }
}

module attributes {stable_mosaic.version = 11 : i64} {
  func.func @_win_conv_kernel(%arg0: i32, %arg1: memref<1x54x128xbf16, #tpu.memory_space<vmem>>, %arg2: memref<9x128x128xbf16, #tpu.memory_space<vmem>>, %arg3: memref<1x128xf32, #tpu.memory_space<vmem>>, %arg4: memref<1x24x128xbf16, #tpu.memory_space<vmem>>) attributes {dimension_semantics = [#tpu.dimension_semantics<parallel>], iteration_bounds = array<i64: 8>, scalar_prefetch = 0 : i64, scratch_operands = 0 : i64, tpu.core_type = #tpu.core_type<tc>, window_params = [{transform_indices = @transform_0, window_bounds = array<i64: 1, 54, 128>}, {pipeline_mode = #tpu.pipeline_mode<synchronous>, transform_indices = @transform_1, window_bounds = array<i64: 9, 128, 128>}, {pipeline_mode = #tpu.pipeline_mode<synchronous>, transform_indices = @transform_2, window_bounds = array<i64: 1, 128>}, {transform_indices = @transform_3, window_bounds = array<i64: 1, 24, 128>}]} {
    %cst = arith.constant 0.000000e+00 : f32
    %0 = vector.broadcast %cst : f32 to vector<24x128xf32>
    %c0 = arith.constant 0 : index
    %c0_0 = arith.constant 0 : index
    %c0_1 = arith.constant 0 : index
    %1 = vector.load %arg1[%c0, %c0_0, %c0_1] : memref<1x54x128xbf16, #tpu.memory_space<vmem>>, vector<1x24x128xbf16>
    %2 = vector.shape_cast %1 : vector<1x24x128xbf16> to vector<24x128xbf16>
    %c0_2 = arith.constant 0 : index
    %c0_3 = arith.constant 0 : index
    %c0_4 = arith.constant 0 : index
    %3 = vector.load %arg2[%c0_2, %c0_3, %c0_4] : memref<9x128x128xbf16, #tpu.memory_space<vmem>>, vector<1x128x128xbf16>
    %4 = vector.shape_cast %3 : vector<1x128x128xbf16> to vector<128x128xbf16>
    %cst_5 = arith.constant dense<0.000000e+00> : vector<24x128xf32>
    %5 = tpu.matmul %2, %4, %cst_5 {dimension_numbers = #tpu.dot_dimension_numbers<[1], [0], [0], [1], [0, 0, 1, 1], [], []>} : vector<24x128xbf16>, vector<128x128xbf16>, vector<24x128xf32> -> vector<24x128xf32>
    %6 = arith.addf %0, %5 : vector<24x128xf32>
    %c0_6 = arith.constant 0 : index
    %c1 = arith.constant 1 : index
    %c0_7 = arith.constant 0 : index
    %7 = vector.load %arg1[%c0_6, %c1, %c0_7] : memref<1x54x128xbf16, #tpu.memory_space<vmem>>, vector<1x24x128xbf16>
    %8 = vector.shape_cast %7 : vector<1x24x128xbf16> to vector<24x128xbf16>
    %c1_8 = arith.constant 1 : index
    %c0_9 = arith.constant 0 : index
    %c0_10 = arith.constant 0 : index
    %9 = vector.load %arg2[%c1_8, %c0_9, %c0_10] : memref<9x128x128xbf16, #tpu.memory_space<vmem>>, vector<1x128x128xbf16>
    %10 = vector.shape_cast %9 : vector<1x128x128xbf16> to vector<128x128xbf16>
    %cst_11 = arith.constant dense<0.000000e+00> : vector<24x128xf32>
    %11 = tpu.matmul %8, %10, %cst_11 {dimension_numbers = #tpu.dot_dimension_numbers<[1], [0], [0], [1], [0, 0, 1, 1], [], []>} : vector<24x128xbf16>, vector<128x128xbf16>, vector<24x128xf32> -> vector<24x128xf32>
    %12 = arith.addf %6, %11 : vector<24x128xf32>
    %c0_12 = arith.constant 0 : index
    %c2 = arith.constant 2 : index
    %c0_13 = arith.constant 0 : index
    %13 = vector.load %arg1[%c0_12, %c2, %c0_13] : memref<1x54x128xbf16, #tpu.memory_space<vmem>>, vector<1x24x128xbf16>
    %14 = vector.shape_cast %13 : vector<1x24x128xbf16> to vector<24x128xbf16>
    %c2_14 = arith.constant 2 : index
    %c0_15 = arith.constant 0 : index
    %c0_16 = arith.constant 0 : index
    %15 = vector.load %arg2[%c2_14, %c0_15, %c0_16] : memref<9x128x128xbf16, #tpu.memory_space<vmem>>, vector<1x128x128xbf16>
    %16 = vector.shape_cast %15 : vector<1x128x128xbf16> to vector<128x128xbf16>
    %cst_17 = arith.constant dense<0.000000e+00> : vector<24x128xf32>
    %17 = tpu.matmul %14, %16, %cst_17 {dimension_numbers = #tpu.dot_dimension_numbers<[1], [0], [0], [1], [0, 0, 1, 1], [], []>} : vector<24x128xbf16>, vector<128x128xbf16>, vector<24x128xf32> -> vector<24x128xf32>
    %18 = arith.addf %12, %17 : vector<24x128xf32>
    %c0_18 = arith.constant 0 : index
    %c6 = arith.constant 6 : index
    %c0_19 = arith.constant 0 : index
    %19 = vector.load %arg1[%c0_18, %c6, %c0_19] : memref<1x54x128xbf16, #tpu.memory_space<vmem>>, vector<1x24x128xbf16>
    %20 = vector.shape_cast %19 : vector<1x24x128xbf16> to vector<24x128xbf16>
    %c3 = arith.constant 3 : index
    %c0_20 = arith.constant 0 : index
    %c0_21 = arith.constant 0 : index
    %21 = vector.load %arg2[%c3, %c0_20, %c0_21] : memref<9x128x128xbf16, #tpu.memory_space<vmem>>, vector<1x128x128xbf16>
    %22 = vector.shape_cast %21 : vector<1x128x128xbf16> to vector<128x128xbf16>
    %cst_22 = arith.constant dense<0.000000e+00> : vector<24x128xf32>
    %23 = tpu.matmul %20, %22, %cst_22 {dimension_numbers = #tpu.dot_dimension_numbers<[1], [0], [0], [1], [0, 0, 1, 1], [], []>} : vector<24x128xbf16>, vector<128x128xbf16>, vector<24x128xf32> -> vector<24x128xf32>
    %24 = arith.addf %18, %23 : vector<24x128xf32>
    %c0_23 = arith.constant 0 : index
    %c7 = arith.constant 7 : index
    %c0_24 = arith.constant 0 : index
    %25 = vector.load %arg1[%c0_23, %c7, %c0_24] : memref<1x54x128xbf16, #tpu.memory_space<vmem>>, vector<1x24x128xbf16>
    %26 = vector.shape_cast %25 : vector<1x24x128xbf16> to vector<24x128xbf16>
    %c4 = arith.constant 4 : index
    %c0_25 = arith.constant 0 : index
    %c0_26 = arith.constant 0 : index
    %27 = vector.load %arg2[%c4, %c0_25, %c0_26] : memref<9x128x128xbf16, #tpu.memory_space<vmem>>, vector<1x128x128xbf16>
    %28 = vector.shape_cast %27 : vector<1x128x128xbf16> to vector<128x128xbf16>
    %cst_27 = arith.constant dense<0.000000e+00> : vector<24x128xf32>
    %29 = tpu.matmul %26, %28, %cst_27 {dimension_numbers = #tpu.dot_dimension_numbers<[1], [0], [0], [1], [0, 0, 1, 1], [], []>} : vector<24x128xbf16>, vector<128x128xbf16>, vector<24x128xf32> -> vector<24x128xf32>
    %30 = arith.addf %24, %29 : vector<24x128xf32>
    %c0_28 = arith.constant 0 : index
    %c8 = arith.constant 8 : index
    %c0_29 = arith.constant 0 : index
    %31 = vector.load %arg1[%c0_28, %c8, %c0_29] : memref<1x54x128xbf16, #tpu.memory_space<vmem>>, vector<1x24x128xbf16>
    %32 = vector.shape_cast %31 : vector<1x24x128xbf16> to vector<24x128xbf16>
    %c5 = arith.constant 5 : index
    %c0_30 = arith.constant 0 : index
    %c0_31 = arith.constant 0 : index
    %33 = vector.load %arg2[%c5, %c0_30, %c0_31] : memref<9x128x128xbf16, #tpu.memory_space<vmem>>, vector<1x128x128xbf16>
    %34 = vector.shape_cast %33 : vector<1x128x128xbf16> to vector<128x128xbf16>
    %cst_32 = arith.constant dense<0.000000e+00> : vector<24x128xf32>
    %35 = tpu.matmul %32, %34, %cst_32 {dimension_numbers = #tpu.dot_dimension_numbers<[1], [0], [0], [1], [0, 0, 1, 1], [], []>} : vector<24x128xbf16>, vector<128x128xbf16>, vector<24x128xf32> -> vector<24x128xf32>
    %36 = arith.addf %30, %35 : vector<24x128xf32>
    %c0_33 = arith.constant 0 : index
    %c12 = arith.constant 12 : index
    %c0_34 = arith.constant 0 : index
    %37 = vector.load %arg1[%c0_33, %c12, %c0_34] : memref<1x54x128xbf16, #tpu.memory_space<vmem>>, vector<1x24x128xbf16>
    %38 = vector.shape_cast %37 : vector<1x24x128xbf16> to vector<24x128xbf16>
    %c6_35 = arith.constant 6 : index
    %c0_36 = arith.constant 0 : index
    %c0_37 = arith.constant 0 : index
    %39 = vector.load %arg2[%c6_35, %c0_36, %c0_37] : memref<9x128x128xbf16, #tpu.memory_space<vmem>>, vector<1x128x128xbf16>
    %40 = vector.shape_cast %39 : vector<1x128x128xbf16> to vector<128x128xbf16>
    %cst_38 = arith.constant dense<0.000000e+00> : vector<24x128xf32>
    %41 = tpu.matmul %38, %40, %cst_38 {dimension_numbers = #tpu.dot_dimension_numbers<[1], [0], [0], [1], [0, 0, 1, 1], [], []>} : vector<24x128xbf16>, vector<128x128xbf16>, vector<24x128xf32> -> vector<24x128xf32>
    %42 = arith.addf %36, %41 : vector<24x128xf32>
    %c0_39 = arith.constant 0 : index
    %c13 = arith.constant 13 : index
    %c0_40 = arith.constant 0 : index
    %43 = vector.load %arg1[%c0_39, %c13, %c0_40] : memref<1x54x128xbf16, #tpu.memory_space<vmem>>, vector<1x24x128xbf16>
    %44 = vector.shape_cast %43 : vector<1x24x128xbf16> to vector<24x128xbf16>
    %c7_41 = arith.constant 7 : index
    %c0_42 = arith.constant 0 : index
    %c0_43 = arith.constant 0 : index
    %45 = vector.load %arg2[%c7_41, %c0_42, %c0_43] : memref<9x128x128xbf16, #tpu.memory_space<vmem>>, vector<1x128x128xbf16>
    %46 = vector.shape_cast %45 : vector<1x128x128xbf16> to vector<128x128xbf16>
    %cst_44 = arith.constant dense<0.000000e+00> : vector<24x128xf32>
    %47 = tpu.matmul %44, %46, %cst_44 {dimension_numbers = #tpu.dot_dimension_numbers<[1], [0], [0], [1], [0, 0, 1, 1], [], []>} : vector<24x128xbf16>, vector<128x128xbf16>, vector<24x128xf32> -> vector<24x128xf32>
    %48 = arith.addf %42, %47 : vector<24x128xf32>
    %c0_45 = arith.constant 0 : index
    %c14 = arith.constant 14 : index
    %c0_46 = arith.constant 0 : index
    %49 = vector.load %arg1[%c0_45, %c14, %c0_46] : memref<1x54x128xbf16, #tpu.memory_space<vmem>>, vector<1x24x128xbf16>
    %50 = vector.shape_cast %49 : vector<1x24x128xbf16> to vector<24x128xbf16>
    %c8_47 = arith.constant 8 : index
    %c0_48 = arith.constant 0 : index
    %c0_49 = arith.constant 0 : index
    %51 = vector.load %arg2[%c8_47, %c0_48, %c0_49] : memref<9x128x128xbf16, #tpu.memory_space<vmem>>, vector<1x128x128xbf16>
    %52 = vector.shape_cast %51 : vector<1x128x128xbf16> to vector<128x128xbf16>
    %cst_50 = arith.constant dense<0.000000e+00> : vector<24x128xf32>
    %53 = tpu.matmul %50, %52, %cst_50 {dimension_numbers = #tpu.dot_dimension_numbers<[1], [0], [0], [1], [0, 0, 1, 1], [], []>} : vector<24x128xbf16>, vector<128x128xbf16>, vector<24x128xf32> -> vector<24x128xf32>
    %54 = arith.addf %48, %53 : vector<24x128xf32>
    %c0_51 = arith.constant 0 : index
    %c0_52 = arith.constant 0 : index
    %55 = vector.load %arg3[%c0_51, %c0_52] : memref<1x128xf32, #tpu.memory_space<vmem>>, vector<1x128xf32>
    %56 = vector.broadcast %55 : vector<1x128xf32> to vector<24x128xf32>
    %57 = arith.addf %54, %56 : vector<24x128xf32>
    %cst_53 = arith.constant 0.000000e+00 : f32
    %58 = vector.broadcast %cst_53 : f32 to vector<24x128xf32>
    %59 = arith.maximumf %57, %58 : vector<24x128xf32>
    %60 = arith.truncf %59 : vector<24x128xf32> to vector<24x128xbf16>
    %c0_54 = arith.constant 0 : index
    %c0_55 = arith.constant 0 : index
    %c0_56 = arith.constant 0 : index
    %61 = vector.load %arg4[%c0_54, %c0_55, %c0_56] : memref<1x24x128xbf16, #tpu.memory_space<vmem>>, vector<1x24x128xbf16>
    %62 = vector.shape_cast %61 : vector<1x24x128xbf16> to vector<24x128xbf16>
    %63 = vector.shape_cast %60 : vector<24x128xbf16> to vector<1x24x128xbf16>
    tpu.vector_store %arg4[%c0_54, %c0_55, %c0_56], %63 {strides = array<i32>} : memref<1x24x128xbf16, #tpu.memory_space<vmem>>, vector<1x24x128xbf16>,
    return
  }
  func.func @transform_0(%arg0: i32) -> (i32, i32, i32) {
    %c0_i32 = arith.constant 0 : i32
    %c0_i32_0 = arith.constant 0 : i32
    %c0_i32_1 = arith.constant 0 : i32
    return %arg0, %c0_i32, %c0_i32_0 : i32, i32, i32
  }
  func.func @transform_1(%arg0: i32) -> (i32, i32, i32) {
    %c0_i32 = arith.constant 0 : i32
    %c0_i32_0 = arith.constant 0 : i32
    %c0_i32_1 = arith.constant 0 : i32
    %c0_i32_2 = arith.constant 0 : i32
    return %c0_i32, %c0_i32_0, %c0_i32_1 : i32, i32, i32
  }
  func.func @transform_2(%arg0: i32) -> (i32, i32) {
    %c0_i32 = arith.constant 0 : i32
    %c0_i32_0 = arith.constant 0 : i32
    %c0_i32_1 = arith.constant 0 : i32
    return %c0_i32, %c0_i32_0 : i32, i32
  }
  func.func @transform_3(%arg0: i32) -> (i32, i32, i32) {
    %c0_i32 = arith.constant 0 : i32
    %c0_i32_0 = arith.constant 0 : i32
    %c0_i32_1 = arith.constant 0 : i32
    return %arg0, %c0_i32, %c0_i32_0 : i32, i32, i32
  }
}

module attributes {stable_mosaic.version = 11 : i64} {
  func.func @_mm_bn_kernel(%arg0: i32, %arg1: i32, %arg2: memref<16x128xbf16, #tpu.memory_space<vmem>>, %arg3: memref<128x128xbf16, #tpu.memory_space<vmem>>, %arg4: memref<1x128xf32, #tpu.memory_space<vmem>>, %arg5: memref<16x128xbf16, #tpu.memory_space<vmem>>) attributes {dimension_semantics = [#tpu.dimension_semantics<parallel>, #tpu.dimension_semantics<parallel>], iteration_bounds = array<i64: 2, 1>, scalar_prefetch = 0 : i64, scratch_operands = 0 : i64, tpu.core_type = #tpu.core_type<tc>, window_params = [{transform_indices = @transform_0, window_bounds = array<i64: 16, 128>}, {transform_indices = @transform_1, window_bounds = array<i64: 128, 128>}, {transform_indices = @transform_2, window_bounds = array<i64: 1, 128>}, {transform_indices = @transform_3, window_bounds = array<i64: 16, 128>}]} {
    %c0 = arith.constant 0 : index
    %c0_0 = arith.constant 0 : index
    %0 = vector.load %arg2[%c0, %c0_0] : memref<16x128xbf16, #tpu.memory_space<vmem>>, vector<16x128xbf16>
    %c0_1 = arith.constant 0 : index
    %c0_2 = arith.constant 0 : index
    %1 = vector.load %arg3[%c0_1, %c0_2] : memref<128x128xbf16, #tpu.memory_space<vmem>>, vector<128x128xbf16>
    %cst = arith.constant dense<0.000000e+00> : vector<16x128xf32>
    %2 = tpu.matmul %0, %1, %cst {dimension_numbers = #tpu.dot_dimension_numbers<[1], [0], [0], [1], [0, 0, 1, 1], [], []>} : vector<16x128xbf16>, vector<128x128xbf16>, vector<16x128xf32> -> vector<16x128xf32>
    %c0_3 = arith.constant 0 : index
    %c0_4 = arith.constant 0 : index
    %3 = vector.load %arg4[%c0_3, %c0_4] : memref<1x128xf32, #tpu.memory_space<vmem>>, vector<1x128xf32>
    %4 = vector.broadcast %3 : vector<1x128xf32> to vector<16x128xf32>
    %5 = arith.addf %2, %4 : vector<16x128xf32>
    %6 = arith.truncf %5 : vector<16x128xf32> to vector<16x128xbf16>
    %c0_5 = arith.constant 0 : index
    %c0_6 = arith.constant 0 : index
    %7 = vector.load %arg5[%c0_5, %c0_6] : memref<16x128xbf16, #tpu.memory_space<vmem>>, vector<16x128xbf16>
    tpu.vector_store %arg5[%c0_5, %c0_6], %6 {strides = array<i32>} : memref<16x128xbf16, #tpu.memory_space<vmem>>, vector<16x128xbf16>,
    return
  }
  func.func @transform_0(%arg0: i32, %arg1: i32) -> (i32, i32) {
    %c0_i32 = arith.constant 0 : i32
    %c0_i32_0 = arith.constant 0 : i32
    return %arg0, %c0_i32 : i32, i32
  }
  func.func @transform_1(%arg0: i32, %arg1: i32) -> (i32, i32) {
    %c0_i32 = arith.constant 0 : i32
    %c0_i32_0 = arith.constant 0 : i32
    return %c0_i32, %arg1 : i32, i32
  }
  func.func @transform_2(%arg0: i32, %arg1: i32) -> (i32, i32) {
    %c0_i32 = arith.constant 0 : i32
    %c0_i32_0 = arith.constant 0 : i32
    return %c0_i32, %arg1 : i32, i32
  }
  func.func @transform_3(%arg0: i32, %arg1: i32) -> (i32, i32) {
    %c0_i32 = arith.constant 0 : i32
    return %arg0, %arg1 : i32, i32
  }
}

module attributes {stable_mosaic.version = 11 : i64} {
  func.func @_mm_bn_res_kernel(%arg0: i32, %arg1: i32, %arg2: memref<16x128xbf16, #tpu.memory_space<vmem>>, %arg3: memref<128x128xbf16, #tpu.memory_space<vmem>>, %arg4: memref<1x128xf32, #tpu.memory_space<vmem>>, %arg5: memref<16x128xbf16, #tpu.memory_space<vmem>>, %arg6: memref<16x128xbf16, #tpu.memory_space<vmem>>) attributes {dimension_semantics = [#tpu.dimension_semantics<parallel>, #tpu.dimension_semantics<parallel>], iteration_bounds = array<i64: 2, 1>, scalar_prefetch = 0 : i64, scratch_operands = 0 : i64, tpu.core_type = #tpu.core_type<tc>, window_params = [{transform_indices = @transform_0, window_bounds = array<i64: 16, 128>}, {transform_indices = @transform_1, window_bounds = array<i64: 128, 128>}, {transform_indices = @transform_2, window_bounds = array<i64: 1, 128>}, {transform_indices = @transform_3, window_bounds = array<i64: 16, 128>}, {transform_indices = @transform_4, window_bounds = array<i64: 16, 128>}]} {
    %c0 = arith.constant 0 : index
    %c0_0 = arith.constant 0 : index
    %0 = vector.load %arg2[%c0, %c0_0] : memref<16x128xbf16, #tpu.memory_space<vmem>>, vector<16x128xbf16>
    %c0_1 = arith.constant 0 : index
    %c0_2 = arith.constant 0 : index
    %1 = vector.load %arg3[%c0_1, %c0_2] : memref<128x128xbf16, #tpu.memory_space<vmem>>, vector<128x128xbf16>
    %cst = arith.constant dense<0.000000e+00> : vector<16x128xf32>
    %2 = tpu.matmul %0, %1, %cst {dimension_numbers = #tpu.dot_dimension_numbers<[1], [0], [0], [1], [0, 0, 1, 1], [], []>} : vector<16x128xbf16>, vector<128x128xbf16>, vector<16x128xf32> -> vector<16x128xf32>
    %c0_3 = arith.constant 0 : index
    %c0_4 = arith.constant 0 : index
    %3 = vector.load %arg4[%c0_3, %c0_4] : memref<1x128xf32, #tpu.memory_space<vmem>>, vector<1x128xf32>
    %4 = vector.broadcast %3 : vector<1x128xf32> to vector<16x128xf32>
    %5 = arith.addf %2, %4 : vector<16x128xf32>
    %c0_5 = arith.constant 0 : index
    %c0_6 = arith.constant 0 : index
    %6 = vector.load %arg5[%c0_5, %c0_6] : memref<16x128xbf16, #tpu.memory_space<vmem>>, vector<16x128xbf16>
    %7 = arith.extf %6 : vector<16x128xbf16> to vector<16x128xf32>
    %8 = arith.addf %5, %7 : vector<16x128xf32>
    %cst_7 = arith.constant 0.000000e+00 : f32
    %9 = vector.broadcast %cst_7 : f32 to vector<16x128xf32>
    %10 = arith.maximumf %8, %9 : vector<16x128xf32>
    %11 = arith.truncf %10 : vector<16x128xf32> to vector<16x128xbf16>
    %c0_8 = arith.constant 0 : index
    %c0_9 = arith.constant 0 : index
    %12 = vector.load %arg6[%c0_8, %c0_9] : memref<16x128xbf16, #tpu.memory_space<vmem>>, vector<16x128xbf16>
    tpu.vector_store %arg6[%c0_8, %c0_9], %11 {strides = array<i32>} : memref<16x128xbf16, #tpu.memory_space<vmem>>, vector<16x128xbf16>,
    return
  }
  func.func @transform_0(%arg0: i32, %arg1: i32) -> (i32, i32) {
    %c0_i32 = arith.constant 0 : i32
    %c0_i32_0 = arith.constant 0 : i32
    return %arg0, %c0_i32 : i32, i32
  }
  func.func @transform_1(%arg0: i32, %arg1: i32) -> (i32, i32) {
    %c0_i32 = arith.constant 0 : i32
    %c0_i32_0 = arith.constant 0 : i32
    return %c0_i32, %arg1 : i32, i32
  }
  func.func @transform_2(%arg0: i32, %arg1: i32) -> (i32, i32) {
    %c0_i32 = arith.constant 0 : i32
    %c0_i32_0 = arith.constant 0 : i32
    return %c0_i32, %arg1 : i32, i32
  }
  func.func @transform_3(%arg0: i32, %arg1: i32) -> (i32, i32) {
    %c0_i32 = arith.constant 0 : i32
    return %arg0, %arg1 : i32, i32
  }
  func.func @transform_4(%arg0: i32, %arg1: i32) -> (i32, i32) {
    %c0_i32 = arith.constant 0 : i32
    return %arg0, %arg1 : i32, i32
  }
}

module attributes {stable_mosaic.version = 11 : i64} {
  func.func @_mm_bn_kernel(%arg0: i32, %arg1: i32, %arg2: memref<16x128xbf16, #tpu.memory_space<vmem>>, %arg3: memref<128x128xbf16, #tpu.memory_space<vmem>>, %arg4: memref<1x128xf32, #tpu.memory_space<vmem>>, %arg5: memref<16x128xbf16, #tpu.memory_space<vmem>>) attributes {dimension_semantics = [#tpu.dimension_semantics<parallel>, #tpu.dimension_semantics<parallel>], iteration_bounds = array<i64: 2, 1>, scalar_prefetch = 0 : i64, scratch_operands = 0 : i64, tpu.core_type = #tpu.core_type<tc>, window_params = [{transform_indices = @transform_0, window_bounds = array<i64: 16, 128>}, {transform_indices = @transform_1, window_bounds = array<i64: 128, 128>}, {transform_indices = @transform_2, window_bounds = array<i64: 1, 128>}, {transform_indices = @transform_3, window_bounds = array<i64: 16, 128>}]} {
    %c0 = arith.constant 0 : index
    %c0_0 = arith.constant 0 : index
    %0 = vector.load %arg2[%c0, %c0_0] : memref<16x128xbf16, #tpu.memory_space<vmem>>, vector<16x128xbf16>
    %c0_1 = arith.constant 0 : index
    %c0_2 = arith.constant 0 : index
    %1 = vector.load %arg3[%c0_1, %c0_2] : memref<128x128xbf16, #tpu.memory_space<vmem>>, vector<128x128xbf16>
    %cst = arith.constant dense<0.000000e+00> : vector<16x128xf32>
    %2 = tpu.matmul %0, %1, %cst {dimension_numbers = #tpu.dot_dimension_numbers<[1], [0], [0], [1], [0, 0, 1, 1], [], []>} : vector<16x128xbf16>, vector<128x128xbf16>, vector<16x128xf32> -> vector<16x128xf32>
    %c0_3 = arith.constant 0 : index
    %c0_4 = arith.constant 0 : index
    %3 = vector.load %arg4[%c0_3, %c0_4] : memref<1x128xf32, #tpu.memory_space<vmem>>, vector<1x128xf32>
    %4 = vector.broadcast %3 : vector<1x128xf32> to vector<16x128xf32>
    %5 = arith.addf %2, %4 : vector<16x128xf32>
    %cst_5 = arith.constant 0.000000e+00 : f32
    %6 = vector.broadcast %cst_5 : f32 to vector<16x128xf32>
    %7 = arith.maximumf %5, %6 : vector<16x128xf32>
    %8 = arith.truncf %7 : vector<16x128xf32> to vector<16x128xbf16>
    %c0_6 = arith.constant 0 : index
    %c0_7 = arith.constant 0 : index
    %9 = vector.load %arg5[%c0_6, %c0_7] : memref<16x128xbf16, #tpu.memory_space<vmem>>, vector<16x128xbf16>
    tpu.vector_store %arg5[%c0_6, %c0_7], %8 {strides = array<i32>} : memref<16x128xbf16, #tpu.memory_space<vmem>>, vector<16x128xbf16>,
    return
  }
  func.func @transform_0(%arg0: i32, %arg1: i32) -> (i32, i32) {
    %c0_i32 = arith.constant 0 : i32
    %c0_i32_0 = arith.constant 0 : i32
    return %arg0, %c0_i32 : i32, i32
  }
  func.func @transform_1(%arg0: i32, %arg1: i32) -> (i32, i32) {
    %c0_i32 = arith.constant 0 : i32
    %c0_i32_0 = arith.constant 0 : i32
    return %c0_i32, %arg1 : i32, i32
  }
  func.func @transform_2(%arg0: i32, %arg1: i32) -> (i32, i32) {
    %c0_i32 = arith.constant 0 : i32
    %c0_i32_0 = arith.constant 0 : i32
    return %c0_i32, %arg1 : i32, i32
  }
  func.func @transform_3(%arg0: i32, %arg1: i32) -> (i32, i32) {
    %c0_i32 = arith.constant 0 : i32
    return %arg0, %arg1 : i32, i32
  }
}

module attributes {stable_mosaic.version = 11 : i64} {
  func.func @_win_conv_kernel(%arg0: i32, %arg1: memref<1x28x128xbf16, #tpu.memory_space<vmem>>, %arg2: memref<9x128x128xbf16, #tpu.memory_space<vmem>>, %arg3: memref<1x128xf32, #tpu.memory_space<vmem>>, %arg4: memref<1x8x128xbf16, #tpu.memory_space<vmem>>) attributes {dimension_semantics = [#tpu.dimension_semantics<parallel>], iteration_bounds = array<i64: 8>, scalar_prefetch = 0 : i64, scratch_operands = 0 : i64, tpu.core_type = #tpu.core_type<tc>, window_params = [{transform_indices = @transform_0, window_bounds = array<i64: 1, 28, 128>}, {pipeline_mode = #tpu.pipeline_mode<synchronous>, transform_indices = @transform_1, window_bounds = array<i64: 9, 128, 128>}, {pipeline_mode = #tpu.pipeline_mode<synchronous>, transform_indices = @transform_2, window_bounds = array<i64: 1, 128>}, {transform_indices = @transform_3, window_bounds = array<i64: 1, 8, 128>}]} {
    %cst = arith.constant 0.000000e+00 : f32
    %0 = vector.broadcast %cst : f32 to vector<8x128xf32>
    %c0 = arith.constant 0 : index
    %c0_0 = arith.constant 0 : index
    %c0_1 = arith.constant 0 : index
    %1 = vector.load %arg1[%c0, %c0_0, %c0_1] : memref<1x28x128xbf16, #tpu.memory_space<vmem>>, vector<1x8x128xbf16>
    %2 = vector.shape_cast %1 : vector<1x8x128xbf16> to vector<8x128xbf16>
    %c0_2 = arith.constant 0 : index
    %c0_3 = arith.constant 0 : index
    %c0_4 = arith.constant 0 : index
    %3 = vector.load %arg2[%c0_2, %c0_3, %c0_4] : memref<9x128x128xbf16, #tpu.memory_space<vmem>>, vector<1x128x128xbf16>
    %4 = vector.shape_cast %3 : vector<1x128x128xbf16> to vector<128x128xbf16>
    %cst_5 = arith.constant dense<0.000000e+00> : vector<8x128xf32>
    %5 = tpu.matmul %2, %4, %cst_5 {dimension_numbers = #tpu.dot_dimension_numbers<[1], [0], [0], [1], [0, 0, 1, 1], [], []>} : vector<8x128xbf16>, vector<128x128xbf16>, vector<8x128xf32> -> vector<8x128xf32>
    %6 = arith.addf %0, %5 : vector<8x128xf32>
    %c0_6 = arith.constant 0 : index
    %c1 = arith.constant 1 : index
    %c0_7 = arith.constant 0 : index
    %7 = vector.load %arg1[%c0_6, %c1, %c0_7] : memref<1x28x128xbf16, #tpu.memory_space<vmem>>, vector<1x8x128xbf16>
    %8 = vector.shape_cast %7 : vector<1x8x128xbf16> to vector<8x128xbf16>
    %c1_8 = arith.constant 1 : index
    %c0_9 = arith.constant 0 : index
    %c0_10 = arith.constant 0 : index
    %9 = vector.load %arg2[%c1_8, %c0_9, %c0_10] : memref<9x128x128xbf16, #tpu.memory_space<vmem>>, vector<1x128x128xbf16>
    %10 = vector.shape_cast %9 : vector<1x128x128xbf16> to vector<128x128xbf16>
    %cst_11 = arith.constant dense<0.000000e+00> : vector<8x128xf32>
    %11 = tpu.matmul %8, %10, %cst_11 {dimension_numbers = #tpu.dot_dimension_numbers<[1], [0], [0], [1], [0, 0, 1, 1], [], []>} : vector<8x128xbf16>, vector<128x128xbf16>, vector<8x128xf32> -> vector<8x128xf32>
    %12 = arith.addf %6, %11 : vector<8x128xf32>
    %c0_12 = arith.constant 0 : index
    %c2 = arith.constant 2 : index
    %c0_13 = arith.constant 0 : index
    %13 = vector.load %arg1[%c0_12, %c2, %c0_13] : memref<1x28x128xbf16, #tpu.memory_space<vmem>>, vector<1x8x128xbf16>
    %14 = vector.shape_cast %13 : vector<1x8x128xbf16> to vector<8x128xbf16>
    %c2_14 = arith.constant 2 : index
    %c0_15 = arith.constant 0 : index
    %c0_16 = arith.constant 0 : index
    %15 = vector.load %arg2[%c2_14, %c0_15, %c0_16] : memref<9x128x128xbf16, #tpu.memory_space<vmem>>, vector<1x128x128xbf16>
    %16 = vector.shape_cast %15 : vector<1x128x128xbf16> to vector<128x128xbf16>
    %cst_17 = arith.constant dense<0.000000e+00> : vector<8x128xf32>
    %17 = tpu.matmul %14, %16, %cst_17 {dimension_numbers = #tpu.dot_dimension_numbers<[1], [0], [0], [1], [0, 0, 1, 1], [], []>} : vector<8x128xbf16>, vector<128x128xbf16>, vector<8x128xf32> -> vector<8x128xf32>
    %18 = arith.addf %12, %17 : vector<8x128xf32>
    %c0_18 = arith.constant 0 : index
    %c4 = arith.constant 4 : index
    %c0_19 = arith.constant 0 : index
    %19 = vector.load %arg1[%c0_18, %c4, %c0_19] : memref<1x28x128xbf16, #tpu.memory_space<vmem>>, vector<1x8x128xbf16>
    %20 = vector.shape_cast %19 : vector<1x8x128xbf16> to vector<8x128xbf16>
    %c3 = arith.constant 3 : index
    %c0_20 = arith.constant 0 : index
    %c0_21 = arith.constant 0 : index
    %21 = vector.load %arg2[%c3, %c0_20, %c0_21] : memref<9x128x128xbf16, #tpu.memory_space<vmem>>, vector<1x128x128xbf16>
    %22 = vector.shape_cast %21 : vector<1x128x128xbf16> to vector<128x128xbf16>
    %cst_22 = arith.constant dense<0.000000e+00> : vector<8x128xf32>
    %23 = tpu.matmul %20, %22, %cst_22 {dimension_numbers = #tpu.dot_dimension_numbers<[1], [0], [0], [1], [0, 0, 1, 1], [], []>} : vector<8x128xbf16>, vector<128x128xbf16>, vector<8x128xf32> -> vector<8x128xf32>
    %24 = arith.addf %18, %23 : vector<8x128xf32>
    %c0_23 = arith.constant 0 : index
    %c5 = arith.constant 5 : index
    %c0_24 = arith.constant 0 : index
    %25 = vector.load %arg1[%c0_23, %c5, %c0_24] : memref<1x28x128xbf16, #tpu.memory_space<vmem>>, vector<1x8x128xbf16>
    %26 = vector.shape_cast %25 : vector<1x8x128xbf16> to vector<8x128xbf16>
    %c4_25 = arith.constant 4 : index
    %c0_26 = arith.constant 0 : index
    %c0_27 = arith.constant 0 : index
    %27 = vector.load %arg2[%c4_25, %c0_26, %c0_27] : memref<9x128x128xbf16, #tpu.memory_space<vmem>>, vector<1x128x128xbf16>
    %28 = vector.shape_cast %27 : vector<1x128x128xbf16> to vector<128x128xbf16>
    %cst_28 = arith.constant dense<0.000000e+00> : vector<8x128xf32>
    %29 = tpu.matmul %26, %28, %cst_28 {dimension_numbers = #tpu.dot_dimension_numbers<[1], [0], [0], [1], [0, 0, 1, 1], [], []>} : vector<8x128xbf16>, vector<128x128xbf16>, vector<8x128xf32> -> vector<8x128xf32>
    %30 = arith.addf %24, %29 : vector<8x128xf32>
    %c0_29 = arith.constant 0 : index
    %c6 = arith.constant 6 : index
    %c0_30 = arith.constant 0 : index
    %31 = vector.load %arg1[%c0_29, %c6, %c0_30] : memref<1x28x128xbf16, #tpu.memory_space<vmem>>, vector<1x8x128xbf16>
    %32 = vector.shape_cast %31 : vector<1x8x128xbf16> to vector<8x128xbf16>
    %c5_31 = arith.constant 5 : index
    %c0_32 = arith.constant 0 : index
    %c0_33 = arith.constant 0 : index
    %33 = vector.load %arg2[%c5_31, %c0_32, %c0_33] : memref<9x128x128xbf16, #tpu.memory_space<vmem>>, vector<1x128x128xbf16>
    %34 = vector.shape_cast %33 : vector<1x128x128xbf16> to vector<128x128xbf16>
    %cst_34 = arith.constant dense<0.000000e+00> : vector<8x128xf32>
    %35 = tpu.matmul %32, %34, %cst_34 {dimension_numbers = #tpu.dot_dimension_numbers<[1], [0], [0], [1], [0, 0, 1, 1], [], []>} : vector<8x128xbf16>, vector<128x128xbf16>, vector<8x128xf32> -> vector<8x128xf32>
    %36 = arith.addf %30, %35 : vector<8x128xf32>
    %c0_35 = arith.constant 0 : index
    %c8 = arith.constant 8 : index
    %c0_36 = arith.constant 0 : index
    %37 = vector.load %arg1[%c0_35, %c8, %c0_36] : memref<1x28x128xbf16, #tpu.memory_space<vmem>>, vector<1x8x128xbf16>
    %38 = vector.shape_cast %37 : vector<1x8x128xbf16> to vector<8x128xbf16>
    %c6_37 = arith.constant 6 : index
    %c0_38 = arith.constant 0 : index
    %c0_39 = arith.constant 0 : index
    %39 = vector.load %arg2[%c6_37, %c0_38, %c0_39] : memref<9x128x128xbf16, #tpu.memory_space<vmem>>, vector<1x128x128xbf16>
    %40 = vector.shape_cast %39 : vector<1x128x128xbf16> to vector<128x128xbf16>
    %cst_40 = arith.constant dense<0.000000e+00> : vector<8x128xf32>
    %41 = tpu.matmul %38, %40, %cst_40 {dimension_numbers = #tpu.dot_dimension_numbers<[1], [0], [0], [1], [0, 0, 1, 1], [], []>} : vector<8x128xbf16>, vector<128x128xbf16>, vector<8x128xf32> -> vector<8x128xf32>
    %42 = arith.addf %36, %41 : vector<8x128xf32>
    %c0_41 = arith.constant 0 : index
    %c9 = arith.constant 9 : index
    %c0_42 = arith.constant 0 : index
    %43 = vector.load %arg1[%c0_41, %c9, %c0_42] : memref<1x28x128xbf16, #tpu.memory_space<vmem>>, vector<1x8x128xbf16>
    %44 = vector.shape_cast %43 : vector<1x8x128xbf16> to vector<8x128xbf16>
    %c7 = arith.constant 7 : index
    %c0_43 = arith.constant 0 : index
    %c0_44 = arith.constant 0 : index
    %45 = vector.load %arg2[%c7, %c0_43, %c0_44] : memref<9x128x128xbf16, #tpu.memory_space<vmem>>, vector<1x128x128xbf16>
    %46 = vector.shape_cast %45 : vector<1x128x128xbf16> to vector<128x128xbf16>
    %cst_45 = arith.constant dense<0.000000e+00> : vector<8x128xf32>
    %47 = tpu.matmul %44, %46, %cst_45 {dimension_numbers = #tpu.dot_dimension_numbers<[1], [0], [0], [1], [0, 0, 1, 1], [], []>} : vector<8x128xbf16>, vector<128x128xbf16>, vector<8x128xf32> -> vector<8x128xf32>
    %48 = arith.addf %42, %47 : vector<8x128xf32>
    %c0_46 = arith.constant 0 : index
    %c10 = arith.constant 10 : index
    %c0_47 = arith.constant 0 : index
    %49 = vector.load %arg1[%c0_46, %c10, %c0_47] : memref<1x28x128xbf16, #tpu.memory_space<vmem>>, vector<1x8x128xbf16>
    %50 = vector.shape_cast %49 : vector<1x8x128xbf16> to vector<8x128xbf16>
    %c8_48 = arith.constant 8 : index
    %c0_49 = arith.constant 0 : index
    %c0_50 = arith.constant 0 : index
    %51 = vector.load %arg2[%c8_48, %c0_49, %c0_50] : memref<9x128x128xbf16, #tpu.memory_space<vmem>>, vector<1x128x128xbf16>
    %52 = vector.shape_cast %51 : vector<1x128x128xbf16> to vector<128x128xbf16>
    %cst_51 = arith.constant dense<0.000000e+00> : vector<8x128xf32>
    %53 = tpu.matmul %50, %52, %cst_51 {dimension_numbers = #tpu.dot_dimension_numbers<[1], [0], [0], [1], [0, 0, 1, 1], [], []>} : vector<8x128xbf16>, vector<128x128xbf16>, vector<8x128xf32> -> vector<8x128xf32>
    %54 = arith.addf %48, %53 : vector<8x128xf32>
    %c0_52 = arith.constant 0 : index
    %c0_53 = arith.constant 0 : index
    %55 = vector.load %arg3[%c0_52, %c0_53] : memref<1x128xf32, #tpu.memory_space<vmem>>, vector<1x128xf32>
    %56 = vector.broadcast %55 : vector<1x128xf32> to vector<8x128xf32>
    %57 = arith.addf %54, %56 : vector<8x128xf32>
    %cst_54 = arith.constant 0.000000e+00 : f32
    %58 = vector.broadcast %cst_54 : f32 to vector<8x128xf32>
    %59 = arith.maximumf %57, %58 : vector<8x128xf32>
    %60 = arith.truncf %59 : vector<8x128xf32> to vector<8x128xbf16>
    %c0_55 = arith.constant 0 : index
    %c0_56 = arith.constant 0 : index
    %c0_57 = arith.constant 0 : index
    %61 = vector.load %arg4[%c0_55, %c0_56, %c0_57] : memref<1x8x128xbf16, #tpu.memory_space<vmem>>, vector<1x8x128xbf16>
    %62 = vector.shape_cast %61 : vector<1x8x128xbf16> to vector<8x128xbf16>
    %63 = vector.shape_cast %60 : vector<8x128xbf16> to vector<1x8x128xbf16>
    tpu.vector_store %arg4[%c0_55, %c0_56, %c0_57], %63 {strides = array<i32>} : memref<1x8x128xbf16, #tpu.memory_space<vmem>>, vector<1x8x128xbf16>,
    return
  }
  func.func @transform_0(%arg0: i32) -> (i32, i32, i32) {
    %c0_i32 = arith.constant 0 : i32
    %c0_i32_0 = arith.constant 0 : i32
    %c0_i32_1 = arith.constant 0 : i32
    return %arg0, %c0_i32, %c0_i32_0 : i32, i32, i32
  }
  func.func @transform_1(%arg0: i32) -> (i32, i32, i32) {
    %c0_i32 = arith.constant 0 : i32
    %c0_i32_0 = arith.constant 0 : i32
    %c0_i32_1 = arith.constant 0 : i32
    %c0_i32_2 = arith.constant 0 : i32
    return %c0_i32, %c0_i32_0, %c0_i32_1 : i32, i32, i32
  }
  func.func @transform_2(%arg0: i32) -> (i32, i32) {
    %c0_i32 = arith.constant 0 : i32
    %c0_i32_0 = arith.constant 0 : i32
    %c0_i32_1 = arith.constant 0 : i32
    return %c0_i32, %c0_i32_0 : i32, i32
  }
  func.func @transform_3(%arg0: i32) -> (i32, i32, i32) {
    %c0_i32 = arith.constant 0 : i32
    %c0_i32_0 = arith.constant 0 : i32
    %c0_i32_1 = arith.constant 0 : i32
    return %arg0, %c0_i32, %c0_i32_0 : i32, i32, i32
  }
}

module attributes {stable_mosaic.version = 11 : i64} {
  func.func @_mm_bn_kernel(%arg0: i32, %arg1: i32, %arg2: memref<8x128xbf16, #tpu.memory_space<vmem>>, %arg3: memref<128x128xbf16, #tpu.memory_space<vmem>>, %arg4: memref<1x128xf32, #tpu.memory_space<vmem>>, %arg5: memref<8x128xbf16, #tpu.memory_space<vmem>>) attributes {dimension_semantics = [#tpu.dimension_semantics<parallel>, #tpu.dimension_semantics<parallel>], iteration_bounds = array<i64: 1, 1>, scalar_prefetch = 0 : i64, scratch_operands = 0 : i64, tpu.core_type = #tpu.core_type<tc>, window_params = [{transform_indices = @transform_0, window_bounds = array<i64: 8, 128>}, {transform_indices = @transform_1, window_bounds = array<i64: 128, 128>}, {transform_indices = @transform_2, window_bounds = array<i64: 1, 128>}, {transform_indices = @transform_3, window_bounds = array<i64: 8, 128>}]} {
    %c0 = arith.constant 0 : index
    %c0_0 = arith.constant 0 : index
    %0 = vector.load %arg2[%c0, %c0_0] : memref<8x128xbf16, #tpu.memory_space<vmem>>, vector<8x128xbf16>
    %c0_1 = arith.constant 0 : index
    %c0_2 = arith.constant 0 : index
    %1 = vector.load %arg3[%c0_1, %c0_2] : memref<128x128xbf16, #tpu.memory_space<vmem>>, vector<128x128xbf16>
    %cst = arith.constant dense<0.000000e+00> : vector<8x128xf32>
    %2 = tpu.matmul %0, %1, %cst {dimension_numbers = #tpu.dot_dimension_numbers<[1], [0], [0], [1], [0, 0, 1, 1], [], []>} : vector<8x128xbf16>, vector<128x128xbf16>, vector<8x128xf32> -> vector<8x128xf32>
    %c0_3 = arith.constant 0 : index
    %c0_4 = arith.constant 0 : index
    %3 = vector.load %arg4[%c0_3, %c0_4] : memref<1x128xf32, #tpu.memory_space<vmem>>, vector<1x128xf32>
    %4 = vector.broadcast %3 : vector<1x128xf32> to vector<8x128xf32>
    %5 = arith.addf %2, %4 : vector<8x128xf32>
    %6 = arith.truncf %5 : vector<8x128xf32> to vector<8x128xbf16>
    %c0_5 = arith.constant 0 : index
    %c0_6 = arith.constant 0 : index
    %7 = vector.load %arg5[%c0_5, %c0_6] : memref<8x128xbf16, #tpu.memory_space<vmem>>, vector<8x128xbf16>
    tpu.vector_store %arg5[%c0_5, %c0_6], %6 {strides = array<i32>} : memref<8x128xbf16, #tpu.memory_space<vmem>>, vector<8x128xbf16>,
    return
  }
  func.func @transform_0(%arg0: i32, %arg1: i32) -> (i32, i32) {
    %c0_i32 = arith.constant 0 : i32
    %c0_i32_0 = arith.constant 0 : i32
    return %arg0, %c0_i32 : i32, i32
  }
  func.func @transform_1(%arg0: i32, %arg1: i32) -> (i32, i32) {
    %c0_i32 = arith.constant 0 : i32
    %c0_i32_0 = arith.constant 0 : i32
    return %c0_i32, %arg1 : i32, i32
  }
  func.func @transform_2(%arg0: i32, %arg1: i32) -> (i32, i32) {
    %c0_i32 = arith.constant 0 : i32
    %c0_i32_0 = arith.constant 0 : i32
    return %c0_i32, %arg1 : i32, i32
  }
  func.func @transform_3(%arg0: i32, %arg1: i32) -> (i32, i32) {
    %c0_i32 = arith.constant 0 : i32
    return %arg0, %arg1 : i32, i32
  }
}

module attributes {stable_mosaic.version = 11 : i64} {
  func.func @_mm_bn_res_kernel(%arg0: i32, %arg1: i32, %arg2: memref<8x128xbf16, #tpu.memory_space<vmem>>, %arg3: memref<128x128xbf16, #tpu.memory_space<vmem>>, %arg4: memref<1x128xf32, #tpu.memory_space<vmem>>, %arg5: memref<8x128xbf16, #tpu.memory_space<vmem>>, %arg6: memref<8x128xbf16, #tpu.memory_space<vmem>>) attributes {dimension_semantics = [#tpu.dimension_semantics<parallel>, #tpu.dimension_semantics<parallel>], iteration_bounds = array<i64: 1, 1>, scalar_prefetch = 0 : i64, scratch_operands = 0 : i64, tpu.core_type = #tpu.core_type<tc>, window_params = [{transform_indices = @transform_0, window_bounds = array<i64: 8, 128>}, {transform_indices = @transform_1, window_bounds = array<i64: 128, 128>}, {transform_indices = @transform_2, window_bounds = array<i64: 1, 128>}, {transform_indices = @transform_3, window_bounds = array<i64: 8, 128>}, {transform_indices = @transform_4, window_bounds = array<i64: 8, 128>}]} {
    %c0 = arith.constant 0 : index
    %c0_0 = arith.constant 0 : index
    %0 = vector.load %arg2[%c0, %c0_0] : memref<8x128xbf16, #tpu.memory_space<vmem>>, vector<8x128xbf16>
    %c0_1 = arith.constant 0 : index
    %c0_2 = arith.constant 0 : index
    %1 = vector.load %arg3[%c0_1, %c0_2] : memref<128x128xbf16, #tpu.memory_space<vmem>>, vector<128x128xbf16>
    %cst = arith.constant dense<0.000000e+00> : vector<8x128xf32>
    %2 = tpu.matmul %0, %1, %cst {dimension_numbers = #tpu.dot_dimension_numbers<[1], [0], [0], [1], [0, 0, 1, 1], [], []>} : vector<8x128xbf16>, vector<128x128xbf16>, vector<8x128xf32> -> vector<8x128xf32>
    %c0_3 = arith.constant 0 : index
    %c0_4 = arith.constant 0 : index
    %3 = vector.load %arg4[%c0_3, %c0_4] : memref<1x128xf32, #tpu.memory_space<vmem>>, vector<1x128xf32>
    %4 = vector.broadcast %3 : vector<1x128xf32> to vector<8x128xf32>
    %5 = arith.addf %2, %4 : vector<8x128xf32>
    %c0_5 = arith.constant 0 : index
    %c0_6 = arith.constant 0 : index
    %6 = vector.load %arg5[%c0_5, %c0_6] : memref<8x128xbf16, #tpu.memory_space<vmem>>, vector<8x128xbf16>
    %7 = arith.extf %6 : vector<8x128xbf16> to vector<8x128xf32>
    %8 = arith.addf %5, %7 : vector<8x128xf32>
    %cst_7 = arith.constant 0.000000e+00 : f32
    %9 = vector.broadcast %cst_7 : f32 to vector<8x128xf32>
    %10 = arith.maximumf %8, %9 : vector<8x128xf32>
    %11 = arith.truncf %10 : vector<8x128xf32> to vector<8x128xbf16>
    %c0_8 = arith.constant 0 : index
    %c0_9 = arith.constant 0 : index
    %12 = vector.load %arg6[%c0_8, %c0_9] : memref<8x128xbf16, #tpu.memory_space<vmem>>, vector<8x128xbf16>
    tpu.vector_store %arg6[%c0_8, %c0_9], %11 {strides = array<i32>} : memref<8x128xbf16, #tpu.memory_space<vmem>>, vector<8x128xbf16>,
    return
  }
  func.func @transform_0(%arg0: i32, %arg1: i32) -> (i32, i32) {
    %c0_i32 = arith.constant 0 : i32
    %c0_i32_0 = arith.constant 0 : i32
    return %arg0, %c0_i32 : i32, i32
  }
  func.func @transform_1(%arg0: i32, %arg1: i32) -> (i32, i32) {
    %c0_i32 = arith.constant 0 : i32
    %c0_i32_0 = arith.constant 0 : i32
    return %c0_i32, %arg1 : i32, i32
  }
  func.func @transform_2(%arg0: i32, %arg1: i32) -> (i32, i32) {
    %c0_i32 = arith.constant 0 : i32
    %c0_i32_0 = arith.constant 0 : i32
    return %c0_i32, %arg1 : i32, i32
  }
  func.func @transform_3(%arg0: i32, %arg1: i32) -> (i32, i32) {
    %c0_i32 = arith.constant 0 : i32
    return %arg0, %arg1 : i32, i32
  }
  func.func @transform_4(%arg0: i32, %arg1: i32) -> (i32, i32) {
    %c0_i32 = arith.constant 0 : i32
    return %arg0, %arg1 : i32, i32
  }
}

module attributes {stable_mosaic.version = 11 : i64} {
  func.func @_mm_bn_kernel(%arg0: i32, %arg1: i32, %arg2: memref<8x128xbf16, #tpu.memory_space<vmem>>, %arg3: memref<128x128xbf16, #tpu.memory_space<vmem>>, %arg4: memref<1x128xf32, #tpu.memory_space<vmem>>, %arg5: memref<8x128xbf16, #tpu.memory_space<vmem>>) attributes {dimension_semantics = [#tpu.dimension_semantics<parallel>, #tpu.dimension_semantics<parallel>], iteration_bounds = array<i64: 1, 1>, scalar_prefetch = 0 : i64, scratch_operands = 0 : i64, tpu.core_type = #tpu.core_type<tc>, window_params = [{transform_indices = @transform_0, window_bounds = array<i64: 8, 128>}, {transform_indices = @transform_1, window_bounds = array<i64: 128, 128>}, {transform_indices = @transform_2, window_bounds = array<i64: 1, 128>}, {transform_indices = @transform_3, window_bounds = array<i64: 8, 128>}]} {
    %c0 = arith.constant 0 : index
    %c0_0 = arith.constant 0 : index
    %0 = vector.load %arg2[%c0, %c0_0] : memref<8x128xbf16, #tpu.memory_space<vmem>>, vector<8x128xbf16>
    %c0_1 = arith.constant 0 : index
    %c0_2 = arith.constant 0 : index
    %1 = vector.load %arg3[%c0_1, %c0_2] : memref<128x128xbf16, #tpu.memory_space<vmem>>, vector<128x128xbf16>
    %cst = arith.constant dense<0.000000e+00> : vector<8x128xf32>
    %2 = tpu.matmul %0, %1, %cst {dimension_numbers = #tpu.dot_dimension_numbers<[1], [0], [0], [1], [0, 0, 1, 1], [], []>} : vector<8x128xbf16>, vector<128x128xbf16>, vector<8x128xf32> -> vector<8x128xf32>
    %c0_3 = arith.constant 0 : index
    %c0_4 = arith.constant 0 : index
    %3 = vector.load %arg4[%c0_3, %c0_4] : memref<1x128xf32, #tpu.memory_space<vmem>>, vector<1x128xf32>
    %4 = vector.broadcast %3 : vector<1x128xf32> to vector<8x128xf32>
    %5 = arith.addf %2, %4 : vector<8x128xf32>
    %cst_5 = arith.constant 0.000000e+00 : f32
    %6 = vector.broadcast %cst_5 : f32 to vector<8x128xf32>
    %7 = arith.maximumf %5, %6 : vector<8x128xf32>
    %8 = arith.truncf %7 : vector<8x128xf32> to vector<8x128xbf16>
    %c0_6 = arith.constant 0 : index
    %c0_7 = arith.constant 0 : index
    %9 = vector.load %arg5[%c0_6, %c0_7] : memref<8x128xbf16, #tpu.memory_space<vmem>>, vector<8x128xbf16>
    tpu.vector_store %arg5[%c0_6, %c0_7], %8 {strides = array<i32>} : memref<8x128xbf16, #tpu.memory_space<vmem>>, vector<8x128xbf16>,
    return
  }
  func.func @transform_0(%arg0: i32, %arg1: i32) -> (i32, i32) {
    %c0_i32 = arith.constant 0 : i32
    %c0_i32_0 = arith.constant 0 : i32
    return %arg0, %c0_i32 : i32, i32
  }
  func.func @transform_1(%arg0: i32, %arg1: i32) -> (i32, i32) {
    %c0_i32 = arith.constant 0 : i32
    %c0_i32_0 = arith.constant 0 : i32
    return %c0_i32, %arg1 : i32, i32
  }
  func.func @transform_2(%arg0: i32, %arg1: i32) -> (i32, i32) {
    %c0_i32 = arith.constant 0 : i32
    %c0_i32_0 = arith.constant 0 : i32
    return %c0_i32, %arg1 : i32, i32
  }
  func.func @transform_3(%arg0: i32, %arg1: i32) -> (i32, i32) {
    %c0_i32 = arith.constant 0 : i32
    return %arg0, %arg1 : i32, i32
  }
}

module attributes {stable_mosaic.version = 11 : i64} {
  func.func @_win_conv_kernel(%arg0: i32, %arg1: memref<1x18x128xbf16, #tpu.memory_space<vmem>>, %arg2: memref<9x128x128xbf16, #tpu.memory_space<vmem>>, %arg3: memref<1x128xf32, #tpu.memory_space<vmem>>, %arg4: memref<1x3x128xbf16, #tpu.memory_space<vmem>>) attributes {dimension_semantics = [#tpu.dimension_semantics<parallel>], iteration_bounds = array<i64: 8>, scalar_prefetch = 0 : i64, scratch_operands = 0 : i64, tpu.core_type = #tpu.core_type<tc>, window_params = [{transform_indices = @transform_0, window_bounds = array<i64: 1, 18, 128>}, {pipeline_mode = #tpu.pipeline_mode<synchronous>, transform_indices = @transform_1, window_bounds = array<i64: 9, 128, 128>}, {pipeline_mode = #tpu.pipeline_mode<synchronous>, transform_indices = @transform_2, window_bounds = array<i64: 1, 128>}, {transform_indices = @transform_3, window_bounds = array<i64: 1, 3, 128>}]} {
    %cst = arith.constant 0.000000e+00 : f32
    %0 = vector.broadcast %cst : f32 to vector<3x128xf32>
    %c0 = arith.constant 0 : index
    %c0_0 = arith.constant 0 : index
    %c0_1 = arith.constant 0 : index
    %1 = vector.load %arg1[%c0, %c0_0, %c0_1] : memref<1x18x128xbf16, #tpu.memory_space<vmem>>, vector<1x3x128xbf16>
    %2 = vector.shape_cast %1 : vector<1x3x128xbf16> to vector<3x128xbf16>
    %c0_2 = arith.constant 0 : index
    %c0_3 = arith.constant 0 : index
    %c0_4 = arith.constant 0 : index
    %3 = vector.load %arg2[%c0_2, %c0_3, %c0_4] : memref<9x128x128xbf16, #tpu.memory_space<vmem>>, vector<1x128x128xbf16>
    %4 = vector.shape_cast %3 : vector<1x128x128xbf16> to vector<128x128xbf16>
    %cst_5 = arith.constant dense<0.000000e+00> : vector<3x128xf32>
    %5 = tpu.matmul %2, %4, %cst_5 {dimension_numbers = #tpu.dot_dimension_numbers<[1], [0], [0], [1], [0, 0, 1, 1], [], []>} : vector<3x128xbf16>, vector<128x128xbf16>, vector<3x128xf32> -> vector<3x128xf32>
    %6 = arith.addf %0, %5 : vector<3x128xf32>
    %c0_6 = arith.constant 0 : index
    %c1 = arith.constant 1 : index
    %c0_7 = arith.constant 0 : index
    %7 = vector.load %arg1[%c0_6, %c1, %c0_7] : memref<1x18x128xbf16, #tpu.memory_space<vmem>>, vector<1x3x128xbf16>
    %8 = vector.shape_cast %7 : vector<1x3x128xbf16> to vector<3x128xbf16>
    %c1_8 = arith.constant 1 : index
    %c0_9 = arith.constant 0 : index
    %c0_10 = arith.constant 0 : index
    %9 = vector.load %arg2[%c1_8, %c0_9, %c0_10] : memref<9x128x128xbf16, #tpu.memory_space<vmem>>, vector<1x128x128xbf16>
    %10 = vector.shape_cast %9 : vector<1x128x128xbf16> to vector<128x128xbf16>
    %cst_11 = arith.constant dense<0.000000e+00> : vector<3x128xf32>
    %11 = tpu.matmul %8, %10, %cst_11 {dimension_numbers = #tpu.dot_dimension_numbers<[1], [0], [0], [1], [0, 0, 1, 1], [], []>} : vector<3x128xbf16>, vector<128x128xbf16>, vector<3x128xf32> -> vector<3x128xf32>
    %12 = arith.addf %6, %11 : vector<3x128xf32>
    %c0_12 = arith.constant 0 : index
    %c2 = arith.constant 2 : index
    %c0_13 = arith.constant 0 : index
    %13 = vector.load %arg1[%c0_12, %c2, %c0_13] : memref<1x18x128xbf16, #tpu.memory_space<vmem>>, vector<1x3x128xbf16>
    %14 = vector.shape_cast %13 : vector<1x3x128xbf16> to vector<3x128xbf16>
    %c2_14 = arith.constant 2 : index
    %c0_15 = arith.constant 0 : index
    %c0_16 = arith.constant 0 : index
    %15 = vector.load %arg2[%c2_14, %c0_15, %c0_16] : memref<9x128x128xbf16, #tpu.memory_space<vmem>>, vector<1x128x128xbf16>
    %16 = vector.shape_cast %15 : vector<1x128x128xbf16> to vector<128x128xbf16>
    %cst_17 = arith.constant dense<0.000000e+00> : vector<3x128xf32>
    %17 = tpu.matmul %14, %16, %cst_17 {dimension_numbers = #tpu.dot_dimension_numbers<[1], [0], [0], [1], [0, 0, 1, 1], [], []>} : vector<3x128xbf16>, vector<128x128xbf16>, vector<3x128xf32> -> vector<3x128xf32>
    %18 = arith.addf %12, %17 : vector<3x128xf32>
    %c0_18 = arith.constant 0 : index
    %c3 = arith.constant 3 : index
    %c0_19 = arith.constant 0 : index
    %19 = vector.load %arg1[%c0_18, %c3, %c0_19] : memref<1x18x128xbf16, #tpu.memory_space<vmem>>, vector<1x3x128xbf16>
    %20 = vector.shape_cast %19 : vector<1x3x128xbf16> to vector<3x128xbf16>
    %c3_20 = arith.constant 3 : index
    %c0_21 = arith.constant 0 : index
    %c0_22 = arith.constant 0 : index
    %21 = vector.load %arg2[%c3_20, %c0_21, %c0_22] : memref<9x128x128xbf16, #tpu.memory_space<vmem>>, vector<1x128x128xbf16>
    %22 = vector.shape_cast %21 : vector<1x128x128xbf16> to vector<128x128xbf16>
    %cst_23 = arith.constant dense<0.000000e+00> : vector<3x128xf32>
    %23 = tpu.matmul %20, %22, %cst_23 {dimension_numbers = #tpu.dot_dimension_numbers<[1], [0], [0], [1], [0, 0, 1, 1], [], []>} : vector<3x128xbf16>, vector<128x128xbf16>, vector<3x128xf32> -> vector<3x128xf32>
    %24 = arith.addf %18, %23 : vector<3x128xf32>
    %c0_24 = arith.constant 0 : index
    %c4 = arith.constant 4 : index
    %c0_25 = arith.constant 0 : index
    %25 = vector.load %arg1[%c0_24, %c4, %c0_25] : memref<1x18x128xbf16, #tpu.memory_space<vmem>>, vector<1x3x128xbf16>
    %26 = vector.shape_cast %25 : vector<1x3x128xbf16> to vector<3x128xbf16>
    %c4_26 = arith.constant 4 : index
    %c0_27 = arith.constant 0 : index
    %c0_28 = arith.constant 0 : index
    %27 = vector.load %arg2[%c4_26, %c0_27, %c0_28] : memref<9x128x128xbf16, #tpu.memory_space<vmem>>, vector<1x128x128xbf16>
    %28 = vector.shape_cast %27 : vector<1x128x128xbf16> to vector<128x128xbf16>
    %cst_29 = arith.constant dense<0.000000e+00> : vector<3x128xf32>
    %29 = tpu.matmul %26, %28, %cst_29 {dimension_numbers = #tpu.dot_dimension_numbers<[1], [0], [0], [1], [0, 0, 1, 1], [], []>} : vector<3x128xbf16>, vector<128x128xbf16>, vector<3x128xf32> -> vector<3x128xf32>
    %30 = arith.addf %24, %29 : vector<3x128xf32>
    %c0_30 = arith.constant 0 : index
    %c5 = arith.constant 5 : index
    %c0_31 = arith.constant 0 : index
    %31 = vector.load %arg1[%c0_30, %c5, %c0_31] : memref<1x18x128xbf16, #tpu.memory_space<vmem>>, vector<1x3x128xbf16>
    %32 = vector.shape_cast %31 : vector<1x3x128xbf16> to vector<3x128xbf16>
    %c5_32 = arith.constant 5 : index
    %c0_33 = arith.constant 0 : index
    %c0_34 = arith.constant 0 : index
    %33 = vector.load %arg2[%c5_32, %c0_33, %c0_34] : memref<9x128x128xbf16, #tpu.memory_space<vmem>>, vector<1x128x128xbf16>
    %34 = vector.shape_cast %33 : vector<1x128x128xbf16> to vector<128x128xbf16>
    %cst_35 = arith.constant dense<0.000000e+00> : vector<3x128xf32>
    %35 = tpu.matmul %32, %34, %cst_35 {dimension_numbers = #tpu.dot_dimension_numbers<[1], [0], [0], [1], [0, 0, 1, 1], [], []>} : vector<3x128xbf16>, vector<128x128xbf16>, vector<3x128xf32> -> vector<3x128xf32>
    %36 = arith.addf %30, %35 : vector<3x128xf32>
    %c0_36 = arith.constant 0 : index
    %c6 = arith.constant 6 : index
    %c0_37 = arith.constant 0 : index
    %37 = vector.load %arg1[%c0_36, %c6, %c0_37] : memref<1x18x128xbf16, #tpu.memory_space<vmem>>, vector<1x3x128xbf16>
    %38 = vector.shape_cast %37 : vector<1x3x128xbf16> to vector<3x128xbf16>
    %c6_38 = arith.constant 6 : index
    %c0_39 = arith.constant 0 : index
    %c0_40 = arith.constant 0 : index
    %39 = vector.load %arg2[%c6_38, %c0_39, %c0_40] : memref<9x128x128xbf16, #tpu.memory_space<vmem>>, vector<1x128x128xbf16>
    %40 = vector.shape_cast %39 : vector<1x128x128xbf16> to vector<128x128xbf16>
    %cst_41 = arith.constant dense<0.000000e+00> : vector<3x128xf32>
    %41 = tpu.matmul %38, %40, %cst_41 {dimension_numbers = #tpu.dot_dimension_numbers<[1], [0], [0], [1], [0, 0, 1, 1], [], []>} : vector<3x128xbf16>, vector<128x128xbf16>, vector<3x128xf32> -> vector<3x128xf32>
    %42 = arith.addf %36, %41 : vector<3x128xf32>
    %c0_42 = arith.constant 0 : index
    %c7 = arith.constant 7 : index
    %c0_43 = arith.constant 0 : index
    %43 = vector.load %arg1[%c0_42, %c7, %c0_43] : memref<1x18x128xbf16, #tpu.memory_space<vmem>>, vector<1x3x128xbf16>
    %44 = vector.shape_cast %43 : vector<1x3x128xbf16> to vector<3x128xbf16>
    %c7_44 = arith.constant 7 : index
    %c0_45 = arith.constant 0 : index
    %c0_46 = arith.constant 0 : index
    %45 = vector.load %arg2[%c7_44, %c0_45, %c0_46] : memref<9x128x128xbf16, #tpu.memory_space<vmem>>, vector<1x128x128xbf16>
    %46 = vector.shape_cast %45 : vector<1x128x128xbf16> to vector<128x128xbf16>
    %cst_47 = arith.constant dense<0.000000e+00> : vector<3x128xf32>
    %47 = tpu.matmul %44, %46, %cst_47 {dimension_numbers = #tpu.dot_dimension_numbers<[1], [0], [0], [1], [0, 0, 1, 1], [], []>} : vector<3x128xbf16>, vector<128x128xbf16>, vector<3x128xf32> -> vector<3x128xf32>
    %48 = arith.addf %42, %47 : vector<3x128xf32>
    %c0_48 = arith.constant 0 : index
    %c8 = arith.constant 8 : index
    %c0_49 = arith.constant 0 : index
    %49 = vector.load %arg1[%c0_48, %c8, %c0_49] : memref<1x18x128xbf16, #tpu.memory_space<vmem>>, vector<1x3x128xbf16>
    %50 = vector.shape_cast %49 : vector<1x3x128xbf16> to vector<3x128xbf16>
    %c8_50 = arith.constant 8 : index
    %c0_51 = arith.constant 0 : index
    %c0_52 = arith.constant 0 : index
    %51 = vector.load %arg2[%c8_50, %c0_51, %c0_52] : memref<9x128x128xbf16, #tpu.memory_space<vmem>>, vector<1x128x128xbf16>
    %52 = vector.shape_cast %51 : vector<1x128x128xbf16> to vector<128x128xbf16>
    %cst_53 = arith.constant dense<0.000000e+00> : vector<3x128xf32>
    %53 = tpu.matmul %50, %52, %cst_53 {dimension_numbers = #tpu.dot_dimension_numbers<[1], [0], [0], [1], [0, 0, 1, 1], [], []>} : vector<3x128xbf16>, vector<128x128xbf16>, vector<3x128xf32> -> vector<3x128xf32>
    %54 = arith.addf %48, %53 : vector<3x128xf32>
    %c0_54 = arith.constant 0 : index
    %c0_55 = arith.constant 0 : index
    %55 = vector.load %arg3[%c0_54, %c0_55] : memref<1x128xf32, #tpu.memory_space<vmem>>, vector<1x128xf32>
    %56 = vector.broadcast %55 : vector<1x128xf32> to vector<3x128xf32>
    %57 = arith.addf %54, %56 : vector<3x128xf32>
    %cst_56 = arith.constant 0.000000e+00 : f32
    %58 = vector.broadcast %cst_56 : f32 to vector<3x128xf32>
    %59 = arith.maximumf %57, %58 : vector<3x128xf32>
    %60 = arith.truncf %59 : vector<3x128xf32> to vector<3x128xbf16>
    %c0_57 = arith.constant 0 : index
    %c0_58 = arith.constant 0 : index
    %c0_59 = arith.constant 0 : index
    %61 = vector.load %arg4[%c0_57, %c0_58, %c0_59] : memref<1x3x128xbf16, #tpu.memory_space<vmem>>, vector<1x3x128xbf16>
    %62 = vector.shape_cast %61 : vector<1x3x128xbf16> to vector<3x128xbf16>
    %63 = vector.shape_cast %60 : vector<3x128xbf16> to vector<1x3x128xbf16>
    tpu.vector_store %arg4[%c0_57, %c0_58, %c0_59], %63 {strides = array<i32>} : memref<1x3x128xbf16, #tpu.memory_space<vmem>>, vector<1x3x128xbf16>,
    return
  }
  func.func @transform_0(%arg0: i32) -> (i32, i32, i32) {
    %c0_i32 = arith.constant 0 : i32
    %c0_i32_0 = arith.constant 0 : i32
    %c0_i32_1 = arith.constant 0 : i32
    return %arg0, %c0_i32, %c0_i32_0 : i32, i32, i32
  }
  func.func @transform_1(%arg0: i32) -> (i32, i32, i32) {
    %c0_i32 = arith.constant 0 : i32
    %c0_i32_0 = arith.constant 0 : i32
    %c0_i32_1 = arith.constant 0 : i32
    %c0_i32_2 = arith.constant 0 : i32
    return %c0_i32, %c0_i32_0, %c0_i32_1 : i32, i32, i32
  }
  func.func @transform_2(%arg0: i32) -> (i32, i32) {
    %c0_i32 = arith.constant 0 : i32
    %c0_i32_0 = arith.constant 0 : i32
    %c0_i32_1 = arith.constant 0 : i32
    return %c0_i32, %c0_i32_0 : i32, i32
  }
  func.func @transform_3(%arg0: i32) -> (i32, i32, i32) {
    %c0_i32 = arith.constant 0 : i32
    %c0_i32_0 = arith.constant 0 : i32
    %c0_i32_1 = arith.constant 0 : i32
    return %arg0, %c0_i32, %c0_i32_0 : i32, i32, i32
  }
}

module attributes {stable_mosaic.version = 11 : i64} {
  func.func @_mm_bn_kernel(%arg0: i32, %arg1: i32, %arg2: memref<8x256xbf16, #tpu.memory_space<vmem>>, %arg3: memref<256x128xbf16, #tpu.memory_space<vmem>>, %arg4: memref<1x128xf32, #tpu.memory_space<vmem>>, %arg5: memref<8x128xbf16, #tpu.memory_space<vmem>>) attributes {dimension_semantics = [#tpu.dimension_semantics<parallel>, #tpu.dimension_semantics<parallel>], iteration_bounds = array<i64: 1, 1>, scalar_prefetch = 0 : i64, scratch_operands = 0 : i64, tpu.core_type = #tpu.core_type<tc>, window_params = [{transform_indices = @transform_0, window_bounds = array<i64: 8, 256>}, {transform_indices = @transform_1, window_bounds = array<i64: 256, 128>}, {transform_indices = @transform_2, window_bounds = array<i64: 1, 128>}, {transform_indices = @transform_3, window_bounds = array<i64: 8, 128>}]} {
    %c0 = arith.constant 0 : index
    %c0_0 = arith.constant 0 : index
    %0 = vector.load %arg2[%c0, %c0_0] : memref<8x256xbf16, #tpu.memory_space<vmem>>, vector<8x256xbf16>
    %c0_1 = arith.constant 0 : index
    %c0_2 = arith.constant 0 : index
    %1 = vector.load %arg3[%c0_1, %c0_2] : memref<256x128xbf16, #tpu.memory_space<vmem>>, vector<256x128xbf16>
    %cst = arith.constant dense<0.000000e+00> : vector<8x128xf32>
    %2 = tpu.matmul %0, %1, %cst {dimension_numbers = #tpu.dot_dimension_numbers<[1], [0], [0], [1], [0, 0, 1, 1], [], []>} : vector<8x256xbf16>, vector<256x128xbf16>, vector<8x128xf32> -> vector<8x128xf32>
    %c0_3 = arith.constant 0 : index
    %c0_4 = arith.constant 0 : index
    %3 = vector.load %arg4[%c0_3, %c0_4] : memref<1x128xf32, #tpu.memory_space<vmem>>, vector<1x128xf32>
    %4 = vector.broadcast %3 : vector<1x128xf32> to vector<8x128xf32>
    %5 = arith.addf %2, %4 : vector<8x128xf32>
    %cst_5 = arith.constant 0.000000e+00 : f32
    %6 = vector.broadcast %cst_5 : f32 to vector<8x128xf32>
    %7 = arith.maximumf %5, %6 : vector<8x128xf32>
    %8 = arith.truncf %7 : vector<8x128xf32> to vector<8x128xbf16>
    %c0_6 = arith.constant 0 : index
    %c0_7 = arith.constant 0 : index
    %9 = vector.load %arg5[%c0_6, %c0_7] : memref<8x128xbf16, #tpu.memory_space<vmem>>, vector<8x128xbf16>
    tpu.vector_store %arg5[%c0_6, %c0_7], %8 {strides = array<i32>} : memref<8x128xbf16, #tpu.memory_space<vmem>>, vector<8x128xbf16>,
    return
  }
  func.func @transform_0(%arg0: i32, %arg1: i32) -> (i32, i32) {
    %c0_i32 = arith.constant 0 : i32
    %c0_i32_0 = arith.constant 0 : i32
    return %arg0, %c0_i32 : i32, i32
  }
  func.func @transform_1(%arg0: i32, %arg1: i32) -> (i32, i32) {
    %c0_i32 = arith.constant 0 : i32
    %c0_i32_0 = arith.constant 0 : i32
    return %c0_i32, %arg1 : i32, i32
  }
  func.func @transform_2(%arg0: i32, %arg1: i32) -> (i32, i32) {
    %c0_i32 = arith.constant 0 : i32
    %c0_i32_0 = arith.constant 0 : i32
    return %c0_i32, %arg1 : i32, i32
  }
  func.func @transform_3(%arg0: i32, %arg1: i32) -> (i32, i32) {
    %c0_i32 = arith.constant 0 : i32
    return %arg0, %arg1 : i32, i32
  }
}

module attributes {stable_mosaic.version = 11 : i64} {
  func.func @_mm_bn_kernel(%arg0: i32, %arg1: i32, %arg2: memref<8x128xbf16, #tpu.memory_space<vmem>>, %arg3: memref<128x128xbf16, #tpu.memory_space<vmem>>, %arg4: memref<1x128xf32, #tpu.memory_space<vmem>>, %arg5: memref<8x128xbf16, #tpu.memory_space<vmem>>) attributes {dimension_semantics = [#tpu.dimension_semantics<parallel>, #tpu.dimension_semantics<parallel>], iteration_bounds = array<i64: 1, 2>, scalar_prefetch = 0 : i64, scratch_operands = 0 : i64, tpu.core_type = #tpu.core_type<tc>, window_params = [{transform_indices = @transform_0, window_bounds = array<i64: 8, 128>}, {transform_indices = @transform_1, window_bounds = array<i64: 128, 128>}, {transform_indices = @transform_2, window_bounds = array<i64: 1, 128>}, {transform_indices = @transform_3, window_bounds = array<i64: 8, 128>}]} {
    %c0 = arith.constant 0 : index
    %c0_0 = arith.constant 0 : index
    %0 = vector.load %arg2[%c0, %c0_0] : memref<8x128xbf16, #tpu.memory_space<vmem>>, vector<8x128xbf16>
    %c0_1 = arith.constant 0 : index
    %c0_2 = arith.constant 0 : index
    %1 = vector.load %arg3[%c0_1, %c0_2] : memref<128x128xbf16, #tpu.memory_space<vmem>>, vector<128x128xbf16>
    %cst = arith.constant dense<0.000000e+00> : vector<8x128xf32>
    %2 = tpu.matmul %0, %1, %cst {dimension_numbers = #tpu.dot_dimension_numbers<[1], [0], [0], [1], [0, 0, 1, 1], [], []>} : vector<8x128xbf16>, vector<128x128xbf16>, vector<8x128xf32> -> vector<8x128xf32>
    %c0_3 = arith.constant 0 : index
    %c0_4 = arith.constant 0 : index
    %3 = vector.load %arg4[%c0_3, %c0_4] : memref<1x128xf32, #tpu.memory_space<vmem>>, vector<1x128xf32>
    %4 = vector.broadcast %3 : vector<1x128xf32> to vector<8x128xf32>
    %5 = arith.addf %2, %4 : vector<8x128xf32>
    %6 = arith.truncf %5 : vector<8x128xf32> to vector<8x128xbf16>
    %c0_5 = arith.constant 0 : index
    %c0_6 = arith.constant 0 : index
    %7 = vector.load %arg5[%c0_5, %c0_6] : memref<8x128xbf16, #tpu.memory_space<vmem>>, vector<8x128xbf16>
    tpu.vector_store %arg5[%c0_5, %c0_6], %6 {strides = array<i32>} : memref<8x128xbf16, #tpu.memory_space<vmem>>, vector<8x128xbf16>,
    return
  }
  func.func @transform_0(%arg0: i32, %arg1: i32) -> (i32, i32) {
    %c0_i32 = arith.constant 0 : i32
    %c0_i32_0 = arith.constant 0 : i32
    return %arg0, %c0_i32 : i32, i32
  }
  func.func @transform_1(%arg0: i32, %arg1: i32) -> (i32, i32) {
    %c0_i32 = arith.constant 0 : i32
    %c0_i32_0 = arith.constant 0 : i32
    return %c0_i32, %arg1 : i32, i32
  }
  func.func @transform_2(%arg0: i32, %arg1: i32) -> (i32, i32) {
    %c0_i32 = arith.constant 0 : i32
    %c0_i32_0 = arith.constant 0 : i32
    return %c0_i32, %arg1 : i32, i32
  }
  func.func @transform_3(%arg0: i32, %arg1: i32) -> (i32, i32) {
    %c0_i32 = arith.constant 0 : i32
    return %arg0, %arg1 : i32, i32
  }
}

module attributes {stable_mosaic.version = 11 : i64} {
  func.func @_mm_bn_res_kernel(%arg0: i32, %arg1: i32, %arg2: memref<8x128xbf16, #tpu.memory_space<vmem>>, %arg3: memref<128x128xbf16, #tpu.memory_space<vmem>>, %arg4: memref<1x128xf32, #tpu.memory_space<vmem>>, %arg5: memref<8x128xbf16, #tpu.memory_space<vmem>>, %arg6: memref<8x128xbf16, #tpu.memory_space<vmem>>) attributes {dimension_semantics = [#tpu.dimension_semantics<parallel>, #tpu.dimension_semantics<parallel>], iteration_bounds = array<i64: 1, 2>, scalar_prefetch = 0 : i64, scratch_operands = 0 : i64, tpu.core_type = #tpu.core_type<tc>, window_params = [{transform_indices = @transform_0, window_bounds = array<i64: 8, 128>}, {transform_indices = @transform_1, window_bounds = array<i64: 128, 128>}, {transform_indices = @transform_2, window_bounds = array<i64: 1, 128>}, {transform_indices = @transform_3, window_bounds = array<i64: 8, 128>}, {transform_indices = @transform_4, window_bounds = array<i64: 8, 128>}]} {
    %c0 = arith.constant 0 : index
    %c0_0 = arith.constant 0 : index
    %0 = vector.load %arg2[%c0, %c0_0] : memref<8x128xbf16, #tpu.memory_space<vmem>>, vector<8x128xbf16>
    %c0_1 = arith.constant 0 : index
    %c0_2 = arith.constant 0 : index
    %1 = vector.load %arg3[%c0_1, %c0_2] : memref<128x128xbf16, #tpu.memory_space<vmem>>, vector<128x128xbf16>
    %cst = arith.constant dense<0.000000e+00> : vector<8x128xf32>
    %2 = tpu.matmul %0, %1, %cst {dimension_numbers = #tpu.dot_dimension_numbers<[1], [0], [0], [1], [0, 0, 1, 1], [], []>} : vector<8x128xbf16>, vector<128x128xbf16>, vector<8x128xf32> -> vector<8x128xf32>
    %c0_3 = arith.constant 0 : index
    %c0_4 = arith.constant 0 : index
    %3 = vector.load %arg4[%c0_3, %c0_4] : memref<1x128xf32, #tpu.memory_space<vmem>>, vector<1x128xf32>
    %4 = vector.broadcast %3 : vector<1x128xf32> to vector<8x128xf32>
    %5 = arith.addf %2, %4 : vector<8x128xf32>
    %c0_5 = arith.constant 0 : index
    %c0_6 = arith.constant 0 : index
    %6 = vector.load %arg5[%c0_5, %c0_6] : memref<8x128xbf16, #tpu.memory_space<vmem>>, vector<8x128xbf16>
    %7 = arith.extf %6 : vector<8x128xbf16> to vector<8x128xf32>
    %8 = arith.addf %5, %7 : vector<8x128xf32>
    %cst_7 = arith.constant 0.000000e+00 : f32
    %9 = vector.broadcast %cst_7 : f32 to vector<8x128xf32>
    %10 = arith.maximumf %8, %9 : vector<8x128xf32>
    %11 = arith.truncf %10 : vector<8x128xf32> to vector<8x128xbf16>
    %c0_8 = arith.constant 0 : index
    %c0_9 = arith.constant 0 : index
    %12 = vector.load %arg6[%c0_8, %c0_9] : memref<8x128xbf16, #tpu.memory_space<vmem>>, vector<8x128xbf16>
    tpu.vector_store %arg6[%c0_8, %c0_9], %11 {strides = array<i32>} : memref<8x128xbf16, #tpu.memory_space<vmem>>, vector<8x128xbf16>,
    return
  }
  func.func @transform_0(%arg0: i32, %arg1: i32) -> (i32, i32) {
    %c0_i32 = arith.constant 0 : i32
    %c0_i32_0 = arith.constant 0 : i32
    return %arg0, %c0_i32 : i32, i32
  }
  func.func @transform_1(%arg0: i32, %arg1: i32) -> (i32, i32) {
    %c0_i32 = arith.constant 0 : i32
    %c0_i32_0 = arith.constant 0 : i32
    return %c0_i32, %arg1 : i32, i32
  }
  func.func @transform_2(%arg0: i32, %arg1: i32) -> (i32, i32) {
    %c0_i32 = arith.constant 0 : i32
    %c0_i32_0 = arith.constant 0 : i32
    return %c0_i32, %arg1 : i32, i32
  }
  func.func @transform_3(%arg0: i32, %arg1: i32) -> (i32, i32) {
    %c0_i32 = arith.constant 0 : i32
    return %arg0, %arg1 : i32, i32
  }
  func.func @transform_4(%arg0: i32, %arg1: i32) -> (i32, i32) {
    %c0_i32 = arith.constant 0 : i32
    return %arg0, %arg1 : i32, i32
  }
}

module attributes {stable_mosaic.version = 11 : i64} {
  func.func @_gap_kernel(%arg0: i32, %arg1: i32, %arg2: memref<1x8x256xbf16, #tpu.memory_space<vmem>>, %arg3: memref<1x8x256xf32, #tpu.memory_space<vmem>>, %arg4: memref<8x256xf32, #tpu.memory_space<vmem>>) attributes {dimension_semantics = [#tpu.dimension_semantics<parallel>, #tpu.dimension_semantics<arbitrary>], iteration_bounds = array<i64: 2, 1>, scalar_prefetch = 0 : i64, scratch_operands = 1 : i64, tpu.core_type = #tpu.core_type<tc>, window_params = [{transform_indices = @transform_0, window_bounds = array<i64: 1, 8, 256>}, {transform_indices = @transform_1, window_bounds = array<i64: 1, 8, 256>}]} {
    %c0_i32 = arith.constant 0 : i32
    %0 = arith.cmpi eq, %arg1, %c0_i32 : i32
    %1 = arith.extui %0 : i1 to i32
    %c0_i32_0 = arith.constant 0 : i32
    %2 = arith.cmpi ne, %1, %c0_i32_0 : i32
    scf.if %2 {
      %cst = arith.constant 0.000000e+00 : f32
      %12 = vector.broadcast %cst : f32 to vector<8x256xf32>
      %c0_9 = arith.constant 0 : index
      %c0_10 = arith.constant 0 : index
      %13 = vector.load %arg4[%c0_9, %c0_10] : memref<8x256xf32, #tpu.memory_space<vmem>>, vector<8x256xf32>
      tpu.vector_store %arg4[%c0_9, %c0_10], %12 {strides = array<i32>} : memref<8x256xf32, #tpu.memory_space<vmem>>, vector<8x256xf32>,
    } else {
    }
    %c0 = arith.constant 0 : index
    %c0_1 = arith.constant 0 : index
    %c0_2 = arith.constant 0 : index
    %3 = vector.load %arg2[%c0, %c0_1, %c0_2] : memref<1x8x256xbf16, #tpu.memory_space<vmem>>, vector<1x8x256xbf16>
    %4 = vector.shape_cast %3 : vector<1x8x256xbf16> to vector<8x256xbf16>
    %5 = arith.extf %4 : vector<8x256xbf16> to vector<8x256xf32>
    %c0_3 = arith.constant 0 : index
    %c0_4 = arith.constant 0 : index
    %6 = vector.load %arg4[%c0_3, %c0_4] : memref<8x256xf32, #tpu.memory_space<vmem>>, vector<8x256xf32>
    %7 = arith.addf %6, %5 : vector<8x256xf32>
    %c0_5 = arith.constant 0 : index
    %c0_6 = arith.constant 0 : index
    %8 = vector.load %arg4[%c0_5, %c0_6] : memref<8x256xf32, #tpu.memory_space<vmem>>, vector<8x256xf32>
    tpu.vector_store %arg4[%c0_5, %c0_6], %7 {strides = array<i32>} : memref<8x256xf32, #tpu.memory_space<vmem>>, vector<8x256xf32>,
    %c0_i32_7 = arith.constant 0 : i32
    %9 = arith.cmpi eq, %arg1, %c0_i32_7 : i32
    %10 = arith.extui %9 : i1 to i32
    %c0_i32_8 = arith.constant 0 : i32
    %11 = arith.cmpi ne, %10, %c0_i32_8 : i32
    scf.if %11 {
      %c0_9 = arith.constant 0 : index
      %c0_10 = arith.constant 0 : index
      %12 = vector.load %arg4[%c0_9, %c0_10] : memref<8x256xf32, #tpu.memory_space<vmem>>, vector<8x256xf32>
      %cst = arith.constant 2.500000e-01 : f32
      %13 = vector.broadcast %cst : f32 to vector<8x256xf32>
      %14 = arith.mulf %12, %13 : vector<8x256xf32>
      %c0_11 = arith.constant 0 : index
      %c0_12 = arith.constant 0 : index
      %c0_13 = arith.constant 0 : index
      %15 = vector.load %arg3[%c0_11, %c0_12, %c0_13] : memref<1x8x256xf32, #tpu.memory_space<vmem>>, vector<1x8x256xf32>
      %16 = vector.shape_cast %15 : vector<1x8x256xf32> to vector<8x256xf32>
      %17 = vector.shape_cast %14 : vector<8x256xf32> to vector<1x8x256xf32>
      tpu.vector_store %arg3[%c0_11, %c0_12, %c0_13], %17 {strides = array<i32>} : memref<1x8x256xf32, #tpu.memory_space<vmem>>, vector<1x8x256xf32>,
    } else {
    }
    return
  }
  func.func @transform_0(%arg0: i32, %arg1: i32) -> (i32, i32, i32) {
    %c0_i32 = arith.constant 0 : i32
    %c0_i32_0 = arith.constant 0 : i32
    return %arg0, %arg1, %c0_i32 : i32, i32, i32
  }
  func.func @transform_1(%arg0: i32, %arg1: i32) -> (i32, i32, i32) {
    %c0_i32 = arith.constant 0 : i32
    %c0_i32_0 = arith.constant 0 : i32
    %c0_i32_1 = arith.constant 0 : i32
    return %arg0, %c0_i32, %c0_i32_0 : i32, i32, i32
  }
}

</mosaic_0001>

<bundles_post_ra>
// kernel: feature_extractor_forward.55
= control target key start
LH: loop header
LB: loop body
LE: loop exit
PB: predicated region body
PF: predicated region fallthrough
CT: control target
= control target key end

     0   :  { %s1494_s12 = smov 0   ;;  %s1496_s13 = smov 0   ;;  %s1668_s0 = inlined_call_operand.vmem [shape: bf16[512,256], index: 0, kind: input, shape index: {}]   ;;  %s1669_s1 = inlined_call_operand.vmem [shape: bf16[256,128], index: 1, kind: input, shape index: {}]   ;;  %s1670_s2 = inlined_call_operand.vmem [shape: f32[1,128], index: 2, kind: input, shape index: {}]   ;;  %s1671_s3 = inlined_call_operand.vmem [shape: bf16[512,128], index: 3, kind: output, shape index: {}]  }
   0x1   :  { %s1498_s14 = smov 0  }
   0x2 LB: > { %s25_s15 = sadd.s32 1, %s1468_s13  ;;  %p1017_p0 = scmp.ge.s32.totalorder %s1472_s14, 1  ;;  %s1472_s14 = sphi %s1498_s14, %s13_s14   ;;  %s1468_s13 = sphi %s1496_s13, %s1673_s13   ;;  %s1464_s12 = sphi %s1494_s12, %s1672_s12  }
   0x3   : > { %p27_p1 = scmp.ge.s32.totalorder %s25_s15, 2  ;;  %p170_p2 = scmp.lt.s32.totalorder %s1472_s14, 3 }
   0x5   : > { %s1675_s15 = smov (%p27_p1, %s25_s15), 0  ;;  %p171_p3 = pnand %p1017_p0, %p170_p2 }
   0x6   : > { %s1018_s18 = sshll.u32 (!%p171_p3), %s1464_s12, 5 }
   0x7   : > { %174 = sbr.rel (%p171_p3) target bundleno = 309 (0x135), region = 32  ;;  %p206_p4 = scmp.lt.s32.totalorder (!%p171_p3), %s1018_s18, 63 }
   0xc   : > { %v1386_v0 = vld [vmem:[%s1669_s1 + $0x78] sm:$0xff]   ;;  %v1388_v2 = vld [vmem:[%s1669_s1 + $0x70] sm:$0xff]   ;;  %v1390_v4 = vld [vmem:[%s1669_s1 + $0x68] sm:$0xff]   ;;  %s1677_s18 = smov (!%p206_p4, %s1018_s18), 63 }
   0xd   : > { %v1387_v1 = vld [vmem:[%s1669_s1 + $0x38] sm:$0xff]   ;;  %1234 = vmatprep.subr.bf16.mxu0 %v1386_v0  ;;  %1346 = vmatprep.subr.bf16.mxu1 %v1386_v0  ;;  %v1389_v3 = vld [vmem:[%s1669_s1 + $0x30] sm:$0xff]   ;;  %v1391_v5 = vld [vmem:[%s1669_s1 + $0x28] sm:$0xff]   ;;  %s1106_s6 = sshll.u32 %s1677_s18, 3  ;;  %s1022_s5 = sshll.u32 %s1677_s18, 2 }
   0xe   : > { %1235 = vmatpush3.bf16.msra.mxu0 %v1387_v1  ;;  %1354 = vmatpush3.bf16.msra.mxu1 %v1387_v1  ;;  %v1392_v6 = vld [vmem:[%s1669_s1 + $0x60] sm:$0xff]   ;;  %v1394_v8 = vld [vmem:[%s1669_s1 + $0x58] sm:$0xff]   ;;  %s1545_s11 = scalar_lea.vmem %s1668_s0, %s1106_s6  ;;  %v1396_v10 = vld [vmem:[%s1669_s1 + $0x50] sm:$0xff]   ;;  %s1613_s8 = scalar_lea.vmem %s1671_s3, %s1022_s5 }
   0xf   : > { %1236 = vmatprep.subr.bf16.mxu0 %v1388_v2  ;;  %1347 = vmatprep.subr.bf16.mxu1 %v1388_v2  ;;  %v1393_v7 = vld [vmem:[%s1669_s1 + $0x20] sm:$0xff]   ;;  %v1395_v9 = vld [vmem:[%s1669_s1 + $0x18] sm:$0xff]   ;;  %v1397_v13 = vld [vmem:[%s1669_s1 + $0x10] sm:$0xff]  }
  0x10   : > { %v1404_v11 = vld [vmem:[%s1545_s11 + $0x4] ss:$8 sps:$4 sm:$0xff]   ;;  %v1402_v18 = vld [vmem:[%s1545_s11] ss:$8 sps:$4 sm:$0xff]   ;;  %v1408_v20 = vld [vmem:[%s1545_s11 + $0x14] ss:$8 sps:$4 sm:$0xff]  }
  0x11   : > { %v1407_v12 = vld [vmem:[%s1545_s11 + $0x84] ss:$8 sps:$4 sm:$0xff]   ;;  %588 = vmatprep.mubr.bf16.mxu0 %v1404_v11  ;;  %v1405_v19 = vld [vmem:[%s1545_s11 + $0x80] ss:$8 sps:$4 sm:$0xff]   ;;  %v1410_v21 = vld [vmem:[%s1545_s11 + $0x94] ss:$8 sps:$4 sm:$0xff]  }
  0x12   : > { %1237 = vmatpush3.bf16.msra.mxu0 %v1389_v3  ;;  %1355 = vmatpush3.bf16.msra.mxu1 %v1389_v3  ;;  %v1398_v14 = vld [vmem:[%s1669_s1 + $0x48] sm:$0xff]   ;;  %v1400_v16 = vld [vmem:[%s1669_s1 + $0x40] sm:$0xff]   ;;  %v1412_v22 = vld [vmem:[%s1545_s11 + $0x10] ss:$8 sps:$4 sm:$0xff]  }
  0x13   : > { %1238 = vmatprep.subr.bf16.mxu0 %v1390_v4  ;;  %1348 = vmatprep.subr.bf16.mxu1 %v1390_v4  ;;  %v1399_v15 = vld [vmem:[%s1669_s1 + $0x8] sm:$0xff]   ;;  %v1401_v17 = vld [vmem:[%s1669_s1] sm:$0xff]   ;;  %v1413_v23 = vld [vmem:[%s1545_s11 + $0x90] ss:$8 sps:$4 sm:$0xff]  }
  0x14   : > { %652 = vmatprep.mubr.bf16.mxu1 %v1407_v12  ;;  %v1414_v24 = vld [vmem:[%s1545_s11 + $0x24] ss:$8 sps:$4 sm:$0xff]   ;;  %v1418_v26 = vld [vmem:[%s1545_s11 + $0x20] ss:$8 sps:$4 sm:$0xff]   ;;  %v1420_v28 = vld [vmem:[%s1545_s11 + $0x34] ss:$8 sps:$4 sm:$0xff]  }
  0x15   : > { %v1416_v25 = vld [vmem:[%s1545_s11 + $0xa4] ss:$8 sps:$4 sm:$0xff]   ;;  %v1419_v27 = vld [vmem:[%s1545_s11 + $0xa0] ss:$8 sps:$4 sm:$0xff]   ;;  %v1422_v29 = vld [vmem:[%s1545_s11 + $0xb4] ss:$8 sps:$4 sm:$0xff]  }
  0x16   : > { %1239 = vmatpush3.bf16.msra.mxu0 %v1391_v5  ;;  %1356 = vmatpush3.bf16.msra.mxu1 %v1391_v5  ;;  %v1424_v30 = vld [vmem:[%s1545_s11 + $0x30] ss:$8 sps:$4 sm:$0xff]   ;;  %v1426_v32 = vld [vmem:[%s1545_s11 + $0x44] ss:$8 sps:$4 sm:$0xff]   ;;  %v1430_v34 = vld [vmem:[%s1545_s11 + $0x40] ss:$8 sps:$4 sm:$0xff]  }
  0x17   : > { %1240 = vmatprep.subr.bf16.mxu0 %v1392_v6  ;;  %1349 = vmatprep.subr.bf16.mxu1 %v1392_v6  ;;  %v1425_v31 = vld [vmem:[%s1545_s11 + $0xb0] ss:$8 sps:$4 sm:$0xff]   ;;  %v1428_v33 = vld [vmem:[%s1545_s11 + $0xc4] ss:$8 sps:$4 sm:$0xff]   ;;  %v1431_v35 = vld [vmem:[%s1545_s11 + $0xc0] ss:$8 sps:$4 sm:$0xff]  }
  0x18   : > { %v1432_v36 = vld [vmem:[%s1545_s11 + $0x54] ss:$8 sps:$4 sm:$0xff]   ;;  %v1436_v38 = vld [vmem:[%s1545_s11 + $0x50] ss:$8 sps:$4 sm:$0xff]   ;;  %v1438_v40 = vld [vmem:[%s1545_s11 + $0x64] ss:$8 sps:$4 sm:$0xff]  }
  0x19   : > { %v1434_v37 = vld [vmem:[%s1545_s11 + $0xd4] ss:$8 sps:$4 sm:$0xff]   ;;  %v1437_v39 = vld [vmem:[%s1545_s11 + $0xd0] ss:$8 sps:$4 sm:$0xff]   ;;  %v1440_v41 = vld [vmem:[%s1545_s11 + $0xe4] ss:$8 sps:$4 sm:$0xff]  }
  0x1a   : > { %1241 = vmatpush3.bf16.msra.mxu0 %v1393_v7  ;;  %1357 = vmatpush3.bf16.msra.mxu1 %v1393_v7  ;;  %v1442_v42 = vld [vmem:[%s1545_s11 + $0x60] ss:$8 sps:$4 sm:$0xff]   ;;  %v1444_v44 = vld [vmem:[%s1545_s11 + $0x74] ss:$8 sps:$4 sm:$0xff]   ;;  %v1448_v46 = vld [vmem:[%s1545_s11 + $0x70] ss:$8 sps:$4 sm:$0xff]  }
  0x1b   : > { %1242 = vmatprep.subr.bf16.mxu0 %v1394_v8  ;;  %1350 = vmatprep.subr.bf16.mxu1 %v1394_v8  ;;  %v1443_v43 = vld [vmem:[%s1545_s11 + $0xe0] ss:$8 sps:$4 sm:$0xff]   ;;  %v1446_v45 = vld [vmem:[%s1545_s11 + $0xf4] ss:$8 sps:$4 sm:$0xff]   ;;  %v1449_v47 = vld [vmem:[%s1545_s11 + $0xf0] ss:$8 sps:$4 sm:$0xff]  }
  0x1c   : > { %v1603_v52 = vld [vmem:[%s1670_s2] ss:$0 sm:$0xff] }
  0x1e   : > { %1243 = vmatpush3.bf16.msra.mxu0 %v1395_v9  ;;  %1358 = vmatpush3.bf16.msra.mxu1 %v1395_v9 }
  0x1f   : > { %1244 = vmatprep.subr.bf16.mxu0 %v1396_v10  ;;  %1351 = vmatprep.subr.bf16.mxu1 %v1396_v10 }
  0x22   : > { %1245 = vmatpush3.bf16.msra.mxu0 %v1397_v13  ;;  %1359 = vmatpush3.bf16.msra.mxu1 %v1397_v13 }
  0x23   : > { %1246 = vmatprep.subr.bf16.mxu0 %v1398_v14  ;;  %1352 = vmatprep.subr.bf16.mxu1 %v1398_v14 }
  0x26   : > { %1247 = vmatpush3.bf16.msra.mxu0 %v1399_v15  ;;  %1360 = vmatpush3.bf16.msra.mxu1 %v1399_v15 }
  0x27   : > { %1248 = vmatprep.subr.bf16.mxu0 %v1400_v16  ;;  %1353 = vmatprep.subr.bf16.mxu1 %v1400_v16 }
  0x2a   : > { %1249 = vmatpush3.bf16.msra.mxu0 %v1401_v17  ;;  %1361 = vmatpush3.bf16.msra.mxu1 %v1401_v17 }
  0x2d   : > { %589 = vmatmul.mubr.bf16.vlgmr.msra.gmra.mxu0 %v1402_v18  ;;  %653 = vmatmul.mubr.bf16.vlgmr.msra.gmra.mxu1 %v1405_v19 }
  0x2e   : > { %596 = vmatprep.mubr.bf16.mxu0 %v1408_v20  ;;  %660 = vmatprep.mubr.bf16.mxu1 %v1410_v21 }
  0x35   : > { %597 = vmatmul.mubr.bf16.gmra.mxu0 %v1412_v22  ;;  %661 = vmatmul.mubr.bf16.gmra.mxu1 %v1413_v23 }
  0x36   : > { %604 = vmatprep.mubr.bf16.mxu0 %v1414_v24  ;;  %668 = vmatprep.mubr.bf16.mxu1 %v1416_v25 }
  0x3d   : > { %605 = vmatmul.mubr.bf16.gmra.mxu0 %v1418_v26  ;;  %669 = vmatmul.mubr.bf16.gmra.mxu1 %v1419_v27 }
  0x3e   : > { %612 = vmatprep.mubr.bf16.mxu0 %v1420_v28  ;;  %676 = vmatprep.mubr.bf16.mxu1 %v1422_v29 }
  0x45   : > { %613 = vmatmul.mubr.bf16.gmra.mxu0 %v1424_v30  ;;  %677 = vmatmul.mubr.bf16.gmra.mxu1 %v1425_v31 }
  0x46   : > { %620 = vmatprep.mubr.bf16.mxu0 %v1426_v32  ;;  %684 = vmatprep.mubr.bf16.mxu1 %v1428_v33 }
  0x4d   : > { %621 = vmatmul.mubr.bf16.gmra.mxu0 %v1430_v34  ;;  %685 = vmatmul.mubr.bf16.gmra.mxu1 %v1431_v35 }
  0x4e   : > { %628 = vmatprep.mubr.bf16.mxu0 %v1432_v36  ;;  %692 = vmatprep.mubr.bf16.mxu1 %v1434_v37 }
  0x55   : > { %629 = vmatmul.mubr.bf16.gmra.mxu0 %v1436_v38  ;;  %693 = vmatmul.mubr.bf16.gmra.mxu1 %v1437_v39 }
  0x56   : > { %636 = vmatprep.mubr.bf16.mxu0 %v1438_v40  ;;  %700 = vmatprep.mubr.bf16.mxu1 %v1440_v41 }
  0x5d   : > { %637 = vmatmul.mubr.bf16.gmra.mxu0 %v1442_v42  ;;  %701 = vmatmul.mubr.bf16.gmra.mxu1 %v1443_v43 }
  0x5e   : > { %644 = vmatprep.mubr.bf16.mxu0 %v1444_v44  ;;  %708 = vmatprep.mubr.bf16.mxu1 %v1446_v45 }
  0x65   : > { %645 = vmatmul.mubr.bf16.gmra.mxu0 %v1448_v46  ;;  %709 = vmatmul.mubr.bf16.gmra.mxu1 %v1449_v47 }
  0xed   : > { %v1250_v48 = vpop.f32.mrf.mxu0  ;;  %v1298_v49 = vpop.f32.mrf.mxu1 }
  0xef   : > { %v1251_v50 = vpop.f32.mrf.mxu0  ;;  %v1299_v51 = vpop.f32.mrf.mxu1 }
  0xf0   : > { %v1252_v53 = vadd.f32 %v1251_v50, %v1250_v48  ;;  %v1300_v54 = vadd.f32 %v1299_v51, %v1298_v49 }
  0xf1   : > { %v1253_v55 = vpop.f32.mrf.mxu0  ;;  %v1301_v56 = vpop.f32.mrf.mxu1 }
  0xf2   : > { %v591_v57 = vadd.f32 %v1252_v53, %v1603_v52  ;;  %v655_v58 = vadd.f32 %v1300_v54, %v1603_v52 }
  0xf3   : > { %v1254_v59 = vpop.f32.mrf.mxu0  ;;  %v1302_v60 = vpop.f32.mrf.mxu1 }
  0xf4   : > { %v1255_v61 = vadd.f32 %v1254_v59, %v1253_v55  ;;  %v1303_v62 = vadd.f32 %v1302_v60, %v1301_v56  ;;  %v717_v3 = vmax.f32 %v591_v57, 0.0  ;;  %v733_v4 = vmax.f32 %v655_v58, 0.0 }
  0xf5   : > { %v1256_v63 = vpop.f32.mrf.mxu0  ;;  %v1304_v0 = vpop.f32.mrf.mxu1 }
  0xf6   : > { %v594_v1 = vadd.f32 %v1255_v61, %v1603_v52  ;;  %v658_v2 = vadd.f32 %v1303_v62, %v1603_v52 }
  0xf7   : > { %v1257_v5 = vpop.f32.mrf.mxu0  ;;  %v1305_v6 = vpop.f32.mrf.mxu1 }
  0xf8   : > { %v718_v7 = vmax.f32 %v594_v1, 0.0  ;;  %v734_v8 = vmax.f32 %v658_v2, 0.0  ;;  %v1258_v9 = vadd.f32 %v1257_v5, %v1256_v63  ;;  %v1306_v10 = vadd.f32 %v1305_v6, %v1304_v0 }
  0xf9   : > { %v1259_v11 = vpop.f32.mrf.mxu0  ;;  %v1307_v12 = vpop.f32.mrf.mxu1 }
  0xfa   : > { %v1142_v13 = vpack.c.bf16 %v718_v7, %v717_v3  ;;  %v1182_v14 = vpack.c.bf16 %v734_v8, %v733_v4  ;;  %v599_v15 = vadd.f32 %v1258_v9, %v1603_v52  ;;  %v663_v16 = vadd.f32 %v1306_v10, %v1603_v52 }
  0xfb   : > { %v1260_v17 = vpop.f32.mrf.mxu0  ;;  %v1308_v18 = vpop.f32.mrf.mxu1 }
  0xfc   : > { %1143 = vst [vmem:[%s1613_s8] sm:$0xff] %v1142_v13   ;;  %1226 = vst [vmem:[%s1613_s8 + $0x40] sm:$0xff] %v1182_v14   ;;  %v1261_v19 = vadd.f32 %v1260_v17, %v1259_v11  ;;  %v1309_v20 = vadd.f32 %v1308_v18, %v1307_v12  ;;  %v719_v25 = vmax.f32 %v599_v15, 0.0  ;;  %v735_v26 = vmax.f32 %v663_v16, 0.0 }
  0xfd   : > { %v1262_v21 = vpop.f32.mrf.mxu0  ;;  %v1310_v22 = vpop.f32.mrf.mxu1 }
  0xfe   : > { %v602_v23 = vadd.f32 %v1261_v19, %v1603_v52  ;;  %v666_v24 = vadd.f32 %v1309_v20, %v1603_v52 }
  0xff   : > { %v1263_v27 = vpop.f32.mrf.mxu0  ;;  %v1311_v28 = vpop.f32.mrf.mxu1 }
 0x100   : > { %v720_v29 = vmax.f32 %v602_v23, 0.0  ;;  %v736_v30 = vmax.f32 %v666_v24, 0.0  ;;  %v1264_v31 = vadd.f32 %v1263_v27, %v1262_v21  ;;  %v1312_v32 = vadd.f32 %v1311_v28, %v1310_v22 }
 0x101   : > { %v1265_v33 = vpop.f32.mrf.mxu0  ;;  %v1313_v34 = vpop.f32.mrf.mxu1 }
 0x102   : > { %v1147_v35 = vpack.c.bf16 %v720_v29, %v719_v25  ;;  %v1187_v36 = vpack.c.bf16 %v736_v30, %v735_v26  ;;  %v607_v37 = vadd.f32 %v1264_v31, %v1603_v52  ;;  %v671_v38 = vadd.f32 %v1312_v32, %v1603_v52 }
 0x103   : > { %v1266_v39 = vpop.f32.mrf.mxu0  ;;  %v1314_v40 = vpop.f32.mrf.mxu1 }
 0x104   : > { %1219 = vst [vmem:[%s1613_s8 + $0x8] sm:$0xff] %v1147_v35   ;;  %1227 = vst [vmem:[%s1613_s8 + $0x48] sm:$0xff] %v1187_v36   ;;  %v1267_v41 = vadd.f32 %v1266_v39, %v1265_v33  ;;  %v1315_v42 = vadd.f32 %v1314_v40, %v1313_v34  ;;  %v721_v47 = vmax.f32 %v607_v37, 0.0  ;;  %v737_v48 = vmax.f32 %v671_v38, 0.0 }
 0x105   : > { %v1268_v43 = vpop.f32.mrf.mxu0  ;;  %v1316_v44 = vpop.f32.mrf.mxu1 }
 0x106   : > { %v610_v45 = vadd.f32 %v1267_v41, %v1603_v52  ;;  %v674_v46 = vadd.f32 %v1315_v42, %v1603_v52 }
 0x107   : > { %v1269_v49 = vpop.f32.mrf.mxu0  ;;  %v1317_v50 = vpop.f32.mrf.mxu1 }
 0x108   : > { %v722_v51 = vmax.f32 %v610_v45, 0.0  ;;  %v738_v53 = vmax.f32 %v674_v46, 0.0  ;;  %v1270_v54 = vadd.f32 %v1269_v49, %v1268_v43  ;;  %v1318_v55 = vadd.f32 %v1317_v50, %v1316_v44 }
 0x109   : > { %v1271_v56 = vpop.f32.mrf.mxu0  ;;  %v1319_v57 = vpop.f32.mrf.mxu1 }
 0x10a   : > { %v1152_v58 = vpack.c.bf16 %v722_v51, %v721_v47  ;;  %v1192_v59 = vpack.c.bf16 %v738_v53, %v737_v48  ;;  %v615_v60 = vadd.f32 %v1270_v54, %v1603_v52  ;;  %v679_v61 = vadd.f32 %v1318_v55, %v1603_v52 }
 0x10b   : > { %v1272_v62 = vpop.f32.mrf.mxu0  ;;  %v1320_v63 = vpop.f32.mrf.mxu1 }
 0x10c   : > { %1220 = vst [vmem:[%s1613_s8 + $0x10] sm:$0xff] %v1152_v58   ;;  %1228 = vst [vmem:[%s1613_s8 + $0x50] sm:$0xff] %v1192_v59   ;;  %v1273_v0 = vadd.f32 %v1272_v62, %v1271_v56  ;;  %v1321_v1 = vadd.f32 %v1320_v63, %v1319_v57  ;;  %v723_v6 = vmax.f32 %v615_v60, 0.0  ;;  %v739_v7 = vmax.f32 %v679_v61, 0.0 }
 0x10d   : > { %v1274_v2 = vpop.f32.mrf.mxu0  ;;  %v1322_v3 = vpop.f32.mrf.mxu1 }
 0x10e   : > { %v618_v4 = vadd.f32 %v1273_v0, %v1603_v52  ;;  %v682_v5 = vadd.f32 %v1321_v1, %v1603_v52 }
 0x10f   : > { %v1275_v8 = vpop.f32.mrf.mxu0  ;;  %v1323_v9 = vpop.f32.mrf.mxu1 }
 0x110   : > { %v724_v10 = vmax.f32 %v618_v4, 0.0  ;;  %v740_v11 = vmax.f32 %v682_v5, 0.0  ;;  %v1276_v12 = vadd.f32 %v1275_v8, %v1274_v2  ;;  %v1324_v13 = vadd.f32 %v1323_v9, %v1322_v3 }
 0x111   : > { %v1277_v14 = vpop.f32.mrf.mxu0  ;;  %v1325_v15 = vpop.f32.mrf.mxu1 }
 0x112   : > { %v1157_v16 = vpack.c.bf16 %v724_v10, %v723_v6  ;;  %v1197_v17 = vpack.c.bf16 %v740_v11, %v739_v7  ;;  %v623_v18 = vadd.f32 %v1276_v12, %v1603_v52  ;;  %v687_v19 = vadd.f32 %v1324_v13, %v1603_v52 }
 0x113   : > { %v1278_v20 = vpop.f32.mrf.mxu0  ;;  %v1326_v21 = vpop.f32.mrf.mxu1 }
 0x114   : > { %1221 = vst [vmem:[%s1613_s8 + $0x18] sm:$0xff] %v1157_v16   ;;  %1229 = vst [vmem:[%s1613_s8 + $0x58] sm:$0xff] %v1197_v17   ;;  %v1279_v22 = vadd.f32 %v1278_v20, %v1277_v14  ;;  %v1327_v23 = vadd.f32 %v1326_v21, %v1325_v15  ;;  %v725_v28 = vmax.f32 %v623_v18, 0.0  ;;  %v741_v29 = vmax.f32 %v687_v19, 0.0 }
 0x115   : > { %v1280_v24 = vpop.f32.mrf.mxu0  ;;  %v1328_v25 = vpop.f32.mrf.mxu1 }
 0x116   : > { %v626_v26 = vadd.f32 %v1279_v22, %v1603_v52  ;;  %v690_v27 = vadd.f32 %v1327_v23, %v1603_v52 }
 0x117   : > { %v1281_v30 = vpop.f32.mrf.mxu0  ;;  %v1329_v31 = vpop.f32.mrf.mxu1 }
 0x118   : > { %v726_v32 = vmax.f32 %v626_v26, 0.0  ;;  %v742_v33 = vmax.f32 %v690_v27, 0.0  ;;  %v1282_v34 = vadd.f32 %v1281_v30, %v1280_v24  ;;  %v1330_v35 = vadd.f32 %v1329_v31, %v1328_v25 }
 0x119   : > { %v1283_v36 = vpop.f32.mrf.mxu0  ;;  %v1331_v37 = vpop.f32.mrf.mxu1 }
 0x11a   : > { %v1162_v38 = vpack.c.bf16 %v726_v32, %v725_v28  ;;  %v1202_v39 = vpack.c.bf16 %v742_v33, %v741_v29  ;;  %v631_v40 = vadd.f32 %v1282_v34, %v1603_v52  ;;  %v695_v41 = vadd.f32 %v1330_v35, %v1603_v52 }
 0x11b   : > { %v1284_v42 = vpop.f32.mrf.mxu0  ;;  %v1332_v43 = vpop.f32.mrf.mxu1 }
 0x11c   : > { %1222 = vst [vmem:[%s1613_s8 + $0x20] sm:$0xff] %v1162_v38   ;;  %1230 = vst [vmem:[%s1613_s8 + $0x60] sm:$0xff] %v1202_v39   ;;  %v1285_v44 = vadd.f32 %v1284_v42, %v1283_v36  ;;  %v1333_v45 = vadd.f32 %v1332_v43, %v1331_v37  ;;  %v727_v50 = vmax.f32 %v631_v40, 0.0  ;;  %v743_v51 = vmax.f32 %v695_v41, 0.0 }
 0x11d   : > { %v1286_v46 = vpop.f32.mrf.mxu0  ;;  %v1334_v47 = vpop.f32.mrf.mxu1 }
 0x11e   : > { %v634_v48 = vadd.f32 %v1285_v44, %v1603_v52  ;;  %v698_v49 = vadd.f32 %v1333_v45, %v1603_v52 }
 0x11f   : > { %v1287_v53 = vpop.f32.mrf.mxu0  ;;  %v1335_v54 = vpop.f32.mrf.mxu1 }
 0x120   : > { %v728_v55 = vmax.f32 %v634_v48, 0.0  ;;  %v744_v56 = vmax.f32 %v698_v49, 0.0  ;;  %v1288_v57 = vadd.f32 %v1287_v53, %v1286_v46  ;;  %v1336_v58 = vadd.f32 %v1335_v54, %v1334_v47 }
 0x121   : > { %v1289_v59 = vpop.f32.mrf.mxu0  ;;  %v1337_v60 = vpop.f32.mrf.mxu1 }
 0x122   : > { %v1167_v61 = vpack.c.bf16 %v728_v55, %v727_v50  ;;  %v1207_v62 = vpack.c.bf16 %v744_v56, %v743_v51  ;;  %v639_v63 = vadd.f32 %v1288_v57, %v1603_v52  ;;  %v703_v0 = vadd.f32 %v1336_v58, %v1603_v52 }
 0x123   : > { %v1290_v1 = vpop.f32.mrf.mxu0  ;;  %v1338_v2 = vpop.f32.mrf.mxu1 }
 0x124   : > { %1223 = vst [vmem:[%s1613_s8 + $0x28] sm:$0xff] %v1167_v61   ;;  %1231 = vst [vmem:[%s1613_s8 + $0x68] sm:$0xff] %v1207_v62   ;;  %v1291_v3 = vadd.f32 %v1290_v1, %v1289_v59  ;;  %v1339_v4 = vadd.f32 %v1338_v2, %v1337_v60  ;;  %v729_v9 = vmax.f32 %v639_v63, 0.0  ;;  %v745_v10 = vmax.f32 %v703_v0, 0.0 }
 0x125   : > { %v1292_v5 = vpop.f32.mrf.mxu0  ;;  %v1340_v6 = vpop.f32.mrf.mxu1 }
 0x126   : > { %v642_v7 = vadd.f32 %v1291_v3, %v1603_v52  ;;  %v706_v8 = vadd.f32 %v1339_v4, %v1603_v52 }
 0x127   : > { %v1293_v11 = vpop.f32.mrf.mxu0  ;;  %v1341_v12 = vpop.f32.mrf.mxu1 }
 0x128   : > { %v730_v13 = vmax.f32 %v642_v7, 0.0  ;;  %v746_v14 = vmax.f32 %v706_v8, 0.0  ;;  %v1294_v15 = vadd.f32 %v1293_v11, %v1292_v5  ;;  %v1342_v16 = vadd.f32 %v1341_v12, %v1340_v6 }
 0x129   : > { %v1295_v17 = vpop.f32.mrf.mxu0  ;;  %v1343_v18 = vpop.f32.mrf.mxu1 }
 0x12a   : > { %v1172_v19 = vpack.c.bf16 %v730_v13, %v729_v9  ;;  %v1212_v20 = vpack.c.bf16 %v746_v14, %v745_v10  ;;  %v647_v23 = vadd.f32 %v1294_v15, %v1603_v52  ;;  %v711_v24 = vadd.f32 %v1342_v16, %v1603_v52 }
 0x12b   : > { %v1296_v21 = vpop.f32.mrf.mxu0  ;;  %v1344_v22 = vpop.f32.mrf.mxu1 }
 0x12c   : > { %1224 = vst [vmem:[%s1613_s8 + $0x30] sm:$0xff] %v1172_v19   ;;  %1232 = vst [vmem:[%s1613_s8 + $0x70] sm:$0xff] %v1212_v20   ;;  %v1297_v25 = vadd.f32 %v1296_v21, %v1295_v17  ;;  %v1345_v26 = vadd.f32 %v1344_v22, %v1343_v18  ;;  %v731_v29 = vmax.f32 %v647_v23, 0.0  ;;  %v747_v30 = vmax.f32 %v711_v24, 0.0 }
 0x12e   : > { %v650_v27 = vadd.f32 %v1297_v25, %v1603_v52  ;;  %v714_v28 = vadd.f32 %v1345_v26, %v1603_v52 }
 0x130   : > { %v732_v31 = vmax.f32 %v650_v27, 0.0  ;;  %v748_v32 = vmax.f32 %v714_v28, 0.0 }
 0x132   : > { %v1177_v33 = vpack.c.bf16 %v732_v31, %v731_v29  ;;  %v1217_v34 = vpack.c.bf16 %v748_v32, %v747_v30 }
 0x134   : > { %1225 = vst [vmem:[%s1613_s8 + $0x38] sm:$0xff] %v1177_v33   ;;  %1233 = vst [vmem:[%s1613_s8 + $0x78] sm:$0xff] %v1217_v34  }
 0x135 PF: > { %s13_s14 = sadd.s32 1, %s1472_s14   ;;  %s1672_s12 = smov %s1468_s13 }
 0x136   : > { %p10_p5 = scmp.ge.s32.totalorder %s13_s14, 4   ;;  %s1673_s13 = smov %s1675_s15 }
 0x138   :  { %12 = sbr.rel (!%p10_p5) target bundleno = 2 (0x2), region = 68 }

// kernel: feature_extractor_forward.56
= control target key start
LH: loop header
LB: loop body
LE: loop exit
PB: predicated region body
PF: predicated region fallthrough
CT: control target
= control target key end

     0   :  { %s814_s6 = smov 0   ;;  %s1393_s0 = inlined_call_operand.vmem [shape: bf16[8,130,128], index: 0, kind: input, shape index: {}]   ;;  %s1394_s1 = inlined_call_operand.vmem [shape: bf16[8,80,128], index: 1, kind: output, shape index: {}]  }
   0x1 LB: > { %s738_s7 = sadd.s32 4294967295, %s802_s6   ;;  %p742_p0 = scmp.ge.s32.totalorder %s802_s6, 1  ;;  %s802_s6 = sphi %s814_s6, %s11_s6  }
   0x2   : > { %p87_p1 = scmp.lt.s32.totalorder %s802_s6, 9 }
   0x4   : > { %p88_p2 = pnand %p742_p0, %p87_p1 }
   0x6   : > { %91 = sbr.rel (%p88_p2) target bundleno = 117 (0x75), region = 24 }
   0xb   : > { %p107_p3 = scmp.lt.s32.totalorder %s738_s7, 7  ;;  %vm128_vm0 = vsmask.f32 3328  ;;  %vm129_vm1 = vsmask.f32 7440  ;;  %vm267_vm3 = vcmask 1042432  }
   0xc   : > { %vm874_vm2 = vmor %vm128_vm0, %vm129_vm1  ;;  %vm268_vm4 = vcmask 1046532   ;;  %vm349_vm6 = vsmask.f32 2304  ;;  %vm350_vm7 = vsmask.f32 6416  ;;  %vm443_vm9 = vcmask 1041408  }
   0xd   : > { %s1433_s7 = smov (!%p107_p3, %s738_s7), 7  ;;  %vm973_vm5 = vmor %vm267_vm3, %vm268_vm4  ;;  %vm444_vm10 = vcmask 1045508   ;;  %vm525_vm12 = vsmask.f32 1280  ;;  %vm526_vm13 = vsmask.f32 5392 }
   0xe   : > { %s786_s8 = smul.u32 68, %s1433_s7  ;;  %vm1101_vm8 = vmor %vm349_vm6, %vm350_vm7  ;;  %vm619_vm15 = vcmask 1040384   ;;  %vm620_vm0 = vcmask 1044484  }
   0xf   : > { %vm1182_vm11 = vmor %vm443_vm9, %vm444_vm10  ;;  %s787_s12 = smul.u32 40, %s1433_s7 }
  0x10   : > { %s828_s11 = scalar_lea.vmem %s1393_s0, %s786_s8  ;;  %vm1279_vm14 = vmor %vm525_vm12, %vm526_vm13 }
  0x11   : > { %v831_v0 = vld [vmem:[%s828_s11] sm:$0xf]  ;;  %v834_v1 = vld [vmem:[%s828_s11 + $0x4] sm:$0xf]  ;;  %v837_v2 = vld [vmem:[%s828_s11 + $0x8] sm:$0xf]  ;;  %s116_s15 = scalar_lea.vmem %s1394_s1, %s787_s12 }
  0x12   : > { %v840_v3 = vld [vmem:[%s828_s11 + $0xc] sm:$0xf]  ;;  %v132_v4 = vshrl.u32 %v831_v0, 16  ;;  %v135_v5 = vshll.u32 %v831_v0, 16  ;;  %v845_v6 = vld [vmem:[%s828_s11 + $0x10] sm:$0xf]  ;;  %vm1344_vm1 = vmor %vm619_vm15, %vm620_vm0 }
  0x13   : > { %v141_v7 = vshll.u32 %v834_v1, 16  ;;  %v145_v8 = vshrl.u32 %v834_v1, 16  ;;  %v151_v9 = vshll.u32 %v837_v2, 16  ;;  %v155_v10 = vshrl.u32 %v837_v2, 16  ;;  %v852_v11 = vld [vmem:[%s828_s11 + $0x14] sm:$0xf] }
  0x14   : > { %v134_v12 = vrot.slane %v132_v4, 4  ;;  %v137_v13 = vrot.slane %v135_v5, 5  ;;  %v855_v14 = vshll.u32 %v840_v3, 16  ;;  %v858_v15 = vshrl.u32 %v840_v3, 16  ;;  %v870_v24 = vld [vmem:[%s828_s11 + $0x18] sm:$0xf] }
  0x15   : > { %v143_v16 = vrot.slane %v141_v7, 5  ;;  %v147_v17 = vrot.slane %v145_v8, 4  ;;  %v153_v18 = vrot.slane %v151_v9, 5  ;;  %v157_v19 = vrot.slane %v155_v10, 4  ;;  %v889_v34 = vld [vmem:[%s828_s11 + $0x1c] sm:$0xf] }
  0x16   : > { %v138_v20 = vor.u32 %v137_v13, %v134_v12  ;;  %v163_v21 = vrot.slane %v855_v14, 5  ;;  %v167_v22 = vrot.slane %v858_v15, 4  ;;  %v867_v23 = vshll.u32 %v845_v6, 16  ;;  %v894_v39 = vld [vmem:[%s828_s11 + $0x20] sm:$0xf] }
  0x17   : > { %v148_v26 = vor.u32 %v147_v17, %v143_v16  ;;  %v158_v27 = vor.u32 %v157_v19, %v153_v18  ;;  %v879_v28 = vshrl.u32 %v845_v6, 16  ;;  %v882_v29 = vshll.u32 %v852_v11, 16  ;;  %v903_v44 = vld [vmem:[%s828_s11 + $0x24] sm:$0xf]  ;;  %v930_v57 = vld [vmem:[%s828_s11 + $0x28] sm:$0x1] }
  0x18   : > { %v139_v30 = vrot.slane %v138_v20, 4  ;;  %v168_v31 = vor.u32 %v167_v22, %v163_v21  ;;  %v173_v32 = vrot.slane %v867_v23, 5  ;;  %v886_v33 = vshrl.u32 %v852_v11, 16 }
  0x19   : > { %v149_v35 = vrot.slane %v148_v26, 4  ;;  %v159_v36 = vrot.slane %v158_v27, 4  ;;  %v177_v37 = vrot.slane %v879_v28, 4  ;;  %v183_v38 = vrot.slane %v882_v29, 5  ;;  %v255_v27 = vld [vmem:[%s828_s11] sm:$0xe] }
  0x1a   : > { %v144_v40 = vsel %vm874_vm2, %v139_v30, %v143_v16  ;;  %v169_v41 = vrot.slane %v168_v31, 4  ;;  %v187_v42 = vrot.slane %v886_v33, 4  ;;  %v900_v43 = vshll.u32 %v870_v24, 16 }
  0x1b   : > { %v154_v45 = vsel %vm874_vm2, %v149_v35, %v153_v18  ;;  %v909_v46 = vsel %vm874_vm2, %v159_v36, %v163_v21  ;;  %v178_v47 = vor.u32 %v177_v37, %v173_v32  ;;  %v912_v48 = vshrl.u32 %v870_v24, 16 }
  0x1c   : > { %v916_v49 = vsel %vm874_vm2, %v169_v41, %v173_v32  ;;  %v188_v50 = vor.u32 %v187_v42, %v183_v38  ;;  %v193_v51 = vrot.slane %v900_v43, 5  ;;  %v920_v52 = vshll.u32 %v889_v34, 16 }
  0x1d   : > { %v179_v53 = vrot.slane %v178_v47, 4  ;;  %v197_v54 = vrot.slane %v912_v48, 4  ;;  %v924_v55 = vshrl.u32 %v889_v34, 16  ;;  %v927_v56 = vshll.u32 %v894_v39, 16 }
  0x1e   : > { %1403 = vst [vmem:[#allocation2_spill] sm:$0xff] %v920_v52  ;;  %v189_v58 = vrot.slane %v188_v50, 4  ;;  %v203_v59 = vrot.slane %v920_v52, 5  ;;  %v934_v60 = vshrl.u32 %v894_v39, 16  ;;  %v937_v61 = vshll.u32 %v903_v44, 16 }
  0x1f   : > { %1404 = vst [vmem:[#allocation3_spill] sm:$0xff] %v927_v56  ;;  %v941_v62 = vsel %vm874_vm2, %v179_v53, %v183_v38  ;;  %v198_v63 = vor.u32 %v197_v54, %v193_v51  ;;  %v207_v4 = vrot.slane %v924_v55, 4  ;;  %v213_v5 = vrot.slane %v927_v56, 5 }
  0x20   : > { %1405 = vst [vmem:[#allocation4_spill] sm:$0xff] %v937_v61  ;;  %v947_v7 = vsel %vm874_vm2, %v189_v58, %v193_v51  ;;  %v217_v8 = vrot.slane %v934_v60, 4  ;;  %v223_v12 = vrot.slane %v937_v61, 5  ;;  %v952_v13 = vshrl.u32 %v903_v44, 16 }
  0x21   : > { %v199_v16 = vrot.slane %v198_v63, 4  ;;  %v208_v17 = vor.u32 %v207_v4, %v203_v59  ;;  %v231_v18 = vshll.u32 %v930_v57, 16  ;;  %v956_v19 = vmax.bf16 %v144_v40, %v831_v0 }
  0x22   : > { %1406 = vst [vmem:[#allocation5_spill] sm:$0xff] %v952_v13  ;;  %v218_v20 = vor.u32 %v217_v8, %v213_v5  ;;  %v227_v21 = vrot.slane %v952_v13, 4  ;;  %v246_v22 = vmax.bf16 %v154_v45, %v834_v1  ;;  %v247_v26 = vmax.bf16 %v909_v46, %v837_v2 }
  0x23   : > { %v204_v30 = vsel %vm874_vm2, %v199_v16, %v203_v59  ;;  %v209_v31 = vrot.slane %v208_v17, 4  ;;  %v233_v32 = vrot.slane %v231_v18, 5  ;;  %v248_v35 = vmax.bf16 %v916_v49, %v840_v3 }
  0x24   : > { %v219_v36 = vrot.slane %v218_v20, 4  ;;  %v228_v0 = vor.u32 %v227_v21, %v223_v12  ;;  %v249_v37 = vmax.bf16 %v941_v62, %v845_v6  ;;  %v250_v38 = vmax.bf16 %v947_v7, %v852_v11 }
  0x25   : > { %v214_v41 = vsel %vm874_vm2, %v209_v31, %v213_v5  ;;  %v251_v42 = vmax.bf16 %v204_v30, %v870_v24  ;;  %v745_v45 = vrot.slane %v255_v27, 9  ;;  %v272_v46 = vrot.slane %v834_v1, 5 }
  0x26   : > { %v224_v47 = vsel %vm874_vm2, %v219_v36, %v223_v12  ;;  %v229_v49 = vrot.slane %v228_v0, 4  ;;  %v252_v50 = vmax.bf16 %v214_v41, %v889_v34  ;;  %v275_v51 = vrot.slane %v837_v2, 5 }
  0x27   : > { %v253_v53 = vmax.bf16 %v224_v47, %v894_v39  ;;  %v273_v54 = vsel %vm973_vm5, %v745_v45, %v272_v46  ;;  %v274_v58 = vrot.slane %v272_v46, 4  ;;  %v278_v59 = vrot.slane %v840_v3, 5 }
  0x28   : > { %v234_v62 = vsel %vm874_vm2, %v229_v49, %v233_v32  ;;  %v277_v1 = vrot.slane %v275_v51, 4  ;;  %v281_v63 = vrot.slane %v845_v6, 5  ;;  %v284_v4 = vrot.slane %v852_v11, 5 }
  0x29   : > { %v254_v5 = vmax.bf16 %v234_v62, %v903_v44  ;;  %v276_v7 = vsel %vm973_vm5, %v274_v58, %v275_v51  ;;  %v280_v8 = vrot.slane %v278_v59, 4  ;;  %v287_v12 = vrot.slane %v870_v24, 5  ;;  %v323_v62 = vld [vmem:[%s828_s11 + $0x2c] sm:$0x1] }
  0x2a   : > { %v999_v16 = vsel %vm973_vm5, %v277_v1, %v278_v59  ;;  %v283_v17 = vrot.slane %v281_v63, 4  ;;  %v286_v25 = vrot.slane %v284_v4, 4  ;;  %v290_v18 = vrot.slane %v889_v34, 5 }
  0x2b   : > { %v1004_v20 = vsel %vm973_vm5, %v280_v8, %v281_v63  ;;  %v289_v21 = vrot.slane %v287_v12, 4  ;;  %v293_v27 = vrot.slane %v894_v39, 5  ;;  %v296_v30 = vrot.slane %v903_v44, 5  ;;  %v1060_v8 = vld [vmem:[%s828_s11 + $0x28] sm:$0xf] }
  0x2c   : > { %v1010_v31 = vsel %vm973_vm5, %v283_v17, %v284_v4  ;;  %v1014_v32 = vsel %vm973_vm5, %v286_v25, %v287_v12  ;;  %v292_v36 = vrot.slane %v290_v18, 4  ;;  %v299_v0 = vrot.slane %v930_v57, 5 }
  0x2d   : > { %v1019_v41 = vsel %vm973_vm5, %v289_v21, %v290_v18  ;;  %v295_v45 = vrot.slane %v293_v27, 4  ;;  %v298_v46 = vrot.slane %v296_v30, 4  ;;  %v311_v47 = vmax.bf16 %v273_v54, %v956_v19 }
  0x2e   : > { %v1024_v49 = vsel %vm973_vm5, %v292_v36, %v293_v27  ;;  %v1026_v58 = vmax.bf16 %v276_v7, %v246_v22  ;;  %v1029_v57 = vmax.bf16 %v999_v16, %v247_v26  ;;  %v1032_v59 = vmax.bf16 %v1004_v20, %v248_v35  ;;  %v321_v7 = vld [vmem:[%s828_s11 + $0x4] sm:$0xe] }
  0x2f   : > { %v1037_v19 = vsel %vm973_vm5, %v295_v45, %v296_v30  ;;  %v300_v54 = vsel %vm973_vm5, %v298_v46, %v299_v0  ;;  %v1042_v1 = vmax.bf16 %v1010_v31, %v249_v37  ;;  %v1045_v22 = vmax.bf16 %v1014_v32, %v250_v38 }
  0x30   : > { %v1048_v26 = vmax.bf16 %v1019_v41, %v251_v42  ;;  %v1051_v35 = vmax.bf16 %v1024_v49, %v252_v50  ;;  %v1054_v63 = vmax.bf16 %v1037_v19, %v253_v53  ;;  %v1056_v4 = vmax.bf16 %v300_v54, %v254_v5 }
  0x31   : > { %v746_v12 = vrot.slane %v321_v7, 9  ;;  %v330_v37 = vrot.slane %v1060_v8, 5  ;;  %v333_v17 = vrot.slane %v323_v62, 5  ;;  %v353_v45 = vshrl.u32 %v321_v7, 16 }
  0x32   : > { %v362_v54 = vrot.slane %v151_v9, 6  ;;  %v371_v40 = vrot.slane %v879_v28, 5  ;;  %v386_v53 = vrot.slane %v924_v55, 5  ;;  %v387_v50 = vrot.slane %v920_v52, 6 }
  0x33   : > { %v329_v25 = vsel %vm973_vm5, %v746_v12, %v275_v51  ;;  %v1077_v18 = vsel %vm973_vm5, %v298_v46, %v330_v37  ;;  %v332_v21 = vrot.slane %v330_v37, 4  ;;  %v356_v51 = vshll.u32 %v321_v7, 16 }
  0x34   : > { %v338_v30 = vmax.bf16 %v329_v25, %v311_v47  ;;  %v361_v46 = vrot.slane %v155_v10, 5  ;;  %v355_v12 = vrot.slane %v353_v45, 5  ;;  %v366_v37 = vrot.slane %v858_v15, 5 }
  0x35   : > { %v1087_v62 = vsel %vm973_vm5, %v332_v21, %v333_v17  ;;  %v367_v25 = vrot.slane %v855_v14, 6  ;;  %v358_v0 = vrot.slane %v356_v51, 6  ;;  %v372_v7 = vrot.slane %v867_v23, 6 }
  0x36   : > { %v363_v36 = vor.u32 %v362_v54, %v361_v46  ;;  %v376_v17 = vrot.slane %v886_v33, 5  ;;  %v377_v21 = vrot.slane %v882_v29, 6  ;;  %v381_v45 = vrot.slane %v912_v48, 5 }
  0x37   : > { %v368_v9 = vor.u32 %v367_v25, %v366_v37  ;;  %v359_v47 = vor.u32 %v358_v0, %v355_v12  ;;  %v373_v46 = vor.u32 %v372_v7, %v371_v40  ;;  %v382_v54 = vrot.slane %v900_v43, 6 }
  0x38   : > { %v365_v51 = vrot.slane %v363_v36, 4  ;;  %v378_v5 = vor.u32 %v377_v21, %v376_v17  ;;  %v388_v40 = vor.u32 %v387_v50, %v386_v53  ;;  %v391_v7 = vrot.slane %v934_v60, 5  ;;  %v1117_v17 = vld [vmem:[%s828_s11 + $0x2c] sm:$0x3] }
  0x39   : > { %v370_v27 = vrot.slane %v368_v9, 4  ;;  %v360_v37 = vrot.slane %v359_v47, 4  ;;  %v375_v42 = vrot.slane %v373_v46, 4  ;;  %v383_v38 = vor.u32 %v382_v54, %v381_v45 }
  0x3a   : > { %v369_v25 = vsel %vm1101_vm8, %v365_v51, %v368_v9  ;;  %v380_v12 = vrot.slane %v378_v5, 4  ;;  %v392_v9 = vrot.slane %v927_v56, 6  ;;  %v390_v51 = vrot.slane %v388_v40, 4  ;;  %v440_v56 = vld [vmem:[%s828_s11 + $0x4] sm:$0xc] }
  0x3b   : > { %v374_v0 = vsel %vm1101_vm8, %v370_v27, %v373_v46  ;;  %v364_v21 = vsel %vm1101_vm8, %v360_v37, %v363_v36  ;;  %v379_v47 = vsel %vm1101_vm8, %v375_v42, %v378_v5  ;;  %v385_v52 = vrot.slane %v383_v38, 4 }
  0x3c   : > { %v384_v45 = vsel %vm1101_vm8, %v380_v12, %v383_v38  ;;  %v396_v27 = vrot.slane %v952_v13, 5  ;;  %v397_v50 = vrot.slane %v937_v61, 6  ;;  %v393_v46 = vor.u32 %v392_v9, %v391_v7 }
  0x3d   : > { %v389_v53 = vsel %vm1101_vm8, %v385_v52, %v388_v40  ;;  %v1400_v36 = vshrl.u32 %v1060_v8, 16  ;;  %v1399_v42 = vshll.u32 %v1060_v8, 16  ;;  %v412_v54 = vshrl.u32 %v1117_v17, 16 }
  0x3e   : > { %v398_v5 = vor.u32 %v397_v50, %v396_v27  ;;  %v415_v37 = vshll.u32 %v1117_v17, 16  ;;  %v1134_v38 = vmax.bf16 %v364_v21, %v338_v30  ;;  %v394_v12 = vsel %vm1101_vm8, %v390_v51, %v393_v46 }
  0x3f   : > { %v395_v61 = vrot.slane %v393_v46, 4  ;;  %v404_v52 = vrot.slane %v1400_v36, 5  ;;  %v407_v40 = vrot.slane %v1399_v42, 6  ;;  %v414_v9 = vrot.slane %v412_v54, 5 }
  0x40   : > { %v400_v7 = vrot.slane %v398_v5, 4  ;;  %v417_v13 = vrot.slane %v415_v37, 6  ;;  %v1411_v27 = vmax.bf16 %v1026_v58, %v999_v16  ;;  %v1412_v51 = vmax.bf16 %v1029_v57, %v1004_v20 }
  0x41   : > { %v399_v30 = vsel %vm1101_vm8, %v395_v61, %v398_v5  ;;  %v408_v21 = vor.u32 %v407_v40, %v404_v52  ;;  %v1413_v42 = vmax.bf16 %v1032_v59, %v1010_v31  ;;  %v1414_v16 = vmax.bf16 %v1042_v1, %v1014_v32 }
  0x42   : > { %v431_v50 = vmax.bf16 %v369_v25, %v1411_v27  ;;  %v1151_v46 = vmax.bf16 %v374_v0, %v1412_v51  ;;  %v418_v54 = vor.u32 %v417_v13, %v414_v9  ;;  %v1415_v61 = vmax.bf16 %v1045_v22, %v1019_v41 }
  0x43   : > { %v1156_v36 = vmax.bf16 %v379_v47, %v1413_v42  ;;  %v1161_v58 = vmax.bf16 %v384_v45, %v1414_v16  ;;  %v1416_v20 = vmax.bf16 %v1048_v26, %v1024_v49  ;;  %v409_v31 = vsel %vm1101_vm8, %v400_v7, %v408_v21 }
  0x44   : > { %v1166_v25 = vmax.bf16 %v389_v53, %v1415_v61  ;;  %v410_v59 = vrot.slane %v408_v21, 4  ;;  %v1417_v13 = vmax.bf16 %v1051_v35, %v1037_v19  ;;  %v747_v1 = vrot.slane %v440_v56, 10 }
  0x45   : > { %v1171_v57 = vmax.bf16 %v394_v12, %v1416_v20  ;;  %v1420_v49 = vmax.bf16 %v1077_v18, %v1054_v63  ;;  %v448_v26 = vrot.slane %v837_v2, 6  ;;  %v451_v0 = vrot.slane %v840_v3, 6 }
  0x46   : > { %v1178_v32 = vmax.bf16 %v399_v30, %v1417_v13  ;;  %v454_v19 = vrot.slane %v845_v6, 6  ;;  %v419_v35 = vsel %vm1101_vm8, %v410_v59, %v418_v54  ;;  %v457_v47 = vrot.slane %v852_v11, 6 }
  0x47   : > { %v1189_v22 = vmax.bf16 %v409_v31, %v1420_v49  ;;  %v460_v45 = vrot.slane %v870_v24, 6  ;;  %v463_v56 = vrot.slane %v889_v34, 6  ;;  %v1421_v63 = vmax.bf16 %v1087_v62, %v1056_v4 }
  0x48   : > { %v449_v2 = vsel %vm1182_vm11, %v747_v1, %v448_v26  ;;  %v450_v53 = vrot.slane %v448_v26, 4  ;;  %v453_v42 = vrot.slane %v451_v0, 4  ;;  %v456_v5 = vrot.slane %v454_v19, 4  ;;  %v499_v26 = vld [vmem:[%s828_s11 + $0x30] sm:$0x3] }
  0x49   : > { %v439_v18 = vmax.bf16 %v419_v35, %v1421_v63  ;;  %v459_v37 = vrot.slane %v457_v47, 4  ;;  %v462_v12 = vrot.slane %v460_v45, 4  ;;  %v465_v10 = vrot.slane %v463_v56, 4  ;;  %v497_v35 = vld [vmem:[%s828_s11 + $0x8] sm:$0xc] }
  0x4a   : > { %v452_v52 = vsel %vm1182_vm11, %v450_v53, %v451_v0  ;;  %v1208_v40 = vsel %vm1182_vm11, %v453_v42, %v454_v19  ;;  %v466_v7 = vrot.slane %v894_v39, 6  ;;  %v469_v4 = vrot.slane %v903_v44, 6 }
  0x4b   : > { %v458_v62 = vsel %vm1182_vm11, %v456_v5, %v457_v47  ;;  %v461_v9 = vsel %vm1182_vm11, %v459_v37, %v460_v45  ;;  %v464_v27 = vsel %vm1182_vm11, %v462_v12, %v463_v56  ;;  %v472_v30 = vrot.slane %v1060_v8, 6  ;;  %v1241_v47 = vld [vmem:[%s828_s11 + $0x2c] sm:$0xf] }
  0x4c   : > { %v467_v21 = vsel %vm1182_vm11, %v465_v10, %v466_v7  ;;  %v468_v51 = vrot.slane %v466_v7, 4  ;;  %v471_v54 = vrot.slane %v469_v4, 4  ;;  %v475_v16 = vrot.slane %v1117_v17, 6 }
  0x4d   : > { %v474_v61 = vrot.slane %v472_v30, 4  ;;  %v487_v20 = vmax.bf16 %v449_v2, %v1134_v38  ;;  %v1223_v31 = vmax.bf16 %v452_v52, %v431_v50  ;;  %v489_v59 = vmax.bf16 %v1208_v40, %v1151_v46 }
  0x4e   : > { %v470_v13 = vsel %vm1182_vm11, %v468_v51, %v469_v4  ;;  %v473_v1 = vsel %vm1182_vm11, %v471_v54, %v472_v30  ;;  %v490_v17 = vmax.bf16 %v458_v62, %v1156_v36  ;;  %v491_v49 = vmax.bf16 %v461_v9, %v1161_v58 }
  0x4f   : > { %v476_v38 = vsel %vm1182_vm11, %v474_v61, %v475_v16  ;;  %v492_v50 = vmax.bf16 %v464_v27, %v1166_v25  ;;  %v493_v46 = vmax.bf16 %v467_v21, %v1171_v57  ;;  %v494_v19 = vmax.bf16 %v470_v13, %v1178_v32 }
  0x50   : > { %v495_v45 = vmax.bf16 %v473_v1, %v1189_v22  ;;  %v496_v56 = vmax.bf16 %v476_v38, %v439_v18  ;;  %v748_v63 = vrot.slane %v497_v35, 10  ;;  %v506_v36 = vrot.slane %v1241_v47, 6 }
  0x51   : > { %v509_v58 = vrot.slane %v499_v26, 6  ;;  %v515_v2 = vmax.bf16 %v1223_v31, %v1208_v40  ;;  %v1247_v53 = vmax.bf16 %v489_v59, %v458_v62  ;;  %v1249_v25 = vmax.bf16 %v490_v17, %v461_v9  ;;  %v1425_v26 = vld [vmem:[#allocation3_spill] sm:$0xff] }
  0x52   : > { %v505_v57 = vsel %vm1182_vm11, %v748_v63, %v451_v0  ;;  %v507_v32 = vsel %vm1182_vm11, %v474_v61, %v506_v36  ;;  %v508_v42 = vrot.slane %v506_v36, 4  ;;  %v1255_v22 = vmax.bf16 %v491_v49, %v464_v27 }
  0x53   : > { %v514_v18 = vmax.bf16 %v505_v57, %v487_v20  ;;  %v1257_v5 = vmax.bf16 %v492_v50, %v467_v21  ;;  %v1259_v37 = vmax.bf16 %v493_v46, %v470_v13  ;;  %v1261_v12 = vmax.bf16 %v494_v19, %v473_v1  ;;  %v1426_v19 = vld [vmem:[#allocation5_spill] sm:$0xff] }
  0x54   : > { %v510_v10 = vsel %vm1182_vm11, %v508_v42, %v509_v58  ;;  %v1265_v52 = vmax.bf16 %v507_v32, %v495_v45  ;;  %v529_v7 = vshrl.u32 %v497_v35, 16  ;;  %v532_v0 = vshll.u32 %v497_v35, 16  ;;  %v1291_v45 = vld [vmem:[%s828_s11 + $0x30] sm:$0x7] }
  0x55   : > { %v1267_v4 = vmax.bf16 %v510_v10, %v496_v56  ;;  %v537_v62 = vrot.slane %v858_v15, 6  ;;  %v538_v9 = vrot.slane %v855_v14, 7  ;;  %v542_v27 = vrot.slane %v879_v28, 6  ;;  %v1427_v32 = vld [vmem:[#allocation4_spill] sm:$0xff] }
  0x56   : > { %v531_v30 = vrot.slane %v529_v7, 6  ;;  %v534_v21 = vrot.slane %v532_v0, 7  ;;  %v543_v51 = vrot.slane %v867_v23, 7  ;;  %v547_v54 = vrot.slane %v886_v33, 6  ;;  %v1424_v23 = vld [vmem:[#allocation2_spill] sm:$0xff] }
  0x57   : > { %v539_v41 = vor.u32 %v538_v9, %v537_v62  ;;  %v548_v16 = vrot.slane %v882_v29, 7  ;;  %v552_v61 = vrot.slane %v912_v48, 6  ;;  %v553_v20 = vrot.slane %v900_v43, 7 }
  0x58   : > { %v535_v14 = vor.u32 %v534_v21, %v531_v30  ;;  %v544_v28 = vor.u32 %v543_v51, %v542_v27  ;;  %v557_v59 = vrot.slane %v924_v55, 6  ;;  %v558_v33 = vrot.slane %v1424_v23, 7 }
  0x59   : > { %v541_v13 = vrot.slane %v539_v41, 4  ;;  %v549_v1 = vor.u32 %v548_v16, %v547_v54  ;;  %v554_v29 = vor.u32 %v553_v20, %v552_v61  ;;  %v562_v48 = vrot.slane %v934_v60, 6 }
  0x5a   : > { %v536_v43 = vrot.slane %v535_v14, 4  ;;  %v546_v17 = vrot.slane %v544_v28, 4  ;;  %v559_v49 = vor.u32 %v558_v33, %v557_v59  ;;  %v563_v38 = vrot.slane %v1425_v26, 7 }
  0x5b   : > { %v545_v50 = vsel %vm1279_vm14, %v541_v13, %v544_v28  ;;  %v551_v46 = vrot.slane %v549_v1, 4  ;;  %v556_v55 = vrot.slane %v554_v29, 4  ;;  %v567_v35 = vrot.slane %v1426_v19, 6  ;;  %v616_v13 = vld [vmem:[%s828_s11 + $0x8] sm:$0x8] }
  0x5c   : > { %v540_v56 = vsel %vm1279_vm14, %v536_v43, %v539_v41  ;;  %v1297_v60 = vsel %vm1279_vm14, %v546_v17, %v549_v1  ;;  %v561_v63 = vrot.slane %v559_v49, 4  ;;  %v564_v36 = vor.u32 %v563_v38, %v562_v48 }
  0x5d   : > { %v1301_v58 = vsel %vm1279_vm14, %v551_v46, %v554_v29  ;;  %v1305_v57 = vsel %vm1279_vm14, %v556_v55, %v559_v49  ;;  %v568_v42 = vrot.slane %v1427_v32, 7  ;;  %v1428_v10 = vshrl.u32 %v1060_v8, 16 }
  0x5e   : > { %v1312_v0 = vsel %vm1279_vm14, %v561_v63, %v564_v36  ;;  %v566_v62 = vrot.slane %v564_v36, 4  ;;  %v1429_v9 = vshll.u32 %v1060_v8, 16  ;;  %v578_v30 = vshrl.u32 %v1241_v47, 16 }
  0x5f   : > { %v572_v7 = vrot.slane %v1428_v10, 6  ;;  %v569_v21 = vor.u32 %v568_v42, %v567_v35  ;;  %v581_v51 = vshll.u32 %v1241_v47, 16  ;;  %v588_v54 = vshrl.u32 %v1291_v45, 16 }
  0x60   : > { %v573_v27 = vrot.slane %v1429_v9, 7  ;;  %v591_v41 = vshll.u32 %v1291_v45, 16  ;;  %v580_v61 = vrot.slane %v578_v30, 6  ;;  %v1320_v20 = vmax.bf16 %v540_v56, %v514_v18 }
  0x61   : > { %v1325_v14 = vmax.bf16 %v545_v50, %v515_v2  ;;  %v570_v28 = vsel %vm1279_vm14, %v566_v62, %v569_v21  ;;  %v571_v59 = vrot.slane %v569_v21, 4  ;;  %v583_v23 = vrot.slane %v581_v51, 7 }
  0x62   : > { %v574_v16 = vor.u32 %v573_v27, %v572_v7  ;;  %v590_v33 = vrot.slane %v588_v54, 6  ;;  %v593_v29 = vrot.slane %v591_v41, 7  ;;  %v608_v48 = vmax.bf16 %v1297_v60, %v1247_v53 }
  0x63   : > { %v609_v18 = vmax.bf16 %v1301_v58, %v1249_v25  ;;  %v584_v31 = vor.u32 %v583_v23, %v580_v61  ;;  %v610_v2 = vmax.bf16 %v1305_v57, %v1255_v22  ;;  %v611_v43 = vmax.bf16 %v1312_v0, %v1257_v5 }
  0x64   : > { %v576_v1 = vrot.slane %v574_v16, 4  ;;  %v575_v40 = vsel %vm1279_vm14, %v571_v59, %v574_v16  ;;  %v594_v17 = vor.u32 %v593_v29, %v590_v33  ;;  %v612_v49 = vmax.bf16 %v570_v28, %v1259_v37 }
  0x65   : > { %v613_v26 = vmax.bf16 %v575_v40, %v1261_v12  ;;  %v749_v25 = vrot.slane %v616_v13, 11  ;;  %v586_v50 = vrot.slane %v584_v31, 4  ;;  %v624_v22 = vrot.slane %v840_v3, 7 }
  0x66   : > { %v585_v38 = vsel %vm1279_vm14, %v576_v1, %v584_v31  ;;  %v627_v5 = vrot.slane %v845_v6, 7  ;;  %v630_v37 = vrot.slane %v852_v11, 7  ;;  %v633_v12 = vrot.slane %v870_v24, 7 }
  0x67   : > { %v614_v46 = vmax.bf16 %v585_v38, %v1265_v52  ;;  %v636_v55 = vrot.slane %v889_v34, 7  ;;  %v595_v19 = vsel %vm1279_vm14, %v586_v50, %v594_v17  ;;  %v625_v35 = vsel %vm1344_vm1, %v749_v25, %v624_v22 }
  0x68   : > { %v626_v56 = vrot.slane %v624_v22, 4  ;;  %v629_v60 = vrot.slane %v627_v5, 4  ;;  %v615_v3 = vmax.bf16 %v595_v19, %v1267_v4  ;;  %v632_v6 = vrot.slane %v630_v37, 4 }
  0x69   : > { %v635_v63 = vrot.slane %v633_v12, 4  ;;  %v638_v52 = vrot.slane %v636_v55, 4  ;;  %v639_v34 = vrot.slane %v894_v39, 7  ;;  %v642_v15 = vrot.slane %v903_v44, 7 }
  0x6a   : > { %v628_v11 = vsel %vm1344_vm1, %v626_v56, %v627_v5  ;;  %v631_v24 = vsel %vm1344_vm1, %v629_v60, %v630_v37  ;;  %v634_v36 = vsel %vm1344_vm1, %v632_v6, %v633_v12  ;;  %v645_v4 = vrot.slane %v1060_v8, 7 }
  0x6b   : > { %v637_v58 = vsel %vm1344_vm1, %v635_v63, %v636_v55  ;;  %v648_v57 = vrot.slane %v1241_v47, 7  ;;  %v640_v32 = vsel %vm1344_vm1, %v638_v52, %v639_v34  ;;  %v641_v42 = vrot.slane %v639_v34, 4 }
  0x6c   : > { %v644_v10 = vrot.slane %v642_v15, 4  ;;  %v651_v39 = vrot.slane %v1291_v45, 7  ;;  %v647_v7 = vrot.slane %v645_v4, 4  ;;  %v663_v0 = vmax.bf16 %v625_v35, %v1320_v20 }
  0x6d   : > { %v650_v44 = vrot.slane %v648_v57, 4  ;;  %v664_v62 = vmax.bf16 %v628_v11, %v1325_v14  ;;  %v643_v9 = vsel %vm1344_vm1, %v641_v42, %v642_v15  ;;  %v665_v47 = vmax.bf16 %v631_v24, %v608_v48 }
  0x6e   : > { %v646_v8 = vsel %vm1344_vm1, %v644_v10, %v645_v4  ;;  %v666_v27 = vmax.bf16 %v634_v36, %v609_v18  ;;  %v649_v30 = vsel %vm1344_vm1, %v647_v7, %v648_v57  ;;  %v667_v21 = vmax.bf16 %v637_v58, %v610_v2 }
  0x6f   : > { %v652_v45 = vsel %vm1344_vm1, %v650_v44, %v651_v39  ;;  %v668_v51 = vmax.bf16 %v640_v32, %v611_v43  ;;  %v669_v54 = vmax.bf16 %v643_v9, %v612_v49  ;;  %v670_v41 = vmax.bf16 %v646_v8, %v613_v26 }
  0x70   : > { %v671_v16 = vmax.bf16 %v649_v30, %v614_v46  ;;  %v672_v61 = vmax.bf16 %v652_v45, %v615_v3  ;;  %v777_v20 = vcombine.low %v663_v0, %v664_v62  ;;  %v778_v14 = vcombine.low %v665_v47, %v666_v27 }
  0x71   : > { %v780_v28 = vcombine.low %v667_v21, %v668_v51  ;;  %v782_v59 = vcombine.low %v669_v54, %v670_v41 }
  0x72   : > { %v784_v23 = vcombine.low %v671_v16, %v672_v61  ;;  %756 = vst [vmem:[%s116_s15] sm:$0xff] %v777_v20   ;;  %779 = vst [vmem:[%s116_s15 + $0x8] sm:$0xff] %v778_v14  }
  0x73   : > { %781 = vst [vmem:[%s116_s15 + $0x10] sm:$0xff] %v780_v28   ;;  %783 = vst [vmem:[%s116_s15 + $0x18] sm:$0xff] %v782_v59  }
  0x74   : > { %785 = vst [vmem:[%s116_s15 + $0x20] sm:$0xff] %v784_v23  }
  0x75 PF: > { %s11_s6 = sadd.s32 1, %s802_s6  }
  0x76   : > { %p8_p4 = scmp.ge.s32.totalorder %s11_s6, 10  }
  0x78   :  { %10 = sbr.rel (!%p8_p4) target bundleno = 1 (0x1), region = 54 }

// kernel: feature_extractor_forward.57
= control target key start
LH: loop header
LB: loop body
LE: loop exit
PB: predicated region body
PF: predicated region fallthrough
CT: control target
= control target key end

     0   :  { %s733_s12 = smov 0   ;;  %s735_s13 = smov 0   ;;  %s806_s0 = inlined_call_operand.vmem [shape: bf16[128,128], index: 0, kind: input, shape index: {}]   ;;  %s807_s1 = inlined_call_operand.vmem [shape: bf16[128,128], index: 1, kind: input, shape index: {}]   ;;  %s808_s2 = inlined_call_operand.vmem [shape: f32[1,128], index: 2, kind: input, shape index: {}]   ;;  %s809_s3 = inlined_call_operand.vmem [shape: bf16[128,128], index: 3, kind: output, shape index: {}]  }
   0x1   :  { %s737_s14 = smov 0  }
   0x2 LB: > { %s25_s15 = sadd.s32 1, %s707_s13  ;;  %p542_p0 = scmp.ge.s32.totalorder %s711_s14, 1  ;;  %s711_s14 = sphi %s737_s14, %s13_s14   ;;  %s707_s13 = sphi %s735_s13, %s811_s13   ;;  %s703_s12 = sphi %s733_s12, %s810_s12  }
   0x3   : > { %p27_p1 = scmp.ge.s32.totalorder %s25_s15, 2  ;;  %p169_p2 = scmp.lt.s32.totalorder %s711_s14, 3 }
   0x5   : > { %s813_s15 = smov (%p27_p1, %s25_s15), 0  ;;  %p170_p3 = pnand %p542_p0, %p169_p2 }
   0x6   : > { %s543_s18 = sshll.u32 (!%p170_p3), %s703_s12, 3 }
   0x7   : > { %173 = sbr.rel (%p170_p3) target bundleno = 249 (0xf9), region = 32  ;;  %p204_p4 = scmp.lt.s32.totalorder (!%p170_p3), %s543_s18, 15 }
   0xc   : > { %v677_v0 = vld [vmem:[%s807_s1 + $0x38] sm:$0xff]   ;;  %v678_v1 = vld [vmem:[%s807_s1 + $0x30] sm:$0xff]   ;;  %s815_s18 = smov (!%p204_p4, %s543_s18), 15  ;;  %v679_v2 = vld [vmem:[%s807_s1 + $0x28] sm:$0xff]  }
   0xd   : > { %613 = vmatprep.subr.bf16.mxu0 %v677_v0  ;;  %637 = vmatprep.subr.bf16.mxu1 %v677_v0  ;;  %s544_s23 = sshll.u32 %s815_s18, 2  ;;  %v680_v3 = vld [vmem:[%s807_s1 + $0x20] sm:$0xff]   ;;  %v681_v6 = vld [vmem:[%s807_s1 + $0x18] sm:$0xff]   ;;  %v682_v7 = vld [vmem:[%s807_s1 + $0x10] sm:$0xff]  }
   0xe   : > { %614 = vmatpush3.bf16.msra.mxu0 %v677_v0  ;;  %645 = vmatpush3.bf16.msra.mxu1 %v677_v0  ;;  %s768_s26 = scalar_lea.vmem %s806_s0, %s544_s23  ;;  %v683_v8 = vld [vmem:[%s807_s1 + $0x8] sm:$0xff]   ;;  %v684_v9 = vld [vmem:[%s807_s1] sm:$0xff]   ;;  %s223_s17 = scalar_lea.vmem %s809_s3, %s544_s23 }
   0xf   : > { %615 = vmatprep.subr.bf16.mxu0 %v678_v1  ;;  %638 = vmatprep.subr.bf16.mxu1 %v678_v1  ;;  %v685_v4 = vld [vmem:[%s768_s26] sm:$0xff]   ;;  %v686_v5 = vld [vmem:[%s768_s26 + $0x10] sm:$0xff]   ;;  %v687_v10 = vld [vmem:[%s768_s26 + $0x8] sm:$0xff]  }
  0x10   : > { %629 = vmatprep.mubr.bf16.mxu0 %v685_v4  ;;  %633 = vmatprep.mubr.bf16.mxu1 %v686_v5  ;;  %v688_v11 = vld [vmem:[%s768_s26 + $0x18] sm:$0xff]   ;;  %v547_v14 = vld [vmem:[%s808_s2] ss:$0 sm:$0xff] }
  0x12   : > { %616 = vmatpush3.bf16.msra.mxu0 %v678_v1  ;;  %646 = vmatpush3.bf16.msra.mxu1 %v678_v1 }
  0x13   : > { %617 = vmatprep.subr.bf16.mxu0 %v679_v2  ;;  %639 = vmatprep.subr.bf16.mxu1 %v679_v2 }
  0x16   : > { %618 = vmatpush3.bf16.msra.mxu0 %v679_v2  ;;  %647 = vmatpush3.bf16.msra.mxu1 %v679_v2 }
  0x17   : > { %619 = vmatprep.subr.bf16.mxu0 %v680_v3  ;;  %640 = vmatprep.subr.bf16.mxu1 %v680_v3 }
  0x1a   : > { %620 = vmatpush3.bf16.msra.mxu0 %v680_v3  ;;  %648 = vmatpush3.bf16.msra.mxu1 %v680_v3 }
  0x1b   : > { %621 = vmatprep.subr.bf16.mxu0 %v681_v6  ;;  %641 = vmatprep.subr.bf16.mxu1 %v681_v6 }
  0x1e   : > { %622 = vmatpush3.bf16.msra.mxu0 %v681_v6  ;;  %649 = vmatpush3.bf16.msra.mxu1 %v681_v6 }
  0x1f   : > { %623 = vmatprep.subr.bf16.mxu0 %v682_v7  ;;  %642 = vmatprep.subr.bf16.mxu1 %v682_v7 }
  0x22   : > { %624 = vmatpush3.bf16.msra.mxu0 %v682_v7  ;;  %650 = vmatpush3.bf16.msra.mxu1 %v682_v7 }
  0x23   : > { %625 = vmatprep.subr.bf16.mxu0 %v683_v8  ;;  %643 = vmatprep.subr.bf16.mxu1 %v683_v8 }
  0x26   : > { %626 = vmatpush3.bf16.msra.mxu0 %v683_v8  ;;  %651 = vmatpush3.bf16.msra.mxu1 %v683_v8 }
  0x27   : > { %627 = vmatprep.subr.bf16.mxu0 %v684_v9  ;;  %644 = vmatprep.subr.bf16.mxu1 %v684_v9 }
  0x2a   : > { %628 = vmatpush3.bf16.msra.mxu0 %v684_v9  ;;  %652 = vmatpush3.bf16.msra.mxu1 %v684_v9 }
  0x2d   : > { %630 = vmatmul.mubr.bf16.vlgmr.msra.gmra.mxu0 %v687_v10  ;;  %634 = vmatmul.mubr.bf16.vlgmr.msra.gmra.mxu1 %v688_v11 }
  0xed   : > { %v631_v12 = vpop.f32.mrf.mxu0  ;;  %v635_v13 = vpop.f32.mrf.mxu1 }
  0xee   : > { %v372_v19 = vadd.f32 %v631_v12, %v547_v14  ;;  %v388_v20 = vadd.f32 %v635_v13, %v547_v14 }
  0xef   : > { %v363_v15 = vpop.f32.mrf.mxu0  ;;  %v379_v16 = vpop.f32.mrf.mxu1 }
  0xf0   : > { %v364_v23 = vadd.f32 %v547_v14, %v363_v15  ;;  %v380_v24 = vadd.f32 %v547_v14, %v379_v16 }
  0xf1   : > { %v632_v17 = vpop.f32.mrf.mxu0  ;;  %v636_v18 = vpop.f32.mrf.mxu1 }
  0xf2   : > { %v375_v21 = vadd.f32 %v632_v17, %v547_v14  ;;  %v391_v22 = vadd.f32 %v636_v18, %v547_v14 }
  0xf3   : > { %v366_v25 = vpop.f32.mrf.mxu0  ;;  %v382_v26 = vpop.f32.mrf.mxu1 }
  0xf4   : > { %v586_v27 = vpack.c.bf16 %v375_v21, %v372_v19  ;;  %v596_v28 = vpack.c.bf16 %v391_v22, %v388_v20  ;;  %v367_v29 = vadd.f32 %v547_v14, %v366_v25  ;;  %v383_v30 = vadd.f32 %v547_v14, %v382_v26 }
  0xf6   : > { %598 = vst [vmem:[%s223_s17 + $0x8] sm:$0xff] %v586_v27   ;;  %600 = vst [vmem:[%s223_s17 + $0x18] sm:$0xff] %v596_v28   ;;  %v581_v31 = vpack.c.bf16 %v367_v29, %v364_v23  ;;  %v591_v32 = vpack.c.bf16 %v383_v30, %v380_v24 }
  0xf8   : > { %582 = vst [vmem:[%s223_s17] sm:$0xff] %v581_v31   ;;  %599 = vst [vmem:[%s223_s17 + $0x10] sm:$0xff] %v591_v32  }
  0xf9 PF: > { %s13_s14 = sadd.s32 1, %s711_s14   ;;  %s810_s12 = smov %s707_s13 }
  0xfa   : > { %p10_p5 = scmp.ge.s32.totalorder %s13_s14, 4   ;;  %s811_s13 = smov %s813_s15 }
  0xfc   :  { %12 = sbr.rel (!%p10_p5) target bundleno = 2 (0x2), region = 68 }

// kernel: feature_extractor_forward.58
= control target key start
LH: loop header
LB: loop body
LE: loop exit
PB: predicated region body
PF: predicated region fallthrough
CT: control target
= control target key end

     0   :  { %s741_s12 = smov 0   ;;  %s743_s13 = smov 0   ;;  %s814_s0 = inlined_call_operand.vmem [shape: bf16[128,128], index: 0, kind: input, shape index: {}]   ;;  %s815_s1 = inlined_call_operand.vmem [shape: bf16[128,128], index: 1, kind: input, shape index: {}]   ;;  %s816_s2 = inlined_call_operand.vmem [shape: f32[1,128], index: 2, kind: input, shape index: {}]   ;;  %s817_s3 = inlined_call_operand.vmem [shape: bf16[128,128], index: 3, kind: output, shape index: {}]  }
   0x1   :  { %s745_s14 = smov 0  }
   0x2 LB: > { %s25_s15 = sadd.s32 1, %s715_s13  ;;  %p550_p0 = scmp.ge.s32.totalorder %s719_s14, 1  ;;  %s719_s14 = sphi %s745_s14, %s13_s14   ;;  %s715_s13 = sphi %s743_s13, %s819_s13   ;;  %s711_s12 = sphi %s741_s12, %s818_s12  }
   0x3   : > { %p27_p1 = scmp.ge.s32.totalorder %s25_s15, 2  ;;  %p169_p2 = scmp.lt.s32.totalorder %s719_s14, 3 }
   0x5   : > { %s821_s15 = smov (%p27_p1, %s25_s15), 0  ;;  %p170_p3 = pnand %p550_p0, %p169_p2 }
   0x6   : > { %s551_s18 = sshll.u32 (!%p170_p3), %s711_s12, 3 }
   0x7   : > { %173 = sbr.rel (%p170_p3) target bundleno = 251 (0xfb), region = 32  ;;  %p204_p4 = scmp.lt.s32.totalorder (!%p170_p3), %s551_s18, 15 }
   0xc   : > { %v685_v0 = vld [vmem:[%s815_s1 + $0x38] sm:$0xff]   ;;  %v686_v1 = vld [vmem:[%s815_s1 + $0x30] sm:$0xff]   ;;  %s823_s18 = smov (!%p204_p4, %s551_s18), 15  ;;  %v687_v2 = vld [vmem:[%s815_s1 + $0x28] sm:$0xff]  }
   0xd   : > { %621 = vmatprep.subr.bf16.mxu0 %v685_v0  ;;  %645 = vmatprep.subr.bf16.mxu1 %v685_v0  ;;  %s552_s23 = sshll.u32 %s823_s18, 2  ;;  %v688_v3 = vld [vmem:[%s815_s1 + $0x20] sm:$0xff]   ;;  %v689_v6 = vld [vmem:[%s815_s1 + $0x18] sm:$0xff]   ;;  %v690_v7 = vld [vmem:[%s815_s1 + $0x10] sm:$0xff]  }
   0xe   : > { %622 = vmatpush3.bf16.msra.mxu0 %v685_v0  ;;  %653 = vmatpush3.bf16.msra.mxu1 %v685_v0  ;;  %s776_s26 = scalar_lea.vmem %s814_s0, %s552_s23  ;;  %v691_v8 = vld [vmem:[%s815_s1 + $0x8] sm:$0xff]   ;;  %v692_v9 = vld [vmem:[%s815_s1] sm:$0xff]   ;;  %s223_s17 = scalar_lea.vmem %s817_s3, %s552_s23 }
   0xf   : > { %623 = vmatprep.subr.bf16.mxu0 %v686_v1  ;;  %646 = vmatprep.subr.bf16.mxu1 %v686_v1  ;;  %v693_v4 = vld [vmem:[%s776_s26] sm:$0xff]   ;;  %v694_v5 = vld [vmem:[%s776_s26 + $0x10] sm:$0xff]   ;;  %v695_v10 = vld [vmem:[%s776_s26 + $0x8] sm:$0xff]  }
  0x10   : > { %637 = vmatprep.mubr.bf16.mxu0 %v693_v4  ;;  %641 = vmatprep.mubr.bf16.mxu1 %v694_v5  ;;  %v696_v11 = vld [vmem:[%s776_s26 + $0x18] sm:$0xff]   ;;  %v555_v12 = vld [vmem:[%s816_s2] ss:$0 sm:$0xff] }
  0x12   : > { %624 = vmatpush3.bf16.msra.mxu0 %v686_v1  ;;  %654 = vmatpush3.bf16.msra.mxu1 %v686_v1 }
  0x13   : > { %625 = vmatprep.subr.bf16.mxu0 %v687_v2  ;;  %647 = vmatprep.subr.bf16.mxu1 %v687_v2 }
  0x16   : > { %626 = vmatpush3.bf16.msra.mxu0 %v687_v2  ;;  %655 = vmatpush3.bf16.msra.mxu1 %v687_v2 }
  0x17   : > { %627 = vmatprep.subr.bf16.mxu0 %v688_v3  ;;  %648 = vmatprep.subr.bf16.mxu1 %v688_v3 }
  0x1a   : > { %628 = vmatpush3.bf16.msra.mxu0 %v688_v3  ;;  %656 = vmatpush3.bf16.msra.mxu1 %v688_v3 }
  0x1b   : > { %629 = vmatprep.subr.bf16.mxu0 %v689_v6  ;;  %649 = vmatprep.subr.bf16.mxu1 %v689_v6 }
  0x1e   : > { %630 = vmatpush3.bf16.msra.mxu0 %v689_v6  ;;  %657 = vmatpush3.bf16.msra.mxu1 %v689_v6 }
  0x1f   : > { %631 = vmatprep.subr.bf16.mxu0 %v690_v7  ;;  %650 = vmatprep.subr.bf16.mxu1 %v690_v7 }
  0x22   : > { %632 = vmatpush3.bf16.msra.mxu0 %v690_v7  ;;  %658 = vmatpush3.bf16.msra.mxu1 %v690_v7 }
  0x23   : > { %633 = vmatprep.subr.bf16.mxu0 %v691_v8  ;;  %651 = vmatprep.subr.bf16.mxu1 %v691_v8 }
  0x26   : > { %634 = vmatpush3.bf16.msra.mxu0 %v691_v8  ;;  %659 = vmatpush3.bf16.msra.mxu1 %v691_v8 }
  0x27   : > { %635 = vmatprep.subr.bf16.mxu0 %v692_v9  ;;  %652 = vmatprep.subr.bf16.mxu1 %v692_v9 }
  0x2a   : > { %636 = vmatpush3.bf16.msra.mxu0 %v692_v9  ;;  %660 = vmatpush3.bf16.msra.mxu1 %v692_v9 }
  0x2d   : > { %638 = vmatmul.mubr.bf16.vlgmr.msra.gmra.mxu0 %v695_v10  ;;  %642 = vmatmul.mubr.bf16.vlgmr.msra.gmra.mxu1 %v696_v11 }
  0xed   : > { %v639_v13 = vpop.f32.mrf.mxu0  ;;  %v643_v14 = vpop.f32.mrf.mxu1 }
  0xee   : > { %v372_v15 = vadd.f32 %v639_v13, %v555_v12  ;;  %v388_v16 = vadd.f32 %v643_v14, %v555_v12 }
  0xef   : > { %v363_v17 = vpop.f32.mrf.mxu0  ;;  %v379_v18 = vpop.f32.mrf.mxu1 }
  0xf0   : > { %v364_v19 = vadd.f32 %v555_v12, %v363_v17  ;;  %v380_v20 = vadd.f32 %v555_v12, %v379_v18  ;;  %v396_v25 = vmax.f32 %v372_v15, 0.0  ;;  %v400_v26 = vmax.f32 %v388_v16, 0.0 }
  0xf1   : > { %v640_v21 = vpop.f32.mrf.mxu0  ;;  %v644_v22 = vpop.f32.mrf.mxu1 }
  0xf2   : > { %v375_v23 = vadd.f32 %v640_v21, %v555_v12  ;;  %v391_v24 = vadd.f32 %v644_v22, %v555_v12  ;;  %v394_v33 = vmax.f32 %v364_v19, 0.0  ;;  %v398_v34 = vmax.f32 %v380_v20, 0.0 }
  0xf3   : > { %v366_v27 = vpop.f32.mrf.mxu0  ;;  %v382_v28 = vpop.f32.mrf.mxu1 }
  0xf4   : > { %v397_v29 = vmax.f32 %v375_v23, 0.0  ;;  %v401_v30 = vmax.f32 %v391_v24, 0.0  ;;  %v367_v31 = vadd.f32 %v555_v12, %v366_v27  ;;  %v383_v32 = vadd.f32 %v555_v12, %v382_v28 }
  0xf6   : > { %v594_v35 = vpack.c.bf16 %v397_v29, %v396_v25  ;;  %v604_v36 = vpack.c.bf16 %v401_v30, %v400_v26  ;;  %v395_v37 = vmax.f32 %v367_v31, 0.0  ;;  %v399_v38 = vmax.f32 %v383_v32, 0.0 }
  0xf8   : > { %606 = vst [vmem:[%s223_s17 + $0x8] sm:$0xff] %v594_v35   ;;  %608 = vst [vmem:[%s223_s17 + $0x18] sm:$0xff] %v604_v36   ;;  %v589_v39 = vpack.c.bf16 %v395_v37, %v394_v33  ;;  %v599_v40 = vpack.c.bf16 %v399_v38, %v398_v34 }
  0xfa   : > { %590 = vst [vmem:[%s223_s17] sm:$0xff] %v589_v39   ;;  %607 = vst [vmem:[%s223_s17 + $0x10] sm:$0xff] %v599_v40  }
  0xfb PF: > { %s13_s14 = sadd.s32 1, %s719_s14   ;;  %s818_s12 = smov %s715_s13 }
  0xfc   : > { %p10_p5 = scmp.ge.s32.totalorder %s13_s14, 4   ;;  %s819_s13 = smov %s821_s15 }
  0xfe   :  { %12 = sbr.rel (!%p10_p5) target bundleno = 2 (0x2), region = 68 }

// kernel: feature_extractor_forward.60
= control target key start
LH: loop header
LB: loop body
LE: loop exit
PB: predicated region body
PF: predicated region fallthrough
CT: control target
= control target key end

     0   :  { %s866_s15 = smov 0   ;;  %s868_s16 = smov 0   ;;  %s940_s0 = inlined_call_operand.vmem [shape: bf16[128,128], index: 0, kind: input, shape index: {}]   ;;  %s941_s1 = inlined_call_operand.vmem [shape: bf16[128,128], index: 1, kind: input, shape index: {}]   ;;  %s942_s2 = inlined_call_operand.vmem [shape: f32[1,128], index: 2, kind: input, shape index: {}]   ;;  %s943_s3 = inlined_call_operand.vmem [shape: bf16[128,128], index: 3, kind: input, shape index: {}]   ;;  %s944_s4 = inlined_call_operand.vmem [shape: bf16[128,128], index: 4, kind: output, shape index: {}]  }
   0x1   :  { %s870_s17 = smov 0  }
   0x2 LB: > { %s26_s18 = sadd.s32 1, %s835_s16  ;;  %p649_p0 = scmp.ge.s32.totalorder %s839_s17, 1  ;;  %s839_s17 = sphi %s870_s17, %s14_s17   ;;  %s835_s16 = sphi %s868_s16, %s946_s16   ;;  %s831_s15 = sphi %s866_s15, %s945_s15  }
   0x3   : > { %p28_p1 = scmp.ge.s32.totalorder %s26_s18, 2  ;;  %p210_p2 = scmp.lt.s32.totalorder %s839_s17, 3 }
   0x5   : > { %s948_s18 = smov (%p28_p1, %s26_s18), 0  ;;  %p211_p3 = pnand %p649_p0, %p210_p2 }
   0x6   : > { %s650_s21 = sshll.u32 (!%p211_p3), %s831_s15, 3 }
   0x7   : > { %214 = sbr.rel (%p211_p3) target bundleno = 253 (0xfd), region = 36  ;;  %p255_p4 = scmp.lt.s32.totalorder (!%p211_p3), %s650_s21, 15 }
   0xc   : > { %v805_v0 = vld [vmem:[%s941_s1 + $0x38] sm:$0xff]   ;;  %v806_v1 = vld [vmem:[%s941_s1 + $0x30] sm:$0xff]   ;;  %s950_s21 = smov (!%p255_p4, %s650_s21), 15  ;;  %v807_v2 = vld [vmem:[%s941_s1 + $0x28] sm:$0xff]  }
   0xd   : > { %741 = vmatprep.subr.bf16.mxu0 %v805_v0  ;;  %765 = vmatprep.subr.bf16.mxu1 %v805_v0  ;;  %s893_s26 = sshll.u32 %s950_s21, 2  ;;  %v808_v3 = vld [vmem:[%s941_s1 + $0x20] sm:$0xff]   ;;  %v809_v6 = vld [vmem:[%s941_s1 + $0x18] sm:$0xff]   ;;  %v810_v7 = vld [vmem:[%s941_s1 + $0x10] sm:$0xff]  }
   0xe   : > { %742 = vmatpush3.bf16.msra.mxu0 %v805_v0  ;;  %773 = vmatpush3.bf16.msra.mxu1 %v805_v0  ;;  %s899_s29 = scalar_lea.vmem %s940_s0, %s893_s26  ;;  %v811_v8 = vld [vmem:[%s941_s1 + $0x8] sm:$0xff]   ;;  %v812_v9 = vld [vmem:[%s941_s1] sm:$0xff]   ;;  %s274_s19 = scalar_lea.vmem %s943_s3, %s893_s26 }
   0xf   : > { %743 = vmatprep.subr.bf16.mxu0 %v806_v1  ;;  %766 = vmatprep.subr.bf16.mxu1 %v806_v1  ;;  %v813_v4 = vld [vmem:[%s899_s29] sm:$0xff]   ;;  %v814_v5 = vld [vmem:[%s899_s29 + $0x10] sm:$0xff]   ;;  %v815_v10 = vld [vmem:[%s899_s29 + $0x8] sm:$0xff]   ;;  %s283_s24 = scalar_lea.vmem %s944_s4, %s893_s26 }
  0x10   : > { %757 = vmatprep.mubr.bf16.mxu0 %v813_v4  ;;  %761 = vmatprep.mubr.bf16.mxu1 %v814_v5  ;;  %v816_v11 = vld [vmem:[%s899_s29 + $0x18] sm:$0xff]   ;;  %v656_v12 = vld [vmem:[%s942_s2] ss:$0 sm:$0xff]  ;;  %v723_v13 = vld [vmem:[%s274_s19 + $0x8] sm:$0xff]  }
  0x11   : > { %v725_v14 = vld [vmem:[%s274_s19 + $0x18] sm:$0xff]   ;;  %v688_v17 = vld [vmem:[%s274_s19] sm:$0xff]   ;;  %v724_v18 = vld [vmem:[%s274_s19 + $0x10] sm:$0xff]   ;;  %v693_v20 = vunpack.c.l.bf16 %v723_v13  ;;  %v694_v30 = vunpack.c.h.bf16 %v723_v13 }
  0x12   : > { %744 = vmatpush3.bf16.msra.mxu0 %v806_v1  ;;  %774 = vmatpush3.bf16.msra.mxu1 %v806_v1  ;;  %v701_v22 = vunpack.c.l.bf16 %v725_v14  ;;  %v689_v26 = vunpack.c.l.bf16 %v688_v17  ;;  %v697_v28 = vunpack.c.l.bf16 %v724_v18  ;;  %v702_v32 = vunpack.c.h.bf16 %v725_v14 }
  0x13   : > { %745 = vmatprep.subr.bf16.mxu0 %v807_v2  ;;  %767 = vmatprep.subr.bf16.mxu1 %v807_v2  ;;  %v690_v33 = vunpack.c.h.bf16 %v688_v17  ;;  %v698_v34 = vunpack.c.h.bf16 %v724_v18 }
  0x16   : > { %746 = vmatpush3.bf16.msra.mxu0 %v807_v2  ;;  %775 = vmatpush3.bf16.msra.mxu1 %v807_v2 }
  0x17   : > { %747 = vmatprep.subr.bf16.mxu0 %v808_v3  ;;  %768 = vmatprep.subr.bf16.mxu1 %v808_v3 }
  0x1a   : > { %748 = vmatpush3.bf16.msra.mxu0 %v808_v3  ;;  %776 = vmatpush3.bf16.msra.mxu1 %v808_v3 }
  0x1b   : > { %749 = vmatprep.subr.bf16.mxu0 %v809_v6  ;;  %769 = vmatprep.subr.bf16.mxu1 %v809_v6 }
  0x1e   : > { %750 = vmatpush3.bf16.msra.mxu0 %v809_v6  ;;  %777 = vmatpush3.bf16.msra.mxu1 %v809_v6 }
  0x1f   : > { %751 = vmatprep.subr.bf16.mxu0 %v810_v7  ;;  %770 = vmatprep.subr.bf16.mxu1 %v810_v7 }
  0x22   : > { %752 = vmatpush3.bf16.msra.mxu0 %v810_v7  ;;  %778 = vmatpush3.bf16.msra.mxu1 %v810_v7 }
  0x23   : > { %753 = vmatprep.subr.bf16.mxu0 %v811_v8  ;;  %771 = vmatprep.subr.bf16.mxu1 %v811_v8 }
  0x26   : > { %754 = vmatpush3.bf16.msra.mxu0 %v811_v8  ;;  %779 = vmatpush3.bf16.msra.mxu1 %v811_v8 }
  0x27   : > { %755 = vmatprep.subr.bf16.mxu0 %v812_v9  ;;  %772 = vmatprep.subr.bf16.mxu1 %v812_v9 }
  0x2a   : > { %756 = vmatpush3.bf16.msra.mxu0 %v812_v9  ;;  %780 = vmatpush3.bf16.msra.mxu1 %v812_v9 }
  0x2d   : > { %758 = vmatmul.mubr.bf16.vlgmr.msra.gmra.mxu0 %v815_v10  ;;  %762 = vmatmul.mubr.bf16.vlgmr.msra.gmra.mxu1 %v816_v11 }
  0xed   : > { %v759_v15 = vpop.f32.mrf.mxu0  ;;  %v763_v16 = vpop.f32.mrf.mxu1 }
  0xee   : > { %v432_v19 = vadd.f32 %v759_v15, %v656_v12  ;;  %v448_v21 = vadd.f32 %v763_v16, %v656_v12 }
  0xef   : > { %v423_v23 = vpop.f32.mrf.mxu0  ;;  %v439_v24 = vpop.f32.mrf.mxu1 }
  0xf0   : > { %v424_v25 = vadd.f32 %v656_v12, %v423_v23  ;;  %v440_v27 = vadd.f32 %v656_v12, %v439_v24  ;;  %v472_v35 = vadd.f32 %v693_v20, %v432_v19  ;;  %v476_v36 = vadd.f32 %v701_v22, %v448_v21 }
  0xf1   : > { %v760_v29 = vpop.f32.mrf.mxu0  ;;  %v764_v31 = vpop.f32.mrf.mxu1 }
  0xf2   : > { %v435_v37 = vadd.f32 %v760_v29, %v656_v12  ;;  %v451_v38 = vadd.f32 %v764_v31, %v656_v12  ;;  %v470_v41 = vadd.f32 %v689_v26, %v424_v25  ;;  %v474_v42 = vadd.f32 %v697_v28, %v440_v27 }
  0xf3   : > { %v426_v39 = vpop.f32.mrf.mxu0  ;;  %v442_v40 = vpop.f32.mrf.mxu1  ;;  %v480_v49 = vmax.f32 %v472_v35, 0.0  ;;  %v484_v50 = vmax.f32 %v476_v36, 0.0 }
  0xf4   : > { %v427_v43 = vadd.f32 %v656_v12, %v426_v39  ;;  %v443_v44 = vadd.f32 %v656_v12, %v442_v40  ;;  %v473_v45 = vadd.f32 %v694_v30, %v435_v37  ;;  %v477_v46 = vadd.f32 %v702_v32, %v451_v38 }
  0xf5   : > { %v478_v53 = vmax.f32 %v470_v41, 0.0  ;;  %v482_v54 = vmax.f32 %v474_v42, 0.0 }
  0xf6   : > { %v471_v47 = vadd.f32 %v690_v33, %v427_v43  ;;  %v475_v48 = vadd.f32 %v698_v34, %v443_v44  ;;  %v481_v51 = vmax.f32 %v473_v45, 0.0  ;;  %v485_v52 = vmax.f32 %v477_v46, 0.0 }
  0xf8   : > { %v479_v55 = vmax.f32 %v471_v47, 0.0  ;;  %v483_v56 = vmax.f32 %v475_v48, 0.0  ;;  %v711_v57 = vpack.c.bf16 %v481_v51, %v480_v49  ;;  %v721_v58 = vpack.c.bf16 %v485_v52, %v484_v50 }
  0xfa   : > { %v706_v59 = vpack.c.bf16 %v479_v55, %v478_v53  ;;  %v716_v60 = vpack.c.bf16 %v483_v56, %v482_v54  ;;  %726 = vst [vmem:[%s283_s24 + $0x8] sm:$0xff] %v711_v57   ;;  %728 = vst [vmem:[%s283_s24 + $0x18] sm:$0xff] %v721_v58  }
  0xfc   : > { %707 = vst [vmem:[%s283_s24] sm:$0xff] %v706_v59   ;;  %727 = vst [vmem:[%s283_s24 + $0x10] sm:$0xff] %v716_v60  }
  0xfd PF: > { %s14_s17 = sadd.s32 1, %s839_s17   ;;  %s945_s15 = smov %s835_s16 }
  0xfe   : > { %p11_p5 = scmp.ge.s32.totalorder %s14_s17, 4   ;;  %s946_s16 = smov %s948_s18 }
 0x100   :  { %13 = sbr.rel (!%p11_p5) target bundleno = 2 (0x2), region = 75 }

// kernel: feature_extractor_forward.67
= control target key start
LH: loop header
LB: loop body
LE: loop exit
PB: predicated region body
PF: predicated region fallthrough
CT: control target
= control target key end

     0   :  { %s600_s12 = smov 0   ;;  %s602_s13 = smov 0   ;;  %s663_s0 = inlined_call_operand.vmem [shape: bf16[32,128], index: 0, kind: input, shape index: {}]   ;;  %s664_s1 = inlined_call_operand.vmem [shape: bf16[128,128], index: 1, kind: input, shape index: {}]   ;;  %s665_s2 = inlined_call_operand.vmem [shape: f32[1,128], index: 2, kind: input, shape index: {}]   ;;  %s666_s3 = inlined_call_operand.vmem [shape: bf16[32,128], index: 3, kind: output, shape index: {}]  }
   0x1   :  { %s604_s14 = smov 0  }
   0x2 LB: > { %s25_s15 = sadd.s32 1, %s572_s13  ;;  %p464_p0 = scmp.ge.s32.totalorder %s576_s14, 1  ;;  %s576_s14 = sphi %s604_s14, %s13_s14   ;;  %s572_s13 = sphi %s602_s13, %s668_s13   ;;  %s568_s12 = sphi %s600_s12, %s667_s12  }
   0x3   : > { %p27_p1 = scmp.ge.s32.totalorder %s25_s15, 2  ;;  %p169_p2 = scmp.lt.s32.totalorder %s576_s14, 3 }
   0x5   : > { %s670_s15 = smov (%p27_p1, %s25_s15), 0  ;;  %p170_p3 = pnand %p464_p0, %p169_p2 }
   0x6   : > { %s465_s20 = sshll.u32 (!%p170_p3), %s568_s12, 1 }
   0x7   : > { %173 = sbr.rel (%p170_p3) target bundleno = 247 (0xf7), region = 32  ;;  %p204_p4 = scmp.lt.s32.totalorder (!%p170_p3), %s465_s20, 3 }
   0xc   : > { %v545_v0 = vld [vmem:[%s664_s1 + $0x38] sm:$0xff]   ;;  %v578_v1 = vmov 0.0   ;;  %v546_v2 = vld [vmem:[%s664_s1 + $0x30] sm:$0xff]   ;;  %vm579_vm0 = vmmov 0   ;;  %s672_s20 = smov (!%p204_p4, %s465_s20), 3  ;;  %v547_v3 = vld [vmem:[%s664_s1 + $0x28] sm:$0xff]  }
   0xd   : > { %499 = vmatprep.subr.bf16.mxu0 %v578_v1  ;;  %515 = vmatprep.mubr.msk.bf16.mxu0 %vm579_vm0, %v578_v1  ;;  %s466_s23 = sshll.u32 %s672_s20, 2  ;;  %v548_v4 = vld [vmem:[%s664_s1 + $0x20] sm:$0xff]   ;;  %v549_v5 = vld [vmem:[%s664_s1 + $0x18] sm:$0xff]   ;;  %v550_v6 = vld [vmem:[%s664_s1 + $0x10] sm:$0xff]  }
   0xe   : > { %500 = vmatpush3.bf16.msra.mxu0 %v545_v0  ;;  %s207_s26 = scalar_lea.vmem %s663_s0, %s466_s23  ;;  %v551_v7 = vld [vmem:[%s664_s1 + $0x8] sm:$0xff]   ;;  %v552_v8 = vld [vmem:[%s664_s1] sm:$0xff]   ;;  %s223_s17 = scalar_lea.vmem %s666_s3, %s466_s23 }
   0xf   : > { %501 = vmatprep.subr.bf16.mxu0 %v578_v1  ;;  %v553_v9 = vld [vmem:[%s207_s26] sm:$0xff]  }
  0x10   : > { %v469_v11 = vld [vmem:[%s665_s2] ss:$0 sm:$0xff] }
  0x12   : > { %502 = vmatpush3.bf16.msra.mxu0 %v546_v2 }
  0x13   : > { %503 = vmatprep.subr.bf16.mxu0 %v578_v1 }
  0x16   : > { %504 = vmatpush3.bf16.msra.mxu0 %v547_v3 }
  0x17   : > { %505 = vmatprep.subr.bf16.mxu0 %v578_v1 }
  0x1a   : > { %506 = vmatpush3.bf16.msra.mxu0 %v548_v4 }
  0x1b   : > { %507 = vmatprep.subr.bf16.mxu0 %v578_v1 }
  0x1e   : > { %508 = vmatpush3.bf16.msra.mxu0 %v549_v5 }
  0x1f   : > { %509 = vmatprep.subr.bf16.mxu0 %v578_v1 }
  0x22   : > { %510 = vmatpush3.bf16.msra.mxu0 %v550_v6 }
  0x23   : > { %511 = vmatprep.subr.bf16.mxu0 %v578_v1 }
  0x26   : > { %512 = vmatpush3.bf16.msra.mxu0 %v551_v7 }
  0x27   : > { %513 = vmatprep.subr.bf16.mxu0 %v578_v1 }
  0x2a   : > { %514 = vmatpush3.bf16.msra.mxu0 %v552_v8 }
  0x2d   : > { %516 = vmatmul.mubr.bf16.vlgmr.msra.gmra.mxu0 %v553_v9 }
  0xed   : > { %v339_v10 = vpop.f32.mrf.mxu0 }
  0xee   : > { %v340_v14 = vadd.f32 %v469_v11, %v339_v10 }
  0xef   : > { %v517_v12 = vpop.f32.mrf.mxu0 }
  0xf1   : > { %v342_v13 = vpop.f32.mrf.mxu0 }
  0xf2   : > { %v343_v15 = vadd.f32 %v469_v11, %v342_v13 }
  0xf3   : > { %v518_v16 = vpop.f32.mrf.mxu0 }
  0xf4   : > { %v488_v17 = vpack.c.bf16 %v343_v15, %v340_v14 }
  0xf6   : > { %489 = vst [vmem:[%s223_s17] sm:$0xff] %v488_v17  }
  0xf7 PF: > { %s13_s14 = sadd.s32 1, %s576_s14   ;;  %s667_s12 = smov %s572_s13 }
  0xf8   : > { %p10_p5 = scmp.ge.s32.totalorder %s13_s14, 4   ;;  %s668_s13 = smov %s670_s15 }
  0xfa   :  { %12 = sbr.rel (!%p10_p5) target bundleno = 2 (0x2), region = 68 }

// kernel: feature_extractor_forward.70
= control target key start
LH: loop header
LB: loop body
LE: loop exit
PB: predicated region body
PF: predicated region fallthrough
CT: control target
= control target key end

     0   :  { %s694_s15 = smov 0   ;;  %s696_s16 = smov 0   ;;  %s762_s0 = inlined_call_operand.vmem [shape: bf16[32,128], index: 0, kind: input, shape index: {}]   ;;  %s763_s1 = inlined_call_operand.vmem [shape: bf16[128,128], index: 1, kind: input, shape index: {}]   ;;  %s764_s2 = inlined_call_operand.vmem [shape: f32[1,128], index: 2, kind: input, shape index: {}]   ;;  %s765_s3 = inlined_call_operand.vmem [shape: bf16[32,128], index: 3, kind: input, shape index: {}]   ;;  %s766_s4 = inlined_call_operand.vmem [shape: bf16[32,128], index: 4, kind: output, shape index: {}]  }
   0x1   :  { %s698_s17 = smov 0  }
   0x2 LB: > { %s26_s18 = sadd.s32 1, %s661_s16  ;;  %p547_p0 = scmp.ge.s32.totalorder %s665_s17, 1  ;;  %s665_s17 = sphi %s698_s17, %s14_s17   ;;  %s661_s16 = sphi %s696_s16, %s768_s16   ;;  %s657_s15 = sphi %s694_s15, %s767_s15  }
   0x3   : > { %p28_p1 = scmp.ge.s32.totalorder %s26_s18, 2  ;;  %p210_p2 = scmp.lt.s32.totalorder %s665_s17, 3 }
   0x5   : > { %s770_s18 = smov (%p28_p1, %s26_s18), 0  ;;  %p211_p3 = pnand %p547_p0, %p210_p2 }
   0x6   : > { %s548_s23 = sshll.u32 (!%p211_p3), %s657_s15, 1 }
   0x7   : > { %214 = sbr.rel (%p211_p3) target bundleno = 251 (0xfb), region = 36  ;;  %p255_p4 = scmp.lt.s32.totalorder (!%p211_p3), %s548_s23, 3 }
   0xc   : > { %v634_v0 = vld [vmem:[%s763_s1 + $0x38] sm:$0xff]   ;;  %v667_v1 = vmov 0.0   ;;  %v635_v2 = vld [vmem:[%s763_s1 + $0x30] sm:$0xff]   ;;  %vm668_vm0 = vmmov 0   ;;  %s772_s23 = smov (!%p255_p4, %s548_s23), 3  ;;  %v636_v3 = vld [vmem:[%s763_s1 + $0x28] sm:$0xff]  }
   0xd   : > { %588 = vmatprep.subr.bf16.mxu0 %v667_v1  ;;  %604 = vmatprep.mubr.msk.bf16.mxu0 %vm668_vm0, %v667_v1  ;;  %s721_s26 = sshll.u32 %s772_s23, 2  ;;  %v637_v4 = vld [vmem:[%s763_s1 + $0x20] sm:$0xff]   ;;  %v638_v5 = vld [vmem:[%s763_s1 + $0x18] sm:$0xff]   ;;  %v639_v6 = vld [vmem:[%s763_s1 + $0x10] sm:$0xff]  }
   0xe   : > { %589 = vmatpush3.bf16.msra.mxu0 %v634_v0  ;;  %s258_s29 = scalar_lea.vmem %s762_s0, %s721_s26  ;;  %v640_v7 = vld [vmem:[%s763_s1 + $0x8] sm:$0xff]   ;;  %v641_v8 = vld [vmem:[%s763_s1] sm:$0xff]   ;;  %s274_s19 = scalar_lea.vmem %s765_s3, %s721_s26 }
   0xf   : > { %590 = vmatprep.subr.bf16.mxu0 %v667_v1  ;;  %v642_v9 = vld [vmem:[%s258_s29] sm:$0xff]   ;;  %s283_s24 = scalar_lea.vmem %s766_s4, %s721_s26 }
  0x10   : > { %v554_v10 = vld [vmem:[%s764_s2] ss:$0 sm:$0xff] }
  0x11   : > { %v571_v11 = vld [vmem:[%s274_s19] sm:$0xff]  }
  0x12   : > { %591 = vmatpush3.bf16.msra.mxu0 %v635_v2  ;;  %v572_v14 = vunpack.c.l.bf16 %v571_v11  ;;  %v573_v16 = vunpack.c.h.bf16 %v571_v11 }
  0x13   : > { %592 = vmatprep.subr.bf16.mxu0 %v667_v1 }
  0x16   : > { %593 = vmatpush3.bf16.msra.mxu0 %v636_v3 }
  0x17   : > { %594 = vmatprep.subr.bf16.mxu0 %v667_v1 }
  0x1a   : > { %595 = vmatpush3.bf16.msra.mxu0 %v637_v4 }
  0x1b   : > { %596 = vmatprep.subr.bf16.mxu0 %v667_v1 }
  0x1e   : > { %597 = vmatpush3.bf16.msra.mxu0 %v638_v5 }
  0x1f   : > { %598 = vmatprep.subr.bf16.mxu0 %v667_v1 }
  0x22   : > { %599 = vmatpush3.bf16.msra.mxu0 %v639_v6 }
  0x23   : > { %600 = vmatprep.subr.bf16.mxu0 %v667_v1 }
  0x26   : > { %601 = vmatpush3.bf16.msra.mxu0 %v640_v7 }
  0x27   : > { %602 = vmatprep.subr.bf16.mxu0 %v667_v1 }
  0x2a   : > { %603 = vmatpush3.bf16.msra.mxu0 %v641_v8 }
  0x2d   : > { %605 = vmatmul.mubr.bf16.vlgmr.msra.gmra.mxu0 %v642_v9 }
  0xed   : > { %v399_v12 = vpop.f32.mrf.mxu0 }
  0xee   : > { %v400_v13 = vadd.f32 %v554_v10, %v399_v12 }
  0xef   : > { %v606_v15 = vpop.f32.mrf.mxu0 }
  0xf0   : > { %v410_v18 = vadd.f32 %v572_v14, %v400_v13 }
  0xf1   : > { %v402_v17 = vpop.f32.mrf.mxu0 }
  0xf2   : > { %v403_v19 = vadd.f32 %v554_v10, %v402_v17  ;;  %v412_v22 = vmax.f32 %v410_v18, 0.0 }
  0xf3   : > { %v607_v20 = vpop.f32.mrf.mxu0 }
  0xf4   : > { %v411_v21 = vadd.f32 %v573_v16, %v403_v19 }
  0xf6   : > { %v413_v23 = vmax.f32 %v411_v21, 0.0 }
  0xf8   : > { %v577_v24 = vpack.c.bf16 %v413_v23, %v412_v22 }
  0xfa   : > { %578 = vst [vmem:[%s283_s24] sm:$0xff] %v577_v24  }
  0xfb PF: > { %s14_s17 = sadd.s32 1, %s665_s17   ;;  %s767_s15 = smov %s661_s16 }
  0xfc   : > { %p11_p5 = scmp.ge.s32.totalorder %s14_s17, 4   ;;  %s768_s16 = smov %s770_s18 }
  0xfe   :  { %13 = sbr.rel (!%p11_p5) target bundleno = 2 (0x2), region = 75 }

// kernel: feature_extractor_forward.71
= control target key start
LH: loop header
LB: loop body
LE: loop exit
PB: predicated region body
PF: predicated region fallthrough
CT: control target
= control target key end

     0   :  { %s602_s12 = smov 0   ;;  %s604_s13 = smov 0   ;;  %s669_s0 = inlined_call_operand.vmem [shape: bf16[32,128], index: 0, kind: input, shape index: {}]   ;;  %s670_s1 = inlined_call_operand.vmem [shape: bf16[128,128], index: 1, kind: input, shape index: {}]   ;;  %s671_s2 = inlined_call_operand.vmem [shape: f32[1,128], index: 2, kind: input, shape index: {}]   ;;  %s672_s3 = inlined_call_operand.vmem [shape: bf16[32,128], index: 3, kind: output, shape index: {}]  }
   0x1   :  { %s606_s14 = smov 0  }
   0x2 LB: > { %s25_s15 = sadd.s32 1, %s574_s13  ;;  %p466_p0 = scmp.ge.s32.totalorder %s578_s14, 1  ;;  %s578_s14 = sphi %s606_s14, %s13_s14   ;;  %s574_s13 = sphi %s604_s13, %s674_s13   ;;  %s570_s12 = sphi %s602_s12, %s673_s12  }
   0x3   : > { %p27_p1 = scmp.ge.s32.totalorder %s25_s15, 2  ;;  %p169_p2 = scmp.lt.s32.totalorder %s578_s14, 3 }
   0x5   : > { %s676_s15 = smov (%p27_p1, %s25_s15), 0  ;;  %p170_p3 = pnand %p466_p0, %p169_p2 }
   0x6   : > { %s467_s20 = sshll.u32 (!%p170_p3), %s570_s12, 1 }
   0x7   : > { %173 = sbr.rel (%p170_p3) target bundleno = 249 (0xf9), region = 32  ;;  %p204_p4 = scmp.lt.s32.totalorder (!%p170_p3), %s467_s20, 3 }
   0xc   : > { %v547_v0 = vld [vmem:[%s670_s1 + $0x38] sm:$0xff]   ;;  %v580_v1 = vmov 0.0   ;;  %v548_v2 = vld [vmem:[%s670_s1 + $0x30] sm:$0xff]   ;;  %vm581_vm0 = vmmov 0   ;;  %s678_s20 = smov (!%p204_p4, %s467_s20), 3  ;;  %v549_v3 = vld [vmem:[%s670_s1 + $0x28] sm:$0xff]  }
   0xd   : > { %501 = vmatprep.subr.bf16.mxu0 %v580_v1  ;;  %517 = vmatprep.mubr.msk.bf16.mxu0 %vm581_vm0, %v580_v1  ;;  %s468_s23 = sshll.u32 %s678_s20, 2  ;;  %v550_v4 = vld [vmem:[%s670_s1 + $0x20] sm:$0xff]   ;;  %v551_v5 = vld [vmem:[%s670_s1 + $0x18] sm:$0xff]   ;;  %v552_v6 = vld [vmem:[%s670_s1 + $0x10] sm:$0xff]  }
   0xe   : > { %502 = vmatpush3.bf16.msra.mxu0 %v547_v0  ;;  %s207_s26 = scalar_lea.vmem %s669_s0, %s468_s23  ;;  %v553_v7 = vld [vmem:[%s670_s1 + $0x8] sm:$0xff]   ;;  %v554_v8 = vld [vmem:[%s670_s1] sm:$0xff]   ;;  %s223_s17 = scalar_lea.vmem %s672_s3, %s468_s23 }
   0xf   : > { %503 = vmatprep.subr.bf16.mxu0 %v580_v1  ;;  %v555_v9 = vld [vmem:[%s207_s26] sm:$0xff]  }
  0x10   : > { %v471_v10 = vld [vmem:[%s671_s2] ss:$0 sm:$0xff] }
  0x12   : > { %504 = vmatpush3.bf16.msra.mxu0 %v548_v2 }
  0x13   : > { %505 = vmatprep.subr.bf16.mxu0 %v580_v1 }
  0x16   : > { %506 = vmatpush3.bf16.msra.mxu0 %v549_v3 }
  0x17   : > { %507 = vmatprep.subr.bf16.mxu0 %v580_v1 }
  0x1a   : > { %508 = vmatpush3.bf16.msra.mxu0 %v550_v4 }
  0x1b   : > { %509 = vmatprep.subr.bf16.mxu0 %v580_v1 }
  0x1e   : > { %510 = vmatpush3.bf16.msra.mxu0 %v551_v5 }
  0x1f   : > { %511 = vmatprep.subr.bf16.mxu0 %v580_v1 }
  0x22   : > { %512 = vmatpush3.bf16.msra.mxu0 %v552_v6 }
  0x23   : > { %513 = vmatprep.subr.bf16.mxu0 %v580_v1 }
  0x26   : > { %514 = vmatpush3.bf16.msra.mxu0 %v553_v7 }
  0x27   : > { %515 = vmatprep.subr.bf16.mxu0 %v580_v1 }
  0x2a   : > { %516 = vmatpush3.bf16.msra.mxu0 %v554_v8 }
  0x2d   : > { %518 = vmatmul.mubr.bf16.vlgmr.msra.gmra.mxu0 %v555_v9 }
  0xed   : > { %v339_v11 = vpop.f32.mrf.mxu0 }
  0xee   : > { %v340_v13 = vadd.f32 %v471_v10, %v339_v11 }
  0xef   : > { %v519_v12 = vpop.f32.mrf.mxu0 }
  0xf0   : > { %v346_v17 = vmax.f32 %v340_v13, 0.0 }
  0xf1   : > { %v342_v14 = vpop.f32.mrf.mxu0 }
  0xf2   : > { %v343_v15 = vadd.f32 %v471_v10, %v342_v14 }
  0xf3   : > { %v520_v16 = vpop.f32.mrf.mxu0 }
  0xf4   : > { %v347_v18 = vmax.f32 %v343_v15, 0.0 }
  0xf6   : > { %v490_v19 = vpack.c.bf16 %v347_v18, %v346_v17 }
  0xf8   : > { %491 = vst [vmem:[%s223_s17] sm:$0xff] %v490_v19  }
  0xf9 PF: > { %s13_s14 = sadd.s32 1, %s578_s14   ;;  %s673_s12 = smov %s574_s13 }
  0xfa   : > { %p10_p5 = scmp.ge.s32.totalorder %s13_s14, 4   ;;  %s674_s13 = smov %s676_s15 }
  0xfc   :  { %12 = sbr.rel (!%p10_p5) target bundleno = 2 (0x2), region = 68 }

// kernel: feature_extractor_forward.59
= control target key start
LH: loop header
LB: loop body
LE: loop exit
PB: predicated region body
PF: predicated region fallthrough
CT: control target
= control target key end

     0   :  { %s2060_s12 = smov 0   ;;  %s2368_s0 = inlined_call_operand.vmem [shape: bf16[8,54,128], index: 0, kind: input, shape index: {}]   ;;  %s2369_s1 = inlined_call_operand.vmem [shape: bf16[9,128,128], index: 1, kind: input, shape index: {}]   ;;  %s2370_s2 = inlined_call_operand.vmem [shape: f32[1,128], index: 2, kind: input, shape index: {}]   ;;  %s2371_s3 = inlined_call_operand.vmem [shape: bf16[8,24,128], index: 3, kind: output, shape index: {}]  }
   0x1 LB: > { %s1433_s13 = sadd.s32 4294967295, %s2038_s12   ;;  %p1437_p0 = scmp.ge.s32.totalorder %s2038_s12, 1  ;;  %s2038_s12 = sphi %s2060_s12, %s13_s12  }
   0x2   : > { %p137_p1 = scmp.lt.s32.totalorder %s2038_s12, 9 }
   0x4   : > { %p138_p2 = pnand %p1437_p0, %p137_p1 }
   0x5   : > { %p161_p3 = scmp.lt.s32.totalorder (!%p138_p2), %s1433_s13, 7 }
   0x6   : > { %141 = sbr.rel (%p138_p2) target bundleno = 380 (0x17c), region = 32 }
   0xb   : > { %v1947_v0 = vld [vmem:[%s2369_s1 + $0x78] sm:$0xff]   ;;  %v1949_v2 = vld [vmem:[%s2369_s1 + $0x70] sm:$0xff]   ;;  %v1951_v4 = vld [vmem:[%s2369_s1 + $0x68] sm:$0xff]   ;;  %s2373_s13 = smov (!%p161_p3, %s1433_s13), 7  ;;  %vm219_vm0 = vsmask.f32 7424 }
   0xc   : > { %v1948_v1 = vld [vmem:[%s2369_s1 + $0x38] sm:$0xff]   ;;  %1757 = vmatprep.subr.bf16.mxu0 %v1947_v0  ;;  %v1950_v3 = vld [vmem:[%s2369_s1 + $0x30] sm:$0xff]   ;;  %v1952_v5 = vld [vmem:[%s2369_s1 + $0x28] sm:$0xff]   ;;  %s1937_s30 = smul.u32 28, %s2373_s13  ;;  %vm453_vm1 = vcmask 1046528   ;;  %vm583_vm2 = vcmask 1044480  }
   0xd   : > { %1777 = vmatprep.subr.bf16.mxu1 %v1948_v1  ;;  %1758 = vmatpush3.bf16.msra.mxu0 %v1947_v0  ;;  %v1953_v6 = vld [vmem:[%s2369_s1 + $0x60] sm:$0xff]   ;;  %v1955_v8 = vld [vmem:[%s2369_s1 + $0x58] sm:$0xff]   ;;  %v1957_v10 = vld [vmem:[%s2369_s1 + $0x50] sm:$0xff]   ;;  %vm709_vm3 = vsmask.f32 4352  ;;  %vm979_vm4 = vcmask 1045504  }
   0xe   : > { %1778 = vmatpush3.bf16.msra.mxu1 %v1948_v1  ;;  %1759 = vmatprep.subr.bf16.mxu0 %v1949_v2  ;;  %v1954_v7 = vld [vmem:[%s2369_s1 + $0x20] sm:$0xff]   ;;  %v1956_v9 = vld [vmem:[%s2369_s1 + $0x18] sm:$0xff]   ;;  %s2104_s10 = scalar_lea.vmem %s2368_s0, %s1937_s30  ;;  %v1958_v14 = vld [vmem:[%s2369_s1 + $0x10] sm:$0xff]   ;;  %vm1105_vm5 = vsmask.f32 5376 }
   0xf   : > { %1779 = vmatprep.subr.bf16.mxu1 %v1950_v3  ;;  %v172_v11 = vld [vmem:[%s2104_s10] sm:$0xf]  ;;  %v2111_v12 = vld [vmem:[%s2104_s10 + $0x4] sm:$0xf]  ;;  %v2114_v13 = vld [vmem:[%s2104_s10 + $0x8] sm:$0xf] }
  0x10   : > { %v191_v15 = vld [vmem:[%s2104_s10 + $0xc] sm:$0x1]  ;;  %v1456_v16 = vcombine.low %v172_v11, %v2111_v12  ;;  %v1961_v26 = vld [vmem:[%s2369_s1 + $0x40] sm:$0xff]   ;;  %v1966_v30 = vld [vmem:[%s2369_s1 + $0xb8] sm:$0xff]   ;;  %v1466_v33 = vcombine.low %v2114_v13, %v2114_v13 }
  0x11   : > { %1760 = vmatpush3.bf16.msra.mxu0 %v1949_v2  ;;  %v2122_v17 = vcombine.low %v2114_v13, %v191_v15  ;;  %v1959_v20 = vld [vmem:[%s2369_s1 + $0x48] sm:$0xff]   ;;  %v1962_v27 = vld [vmem:[%s2369_s1] sm:$0xff]   ;;  %v1967_v31 = vld [vmem:[%s2369_s1 + $0xf8] sm:$0xff]   ;;  %v1567_v15 = vcombine.low %v2111_v12, %v2114_v13 }
  0x12   : > { %1780 = vmatpush3.bf16.msra.mxu1 %v1950_v3  ;;  %1761 = vmatprep.subr.bf16.mxu0 %v1951_v4  ;;  %v221_v18 = vshrl.u32 %v1456_v16, 16  ;;  %v223_v19 = vshll.u32 %v1456_v16, 16  ;;  %v1960_v22 = vld [vmem:[%s2369_s1 + $0x8] sm:$0xff]   ;;  %v1968_v34 = vld [vmem:[%s2369_s1 + $0xb0] sm:$0xff]   ;;  %v432_v36 = vld [vmem:[%s2104_s10] sm:$0xe] }
  0x13   : > { %1781 = vmatprep.subr.bf16.mxu1 %v1952_v5  ;;  %1793 = vmatprep.mubr.bf16.mxu1 %v1456_v16  ;;  %v228_v21 = vshll.u32 %v2122_v17, 16  ;;  %v232_v29 = vshrl.u32 %v2122_v17, 16  ;;  %v1969_v35 = vld [vmem:[%s2369_s1 + $0xf0] sm:$0xff]   ;;  %v1491_v37 = vcombine.low %v432_v36, %v2111_v12  ;;  %v455_v38 = vrot.slane %v2122_v17, 1  ;;  %v558_v39 = vld [vmem:[%s2104_s10] sm:$0x8] }
  0x14   : > { %v225_v23 = vrot.slane %v223_v19, 1  ;;  %v559_v40 = vld [vmem:[%s2104_s10 + $0xc] sm:$0x7]  ;;  %v1516_v42 = vcombine.low %v558_v39, %v2111_v12  ;;  %v1972_v49 = vld [vmem:[%s2369_s1 + $0xa0] sm:$0xff]   ;;  %v1974_v52 = vld [vmem:[%s2369_s1 + $0x98] sm:$0xff]  }
  0x15   : > { %1762 = vmatpush3.bf16.msra.mxu0 %v1951_v4  ;;  %v230_v24 = vrot.slane %v228_v21, 1  ;;  %v1970_v41 = vld [vmem:[%s2369_s1 + $0xa8] sm:$0xff]   ;;  %v1517_v43 = vcombine.low %v2114_v13, %v559_v40  ;;  %v454_v45 = vrot.slane %v1491_v37, 1  ;;  %v1973_v51 = vld [vmem:[%s2369_s1 + $0xe0] sm:$0xff]   ;;  %v1975_v53 = vld [vmem:[%s2369_s1 + $0xd8] sm:$0xff]  }
  0x16   : > { %1782 = vmatpush3.bf16.msra.mxu1 %v1952_v5  ;;  %1763 = vmatprep.subr.bf16.mxu0 %v1953_v6  ;;  %v226_v25 = vor.u32 %v225_v23, %v221_v18  ;;  %v1971_v44 = vld [vmem:[%s2369_s1 + $0xe8] sm:$0xff]   ;;  %v584_v46 = vrot.slane %v1516_v42, 3  ;;  %v1976_v54 = vld [vmem:[%s2369_s1 + $0x90] sm:$0xff]   ;;  %v711_v58 = vshrl.u32 %v1516_v42, 16  ;;  %v714_v59 = vshll.u32 %v1516_v42, 16  ;;  %v1980_v0 = vld [vmem:[%s2369_s1 + $0x80] sm:$0xff]  }
  0x17   : > { %1783 = vmatprep.subr.bf16.mxu1 %v1954_v7  ;;  %v234_v32 = vor.u32 %v232_v29, %v230_v24  ;;  %v2166_v47 = vrot.slane %v1517_v43, 3  ;;  %v456_v48 = vsel %vm453_vm1, %v454_v45, %v455_v38  ;;  %v1977_v55 = vld [vmem:[%s2369_s1 + $0xd0] sm:$0xff]   ;;  %v1978_v56 = vld [vmem:[%s2369_s1 + $0x88] sm:$0xff]   ;;  %v1981_v1 = vld [vmem:[%s2369_s1 + $0xc0] sm:$0xff]  }
  0x18   : > { %v231_v28 = vsel %vm219_vm0, %v226_v25, %v230_v24  ;;  %v2195_v57 = vld [vmem:[%s2104_s10 + $0xc] sm:$0xf]  ;;  %v713_v2 = vrot.slane %v711_v58, 3  ;;  %v716_v3 = vrot.slane %v714_v59, 4  ;;  %v1988_v11 = vld [vmem:[%s2369_s1 + $0x170] sm:$0xff]   ;;  %v1991_v12 = vld [vmem:[%s2369_s1 + $0x120] sm:$0xff]  }
  0x19   : > { %1764 = vmatpush3.bf16.msra.mxu0 %v1953_v6  ;;  %1773 = vmatprep.mubr.bf16.mxu0 %v231_v28  ;;  %v586_v50 = vsel %vm583_vm2, %v584_v46, %v2166_v47  ;;  %v1542_v60 = vcombine.low %v2114_v13, %v2195_v57  ;;  %v1979_v61 = vld [vmem:[%s2369_s1 + $0xc8] sm:$0xff]   ;;  %v1983_v6 = vld [vmem:[%s2369_s1 + $0x138] sm:$0xff]   ;;  %v1992_v13 = vld [vmem:[%s2369_s1 + $0x160] sm:$0xff]  }
  0x1a   : > { %1784 = vmatpush3.bf16.msra.mxu1 %v1954_v7  ;;  %1765 = vmatprep.subr.bf16.mxu0 %v1955_v8  ;;  %v1986_v7 = vld [vmem:[%s2369_s1 + $0x178] sm:$0xff]   ;;  %v1989_v16 = vld [vmem:[%s2369_s1 + $0x128] sm:$0xff]   ;;  %v1084_v19 = vld [vmem:[%s2104_s10 + $0x10] sm:$0x7] }
  0x1b   : > { %1785 = vmatprep.subr.bf16.mxu1 %v1956_v9  ;;  %v719_v62 = vshrl.u32 %v1542_v60, 16  ;;  %v722_v63 = vshll.u32 %v1542_v60, 16  ;;  %v1990_v17 = vld [vmem:[%s2369_s1 + $0x168] sm:$0xff]   ;;  %v1994_v21 = vld [vmem:[%s2369_s1 + $0x158] sm:$0xff]   ;;  %v1224_v24 = vld [vmem:[%s2104_s10 + $0x4] sm:$0x8] }
  0x1c   : > { %v950_v18 = vld [vmem:[%s2104_s10 + $0xc] sm:$0xf]  ;;  %v949_v23 = vld [vmem:[%s2104_s10 + $0x8] sm:$0xf]  ;;  %v948_v28 = vld [vmem:[%s2104_s10 + $0x4] sm:$0xc] }
  0x1d   : > { %1766 = vmatpush3.bf16.msra.mxu0 %v1955_v8  ;;  %v721_v4 = vrot.slane %v719_v62, 3  ;;  %v724_v5 = vrot.slane %v722_v63, 4  ;;  %v717_v8 = vor.u32 %v716_v3, %v713_v2  ;;  %v1644_v25 = vcombine.low %v1224_v24, %v949_v23  ;;  %v1996_v29 = vld [vmem:[%s2369_s1 + $0x150] sm:$0xff]   ;;  %v1999_v40 = vld [vmem:[%s2369_s1 + $0x100] sm:$0xff]   ;;  %v2008_v58 = vld [vmem:[%s2369_s1 + $0x1a8] sm:$0xff]  }
  0x1e   : > { %1786 = vmatpush3.bf16.msra.mxu1 %v1956_v9  ;;  %1767 = vmatprep.subr.bf16.mxu0 %v1957_v10  ;;  %v2009_v59 = vld [vmem:[%s2369_s1 + $0x1e8] sm:$0xff]   ;;  %v2010_v60 = vld [vmem:[%s2369_s1 + $0x1a0] sm:$0xff]   ;;  %v2012_v62 = vld [vmem:[%s2369_s1 + $0x198] sm:$0xff]  }
  0x1f   : > { %1787 = vmatprep.subr.bf16.mxu1 %v1958_v14  ;;  %v2214_v9 = vor.u32 %v724_v5, %v721_v4  ;;  %v2013_v63 = vld [vmem:[%s2369_s1 + $0x1d8] sm:$0xff]   ;;  %v2016_v2 = vld [vmem:[%s2369_s1 + $0x188] sm:$0xff]   ;;  %v2018_v4 = vld [vmem:[%s2369_s1 + $0x180] sm:$0xff]  }
  0x20   : > { %v2017_v3 = vld [vmem:[%s2369_s1 + $0x1c8] sm:$0xff]   ;;  %v2019_v5 = vld [vmem:[%s2369_s1 + $0x1c0] sm:$0xff]  }
  0x21   : > { %1768 = vmatpush3.bf16.msra.mxu0 %v1957_v10  ;;  %v1987_v10 = vld [vmem:[%s2369_s1 + $0x130] sm:$0xff]  }
  0x22   : > { %1788 = vmatpush3.bf16.msra.mxu1 %v1958_v14  ;;  %1769 = vmatprep.subr.bf16.mxu0 %v1959_v20  ;;  %v726_v14 = vsel %vm709_vm3, %v717_v8, %v2214_v9  ;;  %v2025_v8 = vld [vmem:[%s2369_s1 + $0x228] sm:$0xff]  }
  0x23   : > { %1789 = vmatprep.subr.bf16.mxu1 %v1960_v22 }
  0x25   : > { %1770 = vmatpush3.bf16.msra.mxu0 %v1959_v20  ;;  %v1993_v20 = vld [vmem:[%s2369_s1 + $0x118] sm:$0xff]  }
  0x26   : > { %1790 = vmatpush3.bf16.msra.mxu1 %v1960_v22  ;;  %1771 = vmatprep.subr.bf16.mxu0 %v1961_v26  ;;  %v2248_v22 = vcombine.low %v950_v18, %v1084_v19 }
  0x27   : > { %1791 = vmatprep.subr.bf16.mxu1 %v1962_v27 }
  0x28   : > { %v1118_v39 = vshll.u32 %v2248_v22, 16 }
  0x29   : > { %1772 = vmatpush3.bf16.msra.mxu0 %v1961_v26  ;;  %v1246_v26 = vrot.slane %v2248_v22, 3 }
  0x2a   : > { %1792 = vmatpush3.bf16.msra.mxu1 %v1962_v27  ;;  %1797 = vmatprep.subr.bf16.mxu0 %v1966_v30  ;;  %v1995_v27 = vld [vmem:[%s2369_s1 + $0x110] sm:$0xff]   ;;  %v1120_v46 = vrot.slane %v1118_v39, 3 }
  0x2b   : > { %1817 = vmatprep.subr.bf16.mxu1 %v1967_v31 }
  0x2c   : > { %1774 = vmatmul.mubr.bf16.vlgmr.msra.gmra.mxu0 %v234_v32 }
  0x2d   : > { %1794 = vmatmul.mubr.bf16.vlgmr.msra.gmra.mxu1 %v1466_v33  ;;  %1798 = vmatpush3.bf16.msra.mxu0 %v1966_v30  ;;  %v1245_v30 = vrot.slane %v1644_v25, 3  ;;  %v1997_v33 = vld [vmem:[%s2369_s1 + $0x108] sm:$0xff]  }
  0x2e   : > { %1818 = vmatpush3.bf16.msra.mxu1 %v1967_v31  ;;  %1799 = vmatprep.subr.bf16.mxu0 %v1968_v34  ;;  %v1593_v31 = vcombine.low %v948_v28, %v949_v23 }
  0x2f   : > { %1819 = vmatprep.subr.bf16.mxu1 %v1969_v35  ;;  %1813 = vmatprep.mubr.bf16.mxu0 %v456_v48  ;;  %v2263_v32 = vsel %vm583_vm2, %v1245_v30, %v1246_v26  ;;  %v2005_v48 = vld [vmem:[%s2369_s1 + $0x1f8] sm:$0xff]  }
  0x30   : > { %1833 = vmatprep.mubr.bf16.mxu1 %v586_v50  ;;  %v1107_v36 = vshrl.u32 %v1593_v31, 16  ;;  %v1110_v37 = vshll.u32 %v1593_v31, 16 }
  0x31   : > { %1800 = vmatpush3.bf16.msra.mxu0 %v1968_v34  ;;  %v1998_v34 = vld [vmem:[%s2369_s1 + $0x148] sm:$0xff]  }
  0x32   : > { %1820 = vmatpush3.bf16.msra.mxu1 %v1969_v35  ;;  %1801 = vmatprep.subr.bf16.mxu0 %v1970_v41  ;;  %v951_v35 = vld [vmem:[%s2104_s10 + $0x10] sm:$0x3]  ;;  %v1109_v43 = vrot.slane %v1107_v36, 2  ;;  %s1938_s10 = smul.u32 12, %s2373_s13 }
  0x33   : > { %1821 = vmatprep.subr.bf16.mxu1 %v1971_v44  ;;  %v1594_v42 = vcombine.low %v950_v18, %v951_v35 }
  0x34   : > { %s170_s19 = scalar_lea.vmem %s2371_s3, %s1938_s10 }
  0x35   : > { %1802 = vmatpush3.bf16.msra.mxu0 %v1970_v41  ;;  %v2000_v41 = vld [vmem:[%s2369_s1 + $0x140] sm:$0xff]   ;;  %v981_v50 = vrot.slane %v1594_v42, 2 }
  0x36   : > { %1822 = vmatpush3.bf16.msra.mxu1 %v1971_v44  ;;  %1803 = vmatprep.subr.bf16.mxu0 %v1972_v49  ;;  %v1112_v44 = vrot.slane %v1110_v37, 3 }
  0x37   : > { %1823 = vmatprep.subr.bf16.mxu1 %v1973_v51 }
  0x39   : > { %1804 = vmatpush3.bf16.msra.mxu0 %v1972_v49  ;;  %v980_v49 = vrot.slane %v1593_v31, 2 }
  0x3a   : > { %1824 = vmatpush3.bf16.msra.mxu1 %v1973_v51  ;;  %1805 = vmatprep.subr.bf16.mxu0 %v1974_v52  ;;  %v1568_v51 = vcombine.low %v2195_v57, %v2195_v57 }
  0x3b   : > { %1825 = vmatprep.subr.bf16.mxu1 %v1975_v53 }
  0x3d   : > { %1806 = vmatpush3.bf16.msra.mxu0 %v1974_v52  ;;  %v1113_v52 = vor.u32 %v1112_v44, %v1109_v43 }
  0x3e   : > { %1826 = vmatpush3.bf16.msra.mxu1 %v1975_v53  ;;  %1807 = vmatprep.subr.bf16.mxu0 %v1976_v54 }
  0x3f   : > { %1827 = vmatprep.subr.bf16.mxu1 %v1977_v55 }
  0x41   : > { %1808 = vmatpush3.bf16.msra.mxu0 %v1976_v54  ;;  %v2006_v54 = vld [vmem:[%s2369_s1 + $0x1b0] sm:$0xff]  }
  0x42   : > { %1828 = vmatpush3.bf16.msra.mxu1 %v1977_v55  ;;  %1809 = vmatprep.subr.bf16.mxu0 %v1978_v56  ;;  %v2007_v55 = vld [vmem:[%s2369_s1 + $0x1f0] sm:$0xff]  }
  0x43   : > { %1829 = vmatprep.subr.bf16.mxu1 %v1979_v61 }
  0x45   : > { %1810 = vmatpush3.bf16.msra.mxu0 %v1978_v56  ;;  %v982_v56 = vsel %vm979_vm4, %v980_v49, %v981_v50 }
  0x46   : > { %1830 = vmatpush3.bf16.msra.mxu1 %v1979_v61  ;;  %1811 = vmatprep.subr.bf16.mxu0 %v1980_v0  ;;  %v2011_v61 = vld [vmem:[%s2369_s1 + $0x1e0] sm:$0xff]  }
  0x47   : > { %1831 = vmatprep.subr.bf16.mxu1 %v1981_v1 }
  0x49   : > { %1812 = vmatpush3.bf16.msra.mxu0 %v1980_v0  ;;  %v2014_v0 = vld [vmem:[%s2369_s1 + $0x190] sm:$0xff]  }
  0x4a   : > { %1832 = vmatpush3.bf16.msra.mxu1 %v1981_v1  ;;  %1837 = vmatprep.subr.bf16.mxu0 %v1983_v6  ;;  %v2015_v1 = vld [vmem:[%s2369_s1 + $0x1d0] sm:$0xff]  }
  0x4b   : > { %1857 = vmatprep.subr.bf16.mxu1 %v1986_v7 }
  0x4c   : > { %1814 = vmatmul.mubr.bf16.vlgmr.msra.gmra.mxu0 %v455_v38  ;;  %v1115_v38 = vshrl.u32 %v2248_v22, 16 }
  0x4d   : > { %1838 = vmatpush3.bf16.msra.mxu0 %v1983_v6  ;;  %1834 = vmatmul.mubr.bf16.vlgmr.msra.gmra.mxu1 %v2166_v47  ;;  %v2002_v47 = vld [vmem:[%s2369_s1 + $0x1b8] sm:$0xff]  }
  0x4e   : > { %1858 = vmatpush3.bf16.msra.mxu1 %v1986_v7  ;;  %1839 = vmatprep.subr.bf16.mxu0 %v1987_v10  ;;  %v1117_v45 = vrot.slane %v1115_v38, 2  ;;  %v2023_v6 = vld [vmem:[%s2369_s1 + $0x238] sm:$0xff]   ;;  %v2024_v7 = vld [vmem:[%s2369_s1 + $0x230] sm:$0xff]  }
  0x4f   : > { %1859 = vmatprep.subr.bf16.mxu1 %v1988_v11  ;;  %1853 = vmatprep.mubr.bf16.mxu0 %v726_v14  ;;  %v2029_v14 = vld [vmem:[%s2369_s1 + $0x208] sm:$0xff]  }
  0x50   : > { %1873 = vmatprep.mubr.bf16.mxu1 %v1567_v15  ;;  %v1121_v53 = vor.u32 %v1120_v46, %v1117_v45  ;;  %v2030_v15 = vld [vmem:[%s2369_s1 + $0x200] sm:$0xff]  }
  0x51   : > { %1840 = vmatpush3.bf16.msra.mxu0 %v1987_v10  ;;  %v2027_v10 = vld [vmem:[%s2369_s1 + $0x218] sm:$0xff]  }
  0x52   : > { %1860 = vmatpush3.bf16.msra.mxu1 %v1988_v11  ;;  %1841 = vmatprep.subr.bf16.mxu0 %v1989_v16  ;;  %v1122_v57 = vsel %vm1105_vm5, %v1113_v52, %v1121_v53  ;;  %v2028_v11 = vld [vmem:[%s2369_s1 + $0x210] sm:$0xff]  }
  0x53   : > { %1861 = vmatprep.subr.bf16.mxu1 %v1990_v17 }
  0x55   : > { %1842 = vmatpush3.bf16.msra.mxu0 %v1989_v16 }
  0x56   : > { %1862 = vmatpush3.bf16.msra.mxu1 %v1990_v17  ;;  %1843 = vmatprep.subr.bf16.mxu0 %v1991_v12 }
  0x57   : > { %1863 = vmatprep.subr.bf16.mxu1 %v1992_v13 }
  0x59   : > { %1844 = vmatpush3.bf16.msra.mxu0 %v1991_v12 }
  0x5a   : > { %1864 = vmatpush3.bf16.msra.mxu1 %v1992_v13  ;;  %1845 = vmatprep.subr.bf16.mxu0 %v1993_v20 }
  0x5b   : > { %1865 = vmatprep.subr.bf16.mxu1 %v1994_v21 }
  0x5d   : > { %1846 = vmatpush3.bf16.msra.mxu0 %v1993_v20 }
  0x5e   : > { %1866 = vmatpush3.bf16.msra.mxu1 %v1994_v21  ;;  %1847 = vmatprep.subr.bf16.mxu0 %v1995_v27 }
  0x5f   : > { %1867 = vmatprep.subr.bf16.mxu1 %v1996_v29 }
  0x61   : > { %1848 = vmatpush3.bf16.msra.mxu0 %v1995_v27 }
  0x62   : > { %1868 = vmatpush3.bf16.msra.mxu1 %v1996_v29  ;;  %1849 = vmatprep.subr.bf16.mxu0 %v1997_v33 }
  0x63   : > { %1869 = vmatprep.subr.bf16.mxu1 %v1998_v34 }
  0x65   : > { %1850 = vmatpush3.bf16.msra.mxu0 %v1997_v33 }
  0x66   : > { %1870 = vmatpush3.bf16.msra.mxu1 %v1998_v34  ;;  %1851 = vmatprep.subr.bf16.mxu0 %v1999_v40 }
  0x67   : > { %1871 = vmatprep.subr.bf16.mxu1 %v2000_v41 }
  0x69   : > { %1852 = vmatpush3.bf16.msra.mxu0 %v1999_v40 }
  0x6a   : > { %1872 = vmatpush3.bf16.msra.mxu1 %v2000_v41  ;;  %1877 = vmatprep.subr.bf16.mxu0 %v2002_v47 }
  0x6b   : > { %1897 = vmatprep.subr.bf16.mxu1 %v2005_v48 }
  0x6c   : > { %1854 = vmatmul.mubr.bf16.vlgmr.msra.gmra.mxu0 %v2214_v9  ;;  %v2026_v9 = vld [vmem:[%s2369_s1 + $0x220] sm:$0xff]  }
  0x6d   : > { %1878 = vmatpush3.bf16.msra.mxu0 %v2002_v47  ;;  %1874 = vmatmul.mubr.bf16.vlgmr.msra.gmra.mxu1 %v1568_v51 }
  0x6e   : > { %1898 = vmatpush3.bf16.msra.mxu1 %v2005_v48  ;;  %1879 = vmatprep.subr.bf16.mxu0 %v2006_v54 }
  0x6f   : > { %1899 = vmatprep.subr.bf16.mxu1 %v2007_v55  ;;  %1893 = vmatprep.mubr.bf16.mxu0 %v982_v56 }
  0x70   : > { %1913 = vmatprep.mubr.bf16.mxu1 %v1122_v57 }
  0x71   : > { %1880 = vmatpush3.bf16.msra.mxu0 %v2006_v54 }
  0x72   : > { %1900 = vmatpush3.bf16.msra.mxu1 %v2007_v55  ;;  %1881 = vmatprep.subr.bf16.mxu0 %v2008_v58 }
  0x73   : > { %1901 = vmatprep.subr.bf16.mxu1 %v2009_v59 }
  0x75   : > { %1882 = vmatpush3.bf16.msra.mxu0 %v2008_v58 }
  0x76   : > { %1902 = vmatpush3.bf16.msra.mxu1 %v2009_v59  ;;  %1883 = vmatprep.subr.bf16.mxu0 %v2010_v60 }
  0x77   : > { %1903 = vmatprep.subr.bf16.mxu1 %v2011_v61 }
  0x79   : > { %1884 = vmatpush3.bf16.msra.mxu0 %v2010_v60 }
  0x7a   : > { %1904 = vmatpush3.bf16.msra.mxu1 %v2011_v61  ;;  %1885 = vmatprep.subr.bf16.mxu0 %v2012_v62 }
  0x7b   : > { %1905 = vmatprep.subr.bf16.mxu1 %v2013_v63 }
  0x7d   : > { %1886 = vmatpush3.bf16.msra.mxu0 %v2012_v62 }
  0x7e   : > { %1906 = vmatpush3.bf16.msra.mxu1 %v2013_v63  ;;  %1887 = vmatprep.subr.bf16.mxu0 %v2014_v0 }
  0x7f   : > { %1907 = vmatprep.subr.bf16.mxu1 %v2015_v1 }
  0x81   : > { %1888 = vmatpush3.bf16.msra.mxu0 %v2014_v0  ;;  %v1653_v0 = vld [vmem:[%s2370_s2] ss:$0 sm:$0xff] }
  0x82   : > { %1908 = vmatpush3.bf16.msra.mxu1 %v2015_v1  ;;  %1889 = vmatprep.subr.bf16.mxu0 %v2016_v2 }
  0x83   : > { %1909 = vmatprep.subr.bf16.mxu1 %v2017_v3 }
  0x85   : > { %1890 = vmatpush3.bf16.msra.mxu0 %v2016_v2 }
  0x86   : > { %1910 = vmatpush3.bf16.msra.mxu1 %v2017_v3  ;;  %1891 = vmatprep.subr.bf16.mxu0 %v2018_v4 }
  0x87   : > { %1911 = vmatprep.subr.bf16.mxu1 %v2019_v5 }
  0x89   : > { %1892 = vmatpush3.bf16.msra.mxu0 %v2018_v4 }
  0x8a   : > { %1912 = vmatpush3.bf16.msra.mxu1 %v2019_v5  ;;  %1917 = vmatprep.subr.bf16.mxu0 %v2023_v6 }
  0x8c   : > { %1894 = vmatmul.mubr.bf16.vlgmr.msra.gmra.mxu0 %v981_v50 }
  0x8d   : > { %1918 = vmatpush3.bf16.msra.mxu0 %v2023_v6  ;;  %1914 = vmatmul.mubr.bf16.vlgmr.msra.gmra.mxu1 %v1121_v53 }
  0x8e   : > { %1919 = vmatprep.subr.bf16.mxu0 %v2024_v7  ;;  %1933 = vmatprep.mubr.bf16.mxu0 %v2263_v32 }
  0x91   : > { %1920 = vmatpush3.bf16.msra.mxu0 %v2024_v7 }
  0x92   : > { %1921 = vmatprep.subr.bf16.mxu0 %v2025_v8 }
  0x95   : > { %1922 = vmatpush3.bf16.msra.mxu0 %v2025_v8 }
  0x96   : > { %1923 = vmatprep.subr.bf16.mxu0 %v2026_v9 }
  0x99   : > { %1924 = vmatpush3.bf16.msra.mxu0 %v2026_v9 }
  0x9a   : > { %1925 = vmatprep.subr.bf16.mxu0 %v2027_v10 }
  0x9d   : > { %1926 = vmatpush3.bf16.msra.mxu0 %v2027_v10 }
  0x9e   : > { %1927 = vmatprep.subr.bf16.mxu0 %v2028_v11 }
  0xa1   : > { %1928 = vmatpush3.bf16.msra.mxu0 %v2028_v11 }
  0xa2   : > { %1929 = vmatprep.subr.bf16.mxu0 %v2029_v14 }
  0xa5   : > { %1930 = vmatpush3.bf16.msra.mxu0 %v2029_v14 }
  0xa6   : > { %1931 = vmatprep.subr.bf16.mxu0 %v2030_v15 }
  0xa9   : > { %1932 = vmatpush3.bf16.msra.mxu0 %v2030_v15 }
  0xac   : > { %1934 = vmatmul.mubr.bf16.vlgmr.msra.gmra.mxu0 %v1246_v26 }
  0xec   : > { %v1775_v16 = vpop.f32.mrf.mxu0 }
  0xed   : > { %v1795_v17 = vpop.f32.mrf.mxu1 }
  0xee   : > { %v427_v12 = vadd.f32 %v1795_v17, %v1775_v16  ;;  %v319_v13 = vpop.f32.mrf.mxu0 }
  0xef   : > { %v418_v18 = vpop.f32.mrf.mxu1 }
  0xf0   : > { %v419_v19 = vadd.f32 %v418_v18, %v319_v13  ;;  %v1776_v20 = vpop.f32.mrf.mxu0 }
  0xf1   : > { %v1796_v21 = vpop.f32.mrf.mxu1 }
  0xf2   : > { %v322_v23 = vpop.f32.mrf.mxu0 }
  0xf3   : > { %v421_v24 = vpop.f32.mrf.mxu1 }
  0xf4   : > { %v422_v25 = vadd.f32 %v421_v24, %v322_v23 }
 0x10c   : > { %v1815_v27 = vpop.f32.mrf.mxu0 }
 0x10d   : > { %v557_v28 = vadd.f32 %v1815_v27, %v427_v12  ;;  %v1835_v29 = vpop.f32.mrf.mxu1 }
 0x10e   : > { %v541_v30 = vpop.f32.mrf.mxu0 }
 0x10f   : > { %v555_v31 = vadd.f32 %v541_v30, %v419_v19  ;;  %v687_v32 = vadd.f32 %v1835_v29, %v557_v28  ;;  %v671_v33 = vpop.f32.mrf.mxu1 }
 0x110   : > { %v1816_v22 = vpop.f32.mrf.mxu0 }
 0x111   : > { %v685_v26 = vadd.f32 %v671_v33, %v555_v31  ;;  %v1836_v34 = vpop.f32.mrf.mxu1 }
 0x112   : > { %v544_v35 = vpop.f32.mrf.mxu0 }
 0x113   : > { %v674_v36 = vpop.f32.mrf.mxu1  ;;  %v556_v51 = vadd.f32 %v544_v35, %v422_v25 }
 0x115   : > { %v686_v54 = vadd.f32 %v674_v36, %v556_v51 }
 0x12c   : > { %v1855_v37 = vpop.f32.mrf.mxu0 }
 0x12d   : > { %v1875_v38 = vpop.f32.mrf.mxu1  ;;  %v827_v52 = vadd.f32 %v1855_v37, %v687_v32 }
 0x12e   : > { %v811_v39 = vpop.f32.mrf.mxu0 }
 0x12f   : > { %v931_v40 = vpop.f32.mrf.mxu1  ;;  %v825_v53 = vadd.f32 %v811_v39, %v685_v26  ;;  %v947_v55 = vadd.f32 %v1875_v38, %v827_v52 }
 0x130   : > { %v1856_v41 = vpop.f32.mrf.mxu0 }
 0x131   : > { %v1876_v42 = vpop.f32.mrf.mxu1  ;;  %v945_v56 = vadd.f32 %v931_v40, %v825_v53 }
 0x132   : > { %v814_v43 = vpop.f32.mrf.mxu0 }
 0x133   : > { %v934_v44 = vpop.f32.mrf.mxu1  ;;  %v826_v57 = vadd.f32 %v814_v43, %v686_v54 }
 0x135   : > { %v946_v61 = vadd.f32 %v934_v44, %v826_v57 }
 0x14c   : > { %v1895_v45 = vpop.f32.mrf.mxu0 }
 0x14d   : > { %v1915_v46 = vpop.f32.mrf.mxu1  ;;  %v1083_v58 = vadd.f32 %v1895_v45, %v947_v55 }
 0x14e   : > { %v1067_v47 = vpop.f32.mrf.mxu0 }
 0x14f   : > { %v1207_v48 = vpop.f32.mrf.mxu1  ;;  %v1081_v59 = vadd.f32 %v1067_v47, %v945_v56  ;;  %v1223_v62 = vadd.f32 %v1915_v46, %v1083_v58 }
 0x150   : > { %v1896_v49 = vpop.f32.mrf.mxu0 }
 0x151   : > { %v1916_v50 = vpop.f32.mrf.mxu1  ;;  %v1221_v1 = vadd.f32 %v1207_v48, %v1081_v59 }
 0x152   : > { %v1070_v60 = vpop.f32.mrf.mxu0 }
 0x153   : > { %v1082_v2 = vadd.f32 %v1070_v60, %v946_v61  ;;  %v1210_v4 = vpop.f32.mrf.mxu1 }
 0x155   : > { %v1222_v9 = vadd.f32 %v1210_v4, %v1082_v2 }
 0x16c   : > { %v1935_v63 = vpop.f32.mrf.mxu0 }
 0x16d   : > { %v1348_v3 = vadd.f32 %v1935_v63, %v1223_v62 }
 0x16e   : > { %v1332_v5 = vpop.f32.mrf.mxu0 }
 0x16f   : > { %v1358_v6 = vadd.f32 %v1653_v0, %v1348_v3  ;;  %v1346_v7 = vadd.f32 %v1332_v5, %v1221_v1 }
 0x170   : > { %v1936_v8 = vpop.f32.mrf.mxu0 }
 0x171   : > { %v1361_v10 = vmax.f32 %v1358_v6, 0.0  ;;  %v1356_v15 = vadd.f32 %v1653_v0, %v1346_v7 }
 0x172   : > { %v1335_v11 = vpop.f32.mrf.mxu0 }
 0x173   : > { %v1661_v14 = vpack.c.bf16 %v1361_v10, %v1361_v10  ;;  %v1347_v16 = vadd.f32 %v1335_v11, %v1222_v9  ;;  %v1359_v12 = vmax.f32 %v1356_v15, 0.0 }
 0x175   : > { %1377 = vst [vmem:[%s170_s19 + $0x8] sm:$0xf] %v1661_v14  ;;  %v1357_v17 = vadd.f32 %v1653_v0, %v1347_v16 }
 0x177   : > { %v1360_v13 = vmax.f32 %v1357_v17, 0.0 }
 0x179   : > { %v1665_v18 = vpack.c.bf16 %v1360_v13, %v1359_v12 }
 0x17b   : > { %1666 = vst [vmem:[%s170_s19] sm:$0xff] %v1665_v18  }
 0x17c PF: > { %s13_s12 = sadd.s32 1, %s2038_s12  }
 0x17d   : > { %p10_p4 = scmp.ge.s32.totalorder %s13_s12, 10  }
 0x17f   :  { %12 = sbr.rel (!%p10_p4) target bundleno = 1 (0x1), region = 70 }

// kernel: feature_extractor_forward.80
= control target key start
LH: loop header
LB: loop body
LE: loop exit
PB: predicated region body
PF: predicated region fallthrough
CT: control target
= control target key end

     0   :  { %v181_v0 = vmov 0.0   ;;  %vm182_vm0 = vmmov 0   ;;  %s236_s1 = inlined_call_operand.vmem [shape: bf16[128,128], index: 1, kind: input, shape index: {}]   ;;  %s237_s0 = inlined_call_operand.vmem [shape: bf16[8,128], index: 0, kind: input, shape index: {}]   ;;  %s238_s2 = inlined_call_operand.vmem [shape: f32[1,128], index: 2, kind: input, shape index: {}]   ;;  %s239_s3 = inlined_call_operand.vmem [shape: bf16[8,128], index: 3, kind: output, shape index: {}]  }
   0x1   :  { %151 = vmatprep.subr.bf16.mxu0 %v181_v0  ;;  %v173_v1 = vld [vmem:[%s236_s1 + $0x38] sm:$0xff]   ;;  %167 = vmatprep.mubr.msk.bf16.mxu0 %vm182_vm0, %v181_v0  ;;  %v174_v2 = vld [vmem:[%s236_s1 + $0x30] sm:$0xff]   ;;  %v175_v3 = vld [vmem:[%s236_s1 + $0x28] sm:$0xff]  }
   0x2   :  { %152 = vmatpush3.bf16.msra.mxu0 %v173_v1  ;;  %v176_v4 = vld [vmem:[%s236_s1 + $0x20] sm:$0xff]   ;;  %v177_v5 = vld [vmem:[%s236_s1 + $0x18] sm:$0xff]   ;;  %v178_v6 = vld [vmem:[%s236_s1 + $0x10] sm:$0xff]  }
   0x3   :  { %153 = vmatprep.subr.bf16.mxu0 %v181_v0  ;;  %v179_v7 = vld [vmem:[%s236_s1 + $0x8] sm:$0xff]   ;;  %v180_v8 = vld [vmem:[%s236_s1] sm:$0xff]  }
   0x4   :  { %v15_v9 = vld [vmem:[%s237_s0] sm:$0xf] }
   0x5   :  { %v133_v10 = vld [vmem:[%s238_s2] ss:$0 sm:$0xff] }
   0x6   :  { %154 = vmatpush3.bf16.msra.mxu0 %v174_v2 }
   0x7   :  { %155 = vmatprep.subr.bf16.mxu0 %v181_v0 }
   0xa   :  { %156 = vmatpush3.bf16.msra.mxu0 %v175_v3 }
   0xb   :  { %157 = vmatprep.subr.bf16.mxu0 %v181_v0 }
   0xe   :  { %158 = vmatpush3.bf16.msra.mxu0 %v176_v4 }
   0xf   :  { %159 = vmatprep.subr.bf16.mxu0 %v181_v0 }
  0x12   :  { %160 = vmatpush3.bf16.msra.mxu0 %v177_v5 }
  0x13   :  { %161 = vmatprep.subr.bf16.mxu0 %v181_v0 }
  0x16   :  { %162 = vmatpush3.bf16.msra.mxu0 %v178_v6 }
  0x17   :  { %163 = vmatprep.subr.bf16.mxu0 %v181_v0 }
  0x1a   :  { %164 = vmatpush3.bf16.msra.mxu0 %v179_v7 }
  0x1b   :  { %165 = vmatprep.subr.bf16.mxu0 %v181_v0 }
  0x1e   :  { %166 = vmatpush3.bf16.msra.mxu0 %v180_v8 }
  0x21   :  { %168 = vmatmul.mubr.bf16.vlgmr.msra.gmra.mxu0 %v15_v9 }
  0xe1   :  { %v121_v11 = vpop.f32.mrf.mxu0 }
  0xe2   :  { %v122_v12 = vadd.f32 %v133_v10, %v121_v11 }
  0xe3   :  { %v169_v13 = vpop.f32.mrf.mxu0 }
  0xe4   :  { %v127_v14 = vpack.c.bf16 %v122_v12, %v122_v12 }
  0xe5   :  { %v124_v15 = vpop.f32.mrf.mxu0 }
  0xe6   :  { %128 = vst [vmem:[%s239_s3] sm:$0xf] %v127_v14 }
  0xe7   :  { %v170_v16 = vpop.f32.mrf.mxu0 }

// kernel: feature_extractor_forward.83
= control target key start
LH: loop header
LB: loop body
LE: loop exit
PB: predicated region body
PF: predicated region fallthrough
CT: control target
= control target key end

     0   :  { %v188_v0 = vmov 0.0   ;;  %vm189_vm0 = vmmov 0   ;;  %s251_s1 = inlined_call_operand.vmem [shape: bf16[128,128], index: 1, kind: input, shape index: {}]   ;;  %s252_s0 = inlined_call_operand.vmem [shape: bf16[8,128], index: 0, kind: input, shape index: {}]   ;;  %s253_s3 = inlined_call_operand.vmem [shape: bf16[8,128], index: 3, kind: input, shape index: {}]   ;;  %s254_s2 = inlined_call_operand.vmem [shape: f32[1,128], index: 2, kind: input, shape index: {}]   ;;  %s255_s4 = inlined_call_operand.vmem [shape: bf16[8,128], index: 4, kind: output, shape index: {}]  }
   0x1   :  { %158 = vmatprep.subr.bf16.mxu0 %v188_v0  ;;  %v180_v1 = vld [vmem:[%s251_s1 + $0x38] sm:$0xff]   ;;  %174 = vmatprep.mubr.msk.bf16.mxu0 %vm189_vm0, %v188_v0  ;;  %v181_v2 = vld [vmem:[%s251_s1 + $0x30] sm:$0xff]   ;;  %v182_v3 = vld [vmem:[%s251_s1 + $0x28] sm:$0xff]  }
   0x2   :  { %159 = vmatpush3.bf16.msra.mxu0 %v180_v1  ;;  %v183_v4 = vld [vmem:[%s251_s1 + $0x20] sm:$0xff]   ;;  %v184_v5 = vld [vmem:[%s251_s1 + $0x18] sm:$0xff]   ;;  %v185_v6 = vld [vmem:[%s251_s1 + $0x10] sm:$0xff]  }
   0x3   :  { %160 = vmatprep.subr.bf16.mxu0 %v188_v0  ;;  %v186_v7 = vld [vmem:[%s251_s1 + $0x8] sm:$0xff]   ;;  %v187_v8 = vld [vmem:[%s251_s1] sm:$0xff]  }
   0x4   :  { %v18_v9 = vld [vmem:[%s252_s0] sm:$0xf] }
   0x5   :  { %v130_v10 = vld [vmem:[%s253_s3] sm:$0xf] }
   0x6   :  { %161 = vmatpush3.bf16.msra.mxu0 %v181_v2  ;;  %v140_v11 = vld [vmem:[%s254_s2] ss:$0 sm:$0xff]  ;;  %v131_v12 = vunpack.c.l.bf16 %v130_v10 }
   0x7   :  { %162 = vmatprep.subr.bf16.mxu0 %v188_v0 }
   0xa   :  { %163 = vmatpush3.bf16.msra.mxu0 %v182_v3 }
   0xb   :  { %164 = vmatprep.subr.bf16.mxu0 %v188_v0 }
   0xe   :  { %165 = vmatpush3.bf16.msra.mxu0 %v183_v4 }
   0xf   :  { %166 = vmatprep.subr.bf16.mxu0 %v188_v0 }
  0x12   :  { %167 = vmatpush3.bf16.msra.mxu0 %v184_v5 }
  0x13   :  { %168 = vmatprep.subr.bf16.mxu0 %v188_v0 }
  0x16   :  { %169 = vmatpush3.bf16.msra.mxu0 %v185_v6 }
  0x17   :  { %170 = vmatprep.subr.bf16.mxu0 %v188_v0 }
  0x1a   :  { %171 = vmatpush3.bf16.msra.mxu0 %v186_v7 }
  0x1b   :  { %172 = vmatprep.subr.bf16.mxu0 %v188_v0 }
  0x1e   :  { %173 = vmatpush3.bf16.msra.mxu0 %v187_v8 }
  0x21   :  { %175 = vmatmul.mubr.bf16.vlgmr.msra.gmra.mxu0 %v18_v9 }
  0xe1   :  { %v124_v13 = vpop.f32.mrf.mxu0 }
  0xe2   :  { %v125_v14 = vadd.f32 %v140_v11, %v124_v13 }
  0xe3   :  { %v176_v15 = vpop.f32.mrf.mxu0 }
  0xe4   :  { %v132_v16 = vadd.f32 %v131_v12, %v125_v14 }
  0xe5   :  { %v127_v17 = vpop.f32.mrf.mxu0 }
  0xe6   :  { %v133_v18 = vmax.f32 %v132_v16, 0.0 }
  0xe7   :  { %v177_v19 = vpop.f32.mrf.mxu0 }
  0xe8   :  { %v134_v20 = vpack.c.bf16 %v133_v18, %v133_v18 }
  0xea   :  { %135 = vst [vmem:[%s255_s4] sm:$0xf] %v134_v20 }

// kernel: feature_extractor_forward.72
= control target key start
LH: loop header
LB: loop body
LE: loop exit
PB: predicated region body
PF: predicated region fallthrough
CT: control target
= control target key end

     0   :  { %s1855_s12 = smov 0   ;;  %s2202_s0 = inlined_call_operand.vmem [shape: bf16[8,28,128], index: 0, kind: input, shape index: {}]   ;;  %s2203_s1 = inlined_call_operand.vmem [shape: bf16[9,128,128], index: 1, kind: input, shape index: {}]   ;;  %s2204_s2 = inlined_call_operand.vmem [shape: f32[1,128], index: 2, kind: input, shape index: {}]   ;;  %s2205_s3 = inlined_call_operand.vmem [shape: bf16[8,8,128], index: 3, kind: output, shape index: {}]  }
   0x1 LB: > { %s1256_s13 = sadd.s32 4294967295, %s1831_s12   ;;  %p1260_p0 = scmp.ge.s32.totalorder %s1831_s12, 1  ;;  %s1831_s12 = sphi %s1855_s12, %s13_s12  }
   0x2   : > { %p137_p1 = scmp.lt.s32.totalorder %s1831_s12, 9 }
   0x4   : > { %p138_p2 = pnand %p1260_p0, %p137_p1 }
   0x5   : > { %p160_p3 = scmp.lt.s32.totalorder (!%p138_p2), %s1256_s13, 7 }
   0x6   : > { %141 = sbr.rel (%p138_p2) target bundleno = 374 (0x176), region = 32 }
   0xb   : > { %v1746_v0 = vld [vmem:[%s2203_s1 + $0x78] sm:$0xff]   ;;  %v1833_v1 = vmov 0.0   ;;  %v1748_v3 = vld [vmem:[%s2203_s1 + $0x70] sm:$0xff]   ;;  %vm1834_vm0 = vmmov 0   ;;  %v1750_v5 = vld [vmem:[%s2203_s1 + $0x68] sm:$0xff]   ;;  %s2207_s13 = smov (!%p160_p3, %s1256_s13), 7 }
   0xc   : > { %1556 = vmatprep.subr.bf16.mxu0 %v1833_v1  ;;  %1576 = vmatprep.subr.bf16.mxu1 %v1833_v1  ;;  %v1747_v2 = vld [vmem:[%s2203_s1 + $0x38] sm:$0xff]   ;;  %v1749_v4 = vld [vmem:[%s2203_s1 + $0x30] sm:$0xff]   ;;  %v1751_v6 = vld [vmem:[%s2203_s1 + $0x28] sm:$0xff]   ;;  %s1474_s28 = sshll.u32 %s2207_s13, 4  ;;  %s1263_s18 = sshll.u32 %s2207_s13, 2 }
   0xd   : > { %1557 = vmatpush3.bf16.msra.mxu0 %v1746_v0  ;;  %1572 = vmatprep.mubr.msk.bf16.mxu0 %vm1834_vm0, %v1833_v1  ;;  %v1752_v7 = vld [vmem:[%s2203_s1 + $0x60] sm:$0xff]   ;;  %s1905_s6 = scalar_lea.vmem %s2202_s0, %s1474_s28  ;;  %v1754_v9 = vld [vmem:[%s2203_s1 + $0x58] sm:$0xff]   ;;  %v1756_v14 = vld [vmem:[%s2203_s1 + $0x50] sm:$0xff]   ;;  %s168_s21 = scalar_lea.vmem %s2205_s3, %s1263_s18 }
   0xe   : > { %1577 = vmatpush3.bf16.msra.mxu1 %v1747_v2  ;;  %1558 = vmatprep.subr.bf16.mxu0 %v1833_v1  ;;  %v1753_v8 = vld [vmem:[%s2203_s1 + $0x20] sm:$0xff]   ;;  %v1755_v10 = vld [vmem:[%s2203_s1 + $0x18] sm:$0xff]   ;;  %v1757_v15 = vld [vmem:[%s2203_s1 + $0x10] sm:$0xff]  }
   0xf   : > { %1578 = vmatprep.subr.bf16.mxu1 %v1833_v1  ;;  %1592 = vmatprep.mubr.msk.bf16.mxu1 %vm1834_vm0, %v1833_v1  ;;  %v170_v11 = vld [vmem:[%s1905_s6] sm:$0xf]  ;;  %v1917_v12 = vld [vmem:[%s1905_s6 + $0x4] sm:$0x1]  ;;  %v1758_v17 = vld [vmem:[%s2203_s1 + $0x48] sm:$0xff]  }
  0x10   : > { %v1280_v13 = vcombine.low %v170_v11, %v1917_v12  ;;  %v1759_v18 = vld [vmem:[%s2203_s1 + $0x8] sm:$0xff]   ;;  %v1760_v21 = vld [vmem:[%s2203_s1 + $0x40] sm:$0xff]   ;;  %v1763_v24 = vld [vmem:[%s2203_s1 + $0xb8] sm:$0xff]  }
  0x11   : > { %1559 = vmatpush3.bf16.msra.mxu0 %v1748_v3  ;;  %v1761_v22 = vld [vmem:[%s2203_s1] sm:$0xff]   ;;  %v1764_v25 = vld [vmem:[%s2203_s1 + $0xf8] sm:$0xff]   ;;  %v1765_v26 = vld [vmem:[%s2203_s1 + $0xb0] sm:$0xff]  }
  0x12   : > { %1579 = vmatpush3.bf16.msra.mxu1 %v1749_v4  ;;  %1560 = vmatprep.subr.bf16.mxu0 %v1833_v1  ;;  %v213_v16 = vshll.u32 %v1280_v13, 16  ;;  %v211_v19 = vshrl.u32 %v1280_v13, 16  ;;  %v1766_v27 = vld [vmem:[%s2203_s1 + $0xf0] sm:$0xff]   ;;  %v1767_v28 = vld [vmem:[%s2203_s1 + $0xa8] sm:$0xff]   ;;  %v1769_v30 = vld [vmem:[%s2203_s1 + $0xa0] sm:$0xff]  }
  0x13   : > { %1580 = vmatprep.subr.bf16.mxu1 %v1833_v1  ;;  %v1768_v29 = vld [vmem:[%s2203_s1 + $0xe8] sm:$0xff]   ;;  %v1770_v31 = vld [vmem:[%s2203_s1 + $0xe0] sm:$0xff]   ;;  %v1771_v32 = vld [vmem:[%s2203_s1 + $0x98] sm:$0xff]  }
  0x14   : > { %v215_v20 = vrot.slane %v213_v16, 1  ;;  %v1772_v33 = vld [vmem:[%s2203_s1 + $0xd8] sm:$0xff]   ;;  %v1773_v34 = vld [vmem:[%s2203_s1 + $0x90] sm:$0xff]   ;;  %v1775_v36 = vld [vmem:[%s2203_s1 + $0x88] sm:$0xff]  }
  0x15   : > { %1561 = vmatpush3.bf16.msra.mxu0 %v1750_v5  ;;  %v1774_v35 = vld [vmem:[%s2203_s1 + $0xd0] sm:$0xff]   ;;  %v1776_v37 = vld [vmem:[%s2203_s1 + $0xc8] sm:$0xff]   ;;  %v394_v38 = vld [vmem:[%s1905_s6] sm:$0xe] }
  0x16   : > { %1581 = vmatpush3.bf16.msra.mxu1 %v1751_v6  ;;  %1562 = vmatprep.subr.bf16.mxu0 %v1833_v1  ;;  %v216_v23 = vor.u32 %v215_v20, %v211_v19  ;;  %v506_v39 = vld [vmem:[%s1905_s6] sm:$0xc]  ;;  %v507_v40 = vld [vmem:[%s1905_s6 + $0x4] sm:$0x3]  ;;  %v1313_v41 = vcombine.low %v394_v38, %v1917_v12  ;;  %v1780_v46 = vld [vmem:[%s2203_s1 + $0x138] sm:$0xff]  }
  0x17   : > { %1582 = vmatprep.subr.bf16.mxu1 %v1833_v1  ;;  %v1777_v42 = vld [vmem:[%s2203_s1 + $0x80] sm:$0xff]   ;;  %v1338_v43 = vcombine.low %v506_v39, %v507_v40  ;;  %v1783_v48 = vld [vmem:[%s2203_s1 + $0x178] sm:$0xff]   ;;  %v1784_v49 = vld [vmem:[%s2203_s1 + $0x130] sm:$0xff]  }
  0x18   : > { %v1778_v44 = vld [vmem:[%s2203_s1 + $0xc0] sm:$0xff]   ;;  %v415_v45 = vrot.slane %v1313_v41, 1  ;;  %v1785_v50 = vld [vmem:[%s2203_s1 + $0x170] sm:$0xff]   ;;  %v1786_v51 = vld [vmem:[%s2203_s1 + $0x128] sm:$0xff]  }
  0x19   : > { %1563 = vmatpush3.bf16.msra.mxu0 %v1752_v7  ;;  %v530_v47 = vrot.slane %v1338_v43, 2  ;;  %v1787_v52 = vld [vmem:[%s2203_s1 + $0x168] sm:$0xff]   ;;  %v1788_v53 = vld [vmem:[%s2203_s1 + $0x120] sm:$0xff]   ;;  %v1790_v56 = vld [vmem:[%s2203_s1 + $0x118] sm:$0xff]  }
  0x1a   : > { %1583 = vmatpush3.bf16.msra.mxu1 %v1753_v8  ;;  %1564 = vmatprep.subr.bf16.mxu0 %v1833_v1  ;;  %v1789_v54 = vld [vmem:[%s2203_s1 + $0x160] sm:$0xff]   ;;  %v1791_v57 = vld [vmem:[%s2203_s1 + $0x158] sm:$0xff]   ;;  %v1792_v59 = vld [vmem:[%s2203_s1 + $0x110] sm:$0xff]  }
  0x1b   : > { %1584 = vmatprep.subr.bf16.mxu1 %v1833_v1  ;;  %v621_v55 = vld [vmem:[%s1905_s6 + $0x4] sm:$0x7]  ;;  %v1793_v60 = vld [vmem:[%s2203_s1 + $0x150] sm:$0xff]   ;;  %v1794_v63 = vld [vmem:[%s2203_s1 + $0x108] sm:$0xff]  }
  0x1c   : > { %v1363_v58 = vcombine.low %v506_v39, %v621_v55  ;;  %v1795_v0 = vld [vmem:[%s2203_s1 + $0x148] sm:$0xff]   ;;  %v740_v2 = vld [vmem:[%s1905_s6] sm:$0x8]  ;;  %v1801_v12 = vld [vmem:[%s2203_s1 + $0x1b0] sm:$0xff]  }
  0x1d   : > { %1565 = vmatpush3.bf16.msra.mxu0 %v1754_v9  ;;  %v1796_v5 = vld [vmem:[%s2203_s1 + $0x100] sm:$0xff]   ;;  %v1388_v6 = vcombine.low %v740_v2, %v621_v55  ;;  %v1798_v9 = vld [vmem:[%s2203_s1 + $0x1b8] sm:$0xff]   ;;  %v1802_v13 = vld [vmem:[%s2203_s1 + $0x1f0] sm:$0xff]  }
  0x1e   : > { %1585 = vmatpush3.bf16.msra.mxu1 %v1755_v10  ;;  %1566 = vmatprep.subr.bf16.mxu0 %v1833_v1  ;;  %v643_v61 = vshrl.u32 %v1363_v58, 16  ;;  %v646_v62 = vshll.u32 %v1363_v58, 16  ;;  %v1797_v7 = vld [vmem:[%s2203_s1 + $0x140] sm:$0xff]   ;;  %v1808_v19 = vld [vmem:[%s2203_s1 + $0x1d8] sm:$0xff]   ;;  %v1821_v39 = vld [vmem:[%s2203_s1 + $0x210] sm:$0xff]  }
  0x1f   : > { %1586 = vmatprep.subr.bf16.mxu1 %v1833_v1  ;;  %v761_v10 = vrot.slane %v1388_v6, 3  ;;  %v1805_v16 = vld [vmem:[%s2203_s1 + $0x1a0] sm:$0xff]   ;;  %v1820_v38 = vld [vmem:[%s2203_s1 + $0x218] sm:$0xff]   ;;  %v1822_v40 = vld [vmem:[%s2203_s1 + $0x208] sm:$0xff]  }
  0x20   : > { %v645_v3 = vrot.slane %v643_v61, 2  ;;  %v648_v4 = vrot.slane %v646_v62, 3  ;;  %v959_v20 = vld [vmem:[%s1905_s6 + $0x4] sm:$0xf] }
  0x21   : > { %1567 = vmatpush3.bf16.msra.mxu0 %v1756_v14  ;;  %v1803_v14 = vld [vmem:[%s2203_s1 + $0x1a8] sm:$0xff]   ;;  %v1080_v41 = vld [vmem:[%s1905_s6 + $0x4] sm:$0xe] }
  0x22   : > { %1587 = vmatpush3.bf16.msra.mxu1 %v1757_v15  ;;  %1568 = vmatprep.subr.bf16.mxu0 %v1833_v1  ;;  %v649_v8 = vor.u32 %v648_v4, %v645_v3  ;;  %v1804_v15 = vld [vmem:[%s2203_s1 + $0x1e8] sm:$0xff]   ;;  %v1823_v43 = vld [vmem:[%s2203_s1 + $0x200] sm:$0xff]  }
  0x23   : > { %1588 = vmatprep.subr.bf16.mxu1 %v1833_v1 }
  0x25   : > { %1569 = vmatpush3.bf16.msra.mxu0 %v1758_v17  ;;  %v1806_v17 = vld [vmem:[%s2203_s1 + $0x1e0] sm:$0xff]  }
  0x26   : > { %1589 = vmatpush3.bf16.msra.mxu1 %v1759_v18  ;;  %1570 = vmatprep.subr.bf16.mxu0 %v1833_v1  ;;  %v1807_v18 = vld [vmem:[%s2203_s1 + $0x198] sm:$0xff]  }
  0x27   : > { %1590 = vmatprep.subr.bf16.mxu1 %v1833_v1 }
  0x29   : > { %1571 = vmatpush3.bf16.msra.mxu0 %v1760_v21  ;;  %v960_v21 = vld [vmem:[%s1905_s6 + $0x8] sm:$0x1] }
  0x2a   : > { %1591 = vmatpush3.bf16.msra.mxu1 %v1761_v22  ;;  %1596 = vmatprep.subr.bf16.mxu0 %v1833_v1  ;;  %v1809_v22 = vld [vmem:[%s2203_s1 + $0x190] sm:$0xff]  }
  0x2b   : > { %1616 = vmatprep.subr.bf16.mxu1 %v1833_v1 }
  0x2c   : > { %1573 = vmatmul.mubr.bf16.vlgmr.msra.gmra.mxu0 %v216_v23  ;;  %v1437_v23 = vcombine.low %v959_v20, %v960_v21 }
  0x2d   : > { %1593 = vmatmul.mubr.bf16.vlgmr.msra.gmra.mxu1 %v170_v11  ;;  %1597 = vmatpush3.bf16.msra.mxu0 %v1763_v24  ;;  %v1800_v11 = vld [vmem:[%s2203_s1 + $0x1f8] sm:$0xff]   ;;  %v1810_v24 = vld [vmem:[%s2203_s1 + $0x1d0] sm:$0xff]  }
  0x2e   : > { %1617 = vmatpush3.bf16.msra.mxu1 %v1764_v25  ;;  %1598 = vmatprep.subr.bf16.mxu0 %v1833_v1  ;;  %v1811_v25 = vld [vmem:[%s2203_s1 + $0x188] sm:$0xff]  }
  0x2f   : > { %1618 = vmatprep.subr.bf16.mxu1 %v1833_v1  ;;  %1612 = vmatprep.mubr.msk.bf16.mxu0 %vm1834_vm0, %v1833_v1 }
  0x30   : > { %1632 = vmatprep.mubr.msk.bf16.mxu1 %vm1834_vm0, %v1833_v1 }
  0x31   : > { %1599 = vmatpush3.bf16.msra.mxu0 %v1765_v26  ;;  %v986_v26 = vshll.u32 %v1437_v23, 16 }
  0x32   : > { %1619 = vmatpush3.bf16.msra.mxu1 %v1766_v27  ;;  %1600 = vmatprep.subr.bf16.mxu0 %v1833_v1  ;;  %v1812_v27 = vld [vmem:[%s2203_s1 + $0x1c8] sm:$0xff]  }
  0x33   : > { %1620 = vmatprep.subr.bf16.mxu1 %v1833_v1 }
  0x35   : > { %1601 = vmatpush3.bf16.msra.mxu0 %v1767_v28  ;;  %v1813_v28 = vld [vmem:[%s2203_s1 + $0x180] sm:$0xff]  }
  0x36   : > { %1621 = vmatpush3.bf16.msra.mxu1 %v1768_v29  ;;  %1602 = vmatprep.subr.bf16.mxu0 %v1833_v1  ;;  %v984_v29 = vshrl.u32 %v1437_v23, 16 }
  0x37   : > { %1622 = vmatprep.subr.bf16.mxu1 %v1833_v1 }
  0x39   : > { %1603 = vmatpush3.bf16.msra.mxu0 %v1769_v30  ;;  %v988_v30 = vrot.slane %v986_v26, 1 }
  0x3a   : > { %1623 = vmatpush3.bf16.msra.mxu1 %v1770_v31  ;;  %1604 = vmatprep.subr.bf16.mxu0 %v1833_v1  ;;  %v1814_v31 = vld [vmem:[%s2203_s1 + $0x1c0] sm:$0xff]  }
  0x3b   : > { %1624 = vmatprep.subr.bf16.mxu1 %v1833_v1 }
  0x3d   : > { %1605 = vmatpush3.bf16.msra.mxu0 %v1771_v32  ;;  %v852_v32 = vld [vmem:[%s1905_s6 + $0x4] sm:$0xf] }
  0x3e   : > { %1625 = vmatpush3.bf16.msra.mxu1 %v1772_v33  ;;  %1606 = vmatprep.subr.bf16.mxu0 %v1833_v1  ;;  %v1815_v33 = vld [vmem:[%s2203_s1 + $0x238] sm:$0xff]  }
  0x3f   : > { %1626 = vmatprep.subr.bf16.mxu1 %v1833_v1 }
  0x41   : > { %1607 = vmatpush3.bf16.msra.mxu0 %v1773_v34  ;;  %v989_v34 = vor.u32 %v988_v30, %v984_v29 }
  0x42   : > { %1627 = vmatpush3.bf16.msra.mxu1 %v1774_v35  ;;  %1608 = vmatprep.subr.bf16.mxu0 %v1833_v1  ;;  %v1817_v35 = vld [vmem:[%s2203_s1 + $0x230] sm:$0xff]  }
  0x43   : > { %1628 = vmatprep.subr.bf16.mxu1 %v1833_v1 }
  0x45   : > { %1609 = vmatpush3.bf16.msra.mxu0 %v1775_v36  ;;  %v1818_v36 = vld [vmem:[%s2203_s1 + $0x228] sm:$0xff]  }
  0x46   : > { %1629 = vmatpush3.bf16.msra.mxu1 %v1776_v37  ;;  %1610 = vmatprep.subr.bf16.mxu0 %v1833_v1  ;;  %v1819_v37 = vld [vmem:[%s2203_s1 + $0x220] sm:$0xff]  }
  0x47   : > { %1630 = vmatprep.subr.bf16.mxu1 %v1833_v1 }
  0x49   : > { %1611 = vmatpush3.bf16.msra.mxu0 %v1777_v42  ;;  %v1462_v42 = vcombine.low %v1080_v41, %v960_v21  ;;  %v1471_v21 = vld [vmem:[%s2204_s2] ss:$0 sm:$0xff] }
  0x4a   : > { %1631 = vmatpush3.bf16.msra.mxu1 %v1778_v44  ;;  %1636 = vmatprep.subr.bf16.mxu0 %v1833_v1 }
  0x4b   : > { %1656 = vmatprep.subr.bf16.mxu1 %v1833_v1  ;;  %v1101_v44 = vrot.slane %v1462_v42, 1 }
  0x4c   : > { %1613 = vmatmul.mubr.bf16.vlgmr.msra.gmra.mxu0 %v415_v45 }
  0x4d   : > { %1637 = vmatpush3.bf16.msra.mxu0 %v1780_v46  ;;  %1633 = vmatmul.mubr.bf16.vlgmr.msra.gmra.mxu1 %v530_v47 }
  0x4e   : > { %1657 = vmatpush3.bf16.msra.mxu1 %v1783_v48  ;;  %1638 = vmatprep.subr.bf16.mxu0 %v1833_v1 }
  0x4f   : > { %1658 = vmatprep.subr.bf16.mxu1 %v1833_v1  ;;  %1652 = vmatprep.mubr.msk.bf16.mxu0 %vm1834_vm0, %v1833_v1 }
  0x50   : > { %1672 = vmatprep.mubr.msk.bf16.mxu1 %vm1834_vm0, %v1833_v1 }
  0x51   : > { %1639 = vmatpush3.bf16.msra.mxu0 %v1784_v49 }
  0x52   : > { %1659 = vmatpush3.bf16.msra.mxu1 %v1785_v50  ;;  %1640 = vmatprep.subr.bf16.mxu0 %v1833_v1 }
  0x53   : > { %1660 = vmatprep.subr.bf16.mxu1 %v1833_v1 }
  0x55   : > { %1641 = vmatpush3.bf16.msra.mxu0 %v1786_v51 }
  0x56   : > { %1661 = vmatpush3.bf16.msra.mxu1 %v1787_v52  ;;  %1642 = vmatprep.subr.bf16.mxu0 %v1833_v1 }
  0x57   : > { %1662 = vmatprep.subr.bf16.mxu1 %v1833_v1 }
  0x59   : > { %1643 = vmatpush3.bf16.msra.mxu0 %v1788_v53 }
  0x5a   : > { %1663 = vmatpush3.bf16.msra.mxu1 %v1789_v54  ;;  %1644 = vmatprep.subr.bf16.mxu0 %v1833_v1 }
  0x5b   : > { %1664 = vmatprep.subr.bf16.mxu1 %v1833_v1 }
  0x5d   : > { %1645 = vmatpush3.bf16.msra.mxu0 %v1790_v56 }
  0x5e   : > { %1665 = vmatpush3.bf16.msra.mxu1 %v1791_v57  ;;  %1646 = vmatprep.subr.bf16.mxu0 %v1833_v1 }
  0x5f   : > { %1666 = vmatprep.subr.bf16.mxu1 %v1833_v1 }
  0x61   : > { %1647 = vmatpush3.bf16.msra.mxu0 %v1792_v59 }
  0x62   : > { %1667 = vmatpush3.bf16.msra.mxu1 %v1793_v60  ;;  %1648 = vmatprep.subr.bf16.mxu0 %v1833_v1 }
  0x63   : > { %1668 = vmatprep.subr.bf16.mxu1 %v1833_v1 }
  0x65   : > { %1649 = vmatpush3.bf16.msra.mxu0 %v1794_v63 }
  0x66   : > { %1669 = vmatpush3.bf16.msra.mxu1 %v1795_v0  ;;  %1650 = vmatprep.subr.bf16.mxu0 %v1833_v1 }
  0x67   : > { %1670 = vmatprep.subr.bf16.mxu1 %v1833_v1 }
  0x69   : > { %1651 = vmatpush3.bf16.msra.mxu0 %v1796_v5 }
  0x6a   : > { %1671 = vmatpush3.bf16.msra.mxu1 %v1797_v7  ;;  %1676 = vmatprep.subr.bf16.mxu0 %v1833_v1 }
  0x6b   : > { %1696 = vmatprep.subr.bf16.mxu1 %v1833_v1 }
  0x6c   : > { %1653 = vmatmul.mubr.bf16.vlgmr.msra.gmra.mxu0 %v649_v8 }
  0x6d   : > { %1677 = vmatpush3.bf16.msra.mxu0 %v1798_v9  ;;  %1673 = vmatmul.mubr.bf16.vlgmr.msra.gmra.mxu1 %v761_v10 }
  0x6e   : > { %1697 = vmatpush3.bf16.msra.mxu1 %v1800_v11  ;;  %1678 = vmatprep.subr.bf16.mxu0 %v1833_v1 }
  0x6f   : > { %1698 = vmatprep.subr.bf16.mxu1 %v1833_v1  ;;  %1692 = vmatprep.mubr.msk.bf16.mxu0 %vm1834_vm0, %v1833_v1 }
  0x70   : > { %1712 = vmatprep.mubr.msk.bf16.mxu1 %vm1834_vm0, %v1833_v1 }
  0x71   : > { %1679 = vmatpush3.bf16.msra.mxu0 %v1801_v12 }
  0x72   : > { %1699 = vmatpush3.bf16.msra.mxu1 %v1802_v13  ;;  %1680 = vmatprep.subr.bf16.mxu0 %v1833_v1 }
  0x73   : > { %1700 = vmatprep.subr.bf16.mxu1 %v1833_v1 }
  0x75   : > { %1681 = vmatpush3.bf16.msra.mxu0 %v1803_v14 }
  0x76   : > { %1701 = vmatpush3.bf16.msra.mxu1 %v1804_v15  ;;  %1682 = vmatprep.subr.bf16.mxu0 %v1833_v1 }
  0x77   : > { %1702 = vmatprep.subr.bf16.mxu1 %v1833_v1 }
  0x79   : > { %1683 = vmatpush3.bf16.msra.mxu0 %v1805_v16 }
  0x7a   : > { %1703 = vmatpush3.bf16.msra.mxu1 %v1806_v17  ;;  %1684 = vmatprep.subr.bf16.mxu0 %v1833_v1 }
  0x7b   : > { %1704 = vmatprep.subr.bf16.mxu1 %v1833_v1 }
  0x7d   : > { %1685 = vmatpush3.bf16.msra.mxu0 %v1807_v18 }
  0x7e   : > { %1705 = vmatpush3.bf16.msra.mxu1 %v1808_v19  ;;  %1686 = vmatprep.subr.bf16.mxu0 %v1833_v1 }
  0x7f   : > { %1706 = vmatprep.subr.bf16.mxu1 %v1833_v1 }
  0x81   : > { %1687 = vmatpush3.bf16.msra.mxu0 %v1809_v22 }
  0x82   : > { %1707 = vmatpush3.bf16.msra.mxu1 %v1810_v24  ;;  %1688 = vmatprep.subr.bf16.mxu0 %v1833_v1 }
  0x83   : > { %1708 = vmatprep.subr.bf16.mxu1 %v1833_v1 }
  0x85   : > { %1689 = vmatpush3.bf16.msra.mxu0 %v1811_v25 }
  0x86   : > { %1709 = vmatpush3.bf16.msra.mxu1 %v1812_v27  ;;  %1690 = vmatprep.subr.bf16.mxu0 %v1833_v1 }
  0x87   : > { %1710 = vmatprep.subr.bf16.mxu1 %v1833_v1 }
  0x89   : > { %1691 = vmatpush3.bf16.msra.mxu0 %v1813_v28 }
  0x8a   : > { %1711 = vmatpush3.bf16.msra.mxu1 %v1814_v31  ;;  %1716 = vmatprep.subr.bf16.mxu0 %v1833_v1 }
  0x8c   : > { %1693 = vmatmul.mubr.bf16.vlgmr.msra.gmra.mxu0 %v852_v32 }
  0x8d   : > { %1717 = vmatpush3.bf16.msra.mxu0 %v1815_v33  ;;  %1713 = vmatmul.mubr.bf16.vlgmr.msra.gmra.mxu1 %v989_v34 }
  0x8e   : > { %1718 = vmatprep.subr.bf16.mxu0 %v1833_v1  ;;  %1732 = vmatprep.mubr.msk.bf16.mxu0 %vm1834_vm0, %v1833_v1 }
  0x91   : > { %1719 = vmatpush3.bf16.msra.mxu0 %v1817_v35 }
  0x92   : > { %1720 = vmatprep.subr.bf16.mxu0 %v1833_v1 }
  0x95   : > { %1721 = vmatpush3.bf16.msra.mxu0 %v1818_v36 }
  0x96   : > { %1722 = vmatprep.subr.bf16.mxu0 %v1833_v1 }
  0x99   : > { %1723 = vmatpush3.bf16.msra.mxu0 %v1819_v37 }
  0x9a   : > { %1724 = vmatprep.subr.bf16.mxu0 %v1833_v1 }
  0x9d   : > { %1725 = vmatpush3.bf16.msra.mxu0 %v1820_v38 }
  0x9e   : > { %1726 = vmatprep.subr.bf16.mxu0 %v1833_v1 }
  0xa1   : > { %1727 = vmatpush3.bf16.msra.mxu0 %v1821_v39 }
  0xa2   : > { %1728 = vmatprep.subr.bf16.mxu0 %v1833_v1 }
  0xa5   : > { %1729 = vmatpush3.bf16.msra.mxu0 %v1822_v40 }
  0xa6   : > { %1730 = vmatprep.subr.bf16.mxu0 %v1833_v1 }
  0xa9   : > { %1731 = vmatpush3.bf16.msra.mxu0 %v1823_v43 }
  0xac   : > { %1733 = vmatmul.mubr.bf16.vlgmr.msra.gmra.mxu0 %v1101_v44 }
  0xec   : > { %v300_v45 = vpop.f32.mrf.mxu0 }
  0xed   : > { %v388_v46 = vpop.f32.mrf.mxu1 }
  0xee   : > { %v389_v47 = vadd.f32 %v388_v46, %v300_v45  ;;  %v1574_v48 = vpop.f32.mrf.mxu0 }
  0xef   : > { %v1594_v49 = vpop.f32.mrf.mxu1 }
  0xf0   : > { %v303_v50 = vpop.f32.mrf.mxu0 }
  0xf1   : > { %v391_v51 = vpop.f32.mrf.mxu1 }
  0xf2   : > { %v1575_v52 = vpop.f32.mrf.mxu0 }
  0xf3   : > { %v1595_v53 = vpop.f32.mrf.mxu1 }
 0x10c   : > { %v499_v54 = vpop.f32.mrf.mxu0 }
 0x10d   : > { %v505_v55 = vadd.f32 %v499_v54, %v389_v47  ;;  %v614_v56 = vpop.f32.mrf.mxu1 }
 0x10e   : > { %v1614_v57 = vpop.f32.mrf.mxu0 }
 0x10f   : > { %v620_v58 = vadd.f32 %v614_v56, %v505_v55  ;;  %v1634_v59 = vpop.f32.mrf.mxu1 }
 0x110   : > { %v502_v60 = vpop.f32.mrf.mxu0 }
 0x111   : > { %v617_v1 = vpop.f32.mrf.mxu1 }
 0x112   : > { %v1615_v61 = vpop.f32.mrf.mxu0 }
 0x113   : > { %v1635_v62 = vpop.f32.mrf.mxu1 }
 0x12c   : > { %v733_v63 = vpop.f32.mrf.mxu0 }
 0x12d   : > { %v845_v0 = vpop.f32.mrf.mxu1  ;;  %v739_v16 = vadd.f32 %v733_v63, %v620_v58 }
 0x12e   : > { %v1654_v2 = vpop.f32.mrf.mxu0 }
 0x12f   : > { %v1674_v3 = vpop.f32.mrf.mxu1  ;;  %v851_v17 = vadd.f32 %v845_v0, %v739_v16 }
 0x130   : > { %v736_v4 = vpop.f32.mrf.mxu0 }
 0x131   : > { %v848_v5 = vpop.f32.mrf.mxu1 }
 0x132   : > { %v1655_v6 = vpop.f32.mrf.mxu0 }
 0x133   : > { %v1675_v7 = vpop.f32.mrf.mxu1 }
 0x14c   : > { %v952_v8 = vpop.f32.mrf.mxu0 }
 0x14d   : > { %v1073_v9 = vpop.f32.mrf.mxu1  ;;  %v958_v18 = vadd.f32 %v952_v8, %v851_v17 }
 0x14e   : > { %v1694_v10 = vpop.f32.mrf.mxu0 }
 0x14f   : > { %v1714_v11 = vpop.f32.mrf.mxu1  ;;  %v1079_v19 = vadd.f32 %v1073_v9, %v958_v18 }
 0x150   : > { %v955_v12 = vpop.f32.mrf.mxu0 }
 0x151   : > { %v1076_v13 = vpop.f32.mrf.mxu1 }
 0x152   : > { %v1695_v14 = vpop.f32.mrf.mxu0 }
 0x153   : > { %v1715_v15 = vpop.f32.mrf.mxu1 }
 0x16c   : > { %v1185_v20 = vpop.f32.mrf.mxu0 }
 0x16d   : > { %v1191_v22 = vadd.f32 %v1185_v20, %v1079_v19 }
 0x16e   : > { %v1734_v23 = vpop.f32.mrf.mxu0 }
 0x16f   : > { %v1199_v24 = vadd.f32 %v1471_v21, %v1191_v22 }
 0x170   : > { %v1188_v25 = vpop.f32.mrf.mxu0 }
 0x171   : > { %v1200_v26 = vmax.f32 %v1199_v24, 0.0 }
 0x172   : > { %v1735_v27 = vpop.f32.mrf.mxu0 }
 0x173   : > { %v1201_v28 = vpack.c.bf16 %v1200_v26, %v1200_v26 }
 0x175   : > { %1202 = vst [vmem:[%s168_s21] sm:$0xf] %v1201_v28 }
 0x176 PF: > { %s13_s12 = sadd.s32 1, %s1831_s12  }
 0x177   : > { %p10_p4 = scmp.ge.s32.totalorder %s13_s12, 10  }
 0x179   :  { %12 = sbr.rel (!%p10_p4) target bundleno = 1 (0x1), region = 70 }

// kernel: feature_extractor_forward.84
= control target key start
LH: loop header
LB: loop body
LE: loop exit
PB: predicated region body
PF: predicated region fallthrough
CT: control target
= control target key end

     0   :  { %v182_v0 = vmov 0.0   ;;  %vm183_vm0 = vmmov 0   ;;  %s237_s1 = inlined_call_operand.vmem [shape: bf16[128,128], index: 1, kind: input, shape index: {}]   ;;  %s238_s0 = inlined_call_operand.vmem [shape: bf16[8,128], index: 0, kind: input, shape index: {}]   ;;  %s239_s2 = inlined_call_operand.vmem [shape: f32[1,128], index: 2, kind: input, shape index: {}]   ;;  %s240_s3 = inlined_call_operand.vmem [shape: bf16[8,128], index: 3, kind: output, shape index: {}]  }
   0x1   :  { %152 = vmatprep.subr.bf16.mxu0 %v182_v0  ;;  %v174_v1 = vld [vmem:[%s237_s1 + $0x38] sm:$0xff]   ;;  %168 = vmatprep.mubr.msk.bf16.mxu0 %vm183_vm0, %v182_v0  ;;  %v175_v2 = vld [vmem:[%s237_s1 + $0x30] sm:$0xff]   ;;  %v176_v3 = vld [vmem:[%s237_s1 + $0x28] sm:$0xff]  }
   0x2   :  { %153 = vmatpush3.bf16.msra.mxu0 %v174_v1  ;;  %v177_v4 = vld [vmem:[%s237_s1 + $0x20] sm:$0xff]   ;;  %v178_v5 = vld [vmem:[%s237_s1 + $0x18] sm:$0xff]   ;;  %v179_v6 = vld [vmem:[%s237_s1 + $0x10] sm:$0xff]  }
   0x3   :  { %154 = vmatprep.subr.bf16.mxu0 %v182_v0  ;;  %v180_v7 = vld [vmem:[%s237_s1 + $0x8] sm:$0xff]   ;;  %v181_v8 = vld [vmem:[%s237_s1] sm:$0xff]  }
   0x4   :  { %v15_v9 = vld [vmem:[%s238_s0] sm:$0xf] }
   0x5   :  { %v134_v10 = vld [vmem:[%s239_s2] ss:$0 sm:$0xff] }
   0x6   :  { %155 = vmatpush3.bf16.msra.mxu0 %v175_v2 }
   0x7   :  { %156 = vmatprep.subr.bf16.mxu0 %v182_v0 }
   0xa   :  { %157 = vmatpush3.bf16.msra.mxu0 %v176_v3 }
   0xb   :  { %158 = vmatprep.subr.bf16.mxu0 %v182_v0 }
   0xe   :  { %159 = vmatpush3.bf16.msra.mxu0 %v177_v4 }
   0xf   :  { %160 = vmatprep.subr.bf16.mxu0 %v182_v0 }
  0x12   :  { %161 = vmatpush3.bf16.msra.mxu0 %v178_v5 }
  0x13   :  { %162 = vmatprep.subr.bf16.mxu0 %v182_v0 }
  0x16   :  { %163 = vmatpush3.bf16.msra.mxu0 %v179_v6 }
  0x17   :  { %164 = vmatprep.subr.bf16.mxu0 %v182_v0 }
  0x1a   :  { %165 = vmatpush3.bf16.msra.mxu0 %v180_v7 }
  0x1b   :  { %166 = vmatprep.subr.bf16.mxu0 %v182_v0 }
  0x1e   :  { %167 = vmatpush3.bf16.msra.mxu0 %v181_v8 }
  0x21   :  { %169 = vmatmul.mubr.bf16.vlgmr.msra.gmra.mxu0 %v15_v9 }
  0xe1   :  { %v121_v11 = vpop.f32.mrf.mxu0 }
  0xe2   :  { %v122_v12 = vadd.f32 %v134_v10, %v121_v11 }
  0xe3   :  { %v170_v13 = vpop.f32.mrf.mxu0 }
  0xe4   :  { %v127_v14 = vmax.f32 %v122_v12, 0.0 }
  0xe5   :  { %v124_v15 = vpop.f32.mrf.mxu0 }
  0xe6   :  { %v128_v16 = vpack.c.bf16 %v127_v14, %v127_v14 }
  0xe7   :  { %v171_v17 = vpop.f32.mrf.mxu0 }
  0xe8   :  { %129 = vst [vmem:[%s240_s3] sm:$0xf] %v128_v16 }

// kernel: feature_extractor_forward.99
= control target key start
LH: loop header
LB: loop body
LE: loop exit
PB: predicated region body
PF: predicated region fallthrough
CT: control target
= control target key end

     0   :  { %s710_s12 = smov 0   ;;  %s712_s13 = smov 0   ;;  %s800_s0 = inlined_call_operand.vmem [shape: bf16[8,128], index: 0, kind: input, shape index: {}]   ;;  %s801_s1 = inlined_call_operand.vmem [shape: bf16[128,256], index: 1, kind: input, shape index: {}]   ;;  %s802_s2 = inlined_call_operand.vmem [shape: f32[1,256], index: 2, kind: input, shape index: {}]   ;;  %s803_s3 = inlined_call_operand.vmem [shape: bf16[8,256], index: 3, kind: output, shape index: {}]  }
   0x1   :  { %s714_s14 = smov 0   ;;  %s716_s15 = smov 0  }
   0x2   :  { %s718_s16 = smov 0  }
   0x3 LB: > { %s22_s17 = sadd.s32 1, %s682_s15  ;;  %p65_p1 = scmp.ne.s32.totalorder %s674_s13, %s670_s12  ;;  %s686_s16 = sphi %s718_s16, %s13_s16   ;;  %s682_s15 = sphi %s716_s15, %s807_s15   ;;  %s678_s14 = sphi %s714_s14, %s806_s14   ;;  %s674_s13 = sphi %s712_s13, %s805_s13   ;;  %s670_s12 = sphi %s710_s12, %s804_s12  }
   0x4   : > { %p23_p0 = scmp.ge.s32.totalorder %s22_s17, 2  ;;  %p66_p2 = scmp.eq.s32.totalorder %s686_s16, 0 }
   0x5   : > { %s58_s19 = sadd.s32 1, %s674_s13  ;;  %p552_p5 = scmp.ge.s32.totalorder %s686_s16, 2 }
   0x6   : > { %s809_s17 = smov (%p23_p0, %s22_s17), 0  ;;  %p67_p3 = por %p66_p2, %p65_p1 }
   0x7   : > { %s55_s18 = ssub.s32 %s682_s15, %s809_s17  ;;  %152 = sbr.rel (%p552_p5) target bundleno = 26 (0x1a), region = 20 }
   0x8   : > { %p56_p4 = scmp.eq.s32.totalorder %s55_s18, 0 }
   0xa   : > { %s745_s20 = scalar_select %p56_p4, %s674_s13, %s58_s19  }
   0xc   : > { %155 = sbr.rel (!%p67_p3) target bundleno = 26 (0x1a), region = 24  ;;  %s157_s21 = sand.u32 (%p67_p3), 1, %s674_s13  }
   0xd   : > { %s554_s22 = sshll.u32 (%p67_p3), %s682_s15, 2  ;;  %s553_s23 = sshll.u32 (%p67_p3), %s157_s21, 6 }
   0xe   : > { %s753_s26 = scalar_lea.vmem (%p67_p3), %s801_s1, %s554_s22  ;;  %s159_s27 = scalar_lea.vmem (%p67_p3), [#allocation2], %s553_s23 }
   0xf   : > { %v178_v0 = vld [vmem:[%s753_s26] sm:$0xf] (%p67_p3)  ;;  %v180_v1 = vld [vmem:[%s753_s26 + $0x8] sm:$0xf] (%p67_p3)  ;;  %v182_v2 = vld [vmem:[%s753_s26 + $0x10] sm:$0xf] (%p67_p3) }
  0x10   : > { %179 = vst [vmem:[%s159_s27] sm:$0xf] (%p67_p3), %v178_v0  ;;  %181 = vst [vmem:[%s159_s27 + $0x4] sm:$0xf] (%p67_p3), %v180_v1  ;;  %v184_v3 = vld [vmem:[%s753_s26 + $0x18] sm:$0xf] (%p67_p3) }
  0x11   : > { %v186_v4 = vld [vmem:[%s753_s26 + $0x20] sm:$0xf]  ;;  %183 = vst [vmem:[%s159_s27 + $0x8] sm:$0xf] %v182_v2  ;;  %185 = vst [vmem:[%s159_s27 + $0xc] sm:$0xf] %v184_v3 }
  0x12   : > { %187 = vst [vmem:[%s159_s27 + $0x10] sm:$0xf] %v186_v4  ;;  %v188_v5 = vld [vmem:[%s753_s26 + $0x28] sm:$0xf]  ;;  %v190_v6 = vld [vmem:[%s753_s26 + $0x30] sm:$0xf] }
  0x13   : > { %v192_v7 = vld [vmem:[%s753_s26 + $0x38] sm:$0xf]  ;;  %189 = vst [vmem:[%s159_s27 + $0x14] sm:$0xf] %v188_v5  ;;  %191 = vst [vmem:[%s159_s27 + $0x18] sm:$0xf] %v190_v6 }
  0x14   : > { %193 = vst [vmem:[%s159_s27 + $0x1c] sm:$0xf] %v192_v7  ;;  %v194_v8 = vld [vmem:[%s753_s26 + $0x40] sm:$0xf]  ;;  %v196_v9 = vld [vmem:[%s753_s26 + $0x48] sm:$0xf] }
  0x15   : > { %v198_v10 = vld [vmem:[%s753_s26 + $0x50] sm:$0xf]  ;;  %195 = vst [vmem:[%s159_s27 + $0x20] sm:$0xf] %v194_v8  ;;  %197 = vst [vmem:[%s159_s27 + $0x24] sm:$0xf] %v196_v9 }
  0x16   : > { %199 = vst [vmem:[%s159_s27 + $0x28] sm:$0xf] %v198_v10  ;;  %v200_v11 = vld [vmem:[%s753_s26 + $0x58] sm:$0xf]  ;;  %v202_v12 = vld [vmem:[%s753_s26 + $0x60] sm:$0xf] }
  0x17   : > { %v204_v13 = vld [vmem:[%s753_s26 + $0x68] sm:$0xf]  ;;  %201 = vst [vmem:[%s159_s27 + $0x2c] sm:$0xf] %v200_v11  ;;  %203 = vst [vmem:[%s159_s27 + $0x30] sm:$0xf] %v202_v12 }
  0x18   : > { %205 = vst [vmem:[%s159_s27 + $0x34] sm:$0xf] %v204_v13  ;;  %v206_v14 = vld [vmem:[%s753_s26 + $0x70] sm:$0xf]  ;;  %v208_v15 = vld [vmem:[%s753_s26 + $0x78] sm:$0xf] }
  0x19   : > { %207 = vst [vmem:[%s159_s27 + $0x38] sm:$0xf] %v206_v14  ;;  %209 = vst [vmem:[%s159_s27 + $0x3c] sm:$0xf] %v208_v15 }
  0x1a PF: > { %p555_p6 = scmp.ge.s32.totalorder %s686_s16, 1  ;;  %p270_p7 = scmp.lt.s32.totalorder %s686_s16, 3 }
  0x1c   : > { %p271_p8 = pnand %p555_p6, %p270_p7 }
  0x1d   : > { %s277_s28 = sand.u32 (!%p271_p8), 1, %s670_s12   ;;  %p314_p9 = scmp.lt.s32.totalorder (!%p271_p8), %s678_s14, 1 }
  0x1e   : > { %274 = sbr.rel (%p271_p8) target bundleno = 267 (0x10b), region = 69  ;;  %s556_s29 = sshll.u32 (!%p271_p8), %s277_s28, 6 }
  0x1f   : > { %s279_s30 = scalar_lea.vmem (!%p271_p8), [#allocation2], %s556_s29 }
  0x23   : > { %v688_v16 = vmov 0.0   ;;  %vm689_vm0 = vmmov 0   ;;  %v640_v17 = vld [vmem:[%s279_s30 + $0x38] sm:$0xff]   ;;  %v641_v18 = vld [vmem:[%s279_s30 + $0x30] sm:$0xff]   ;;  %v642_v19 = vld [vmem:[%s279_s30 + $0x28] sm:$0xff]   ;;  %s811_s14 = smov (!%p314_p9, %s678_s14), 1 }
  0x24   : > { %578 = vmatprep.subr.bf16.mxu0 %v688_v16  ;;  %594 = vmatprep.mubr.msk.bf16.mxu0 %vm689_vm0, %v688_v16  ;;  %v643_v20 = vld [vmem:[%s279_s30 + $0x20] sm:$0xff]   ;;  %v644_v21 = vld [vmem:[%s279_s30 + $0x18] sm:$0xff]   ;;  %v645_v22 = vld [vmem:[%s279_s30 + $0x10] sm:$0xff]   ;;  %s316_s8 = scalar_lea.vmem %s802_s2, %s811_s14  ;;  %s557_s9 = sshll.u32 %s811_s14, 2 }
  0x25   : > { %579 = vmatpush3.bf16.msra.mxu0 %v640_v17  ;;  %v646_v23 = vld [vmem:[%s279_s30 + $0x8] sm:$0xff]   ;;  %v647_v24 = vld [vmem:[%s279_s30] sm:$0xff]   ;;  %s324_s12 = scalar_lea.vmem %s803_s3, %s557_s9 }
  0x26   : > { %580 = vmatprep.subr.bf16.mxu0 %v688_v16  ;;  %v326_v25 = vld [vmem:[%s800_s0] sm:$0xf] }
  0x27   : > { %v558_v26 = vld [vmem:[%s316_s8] ss:$0 sm:$0xff] }
  0x29   : > { %581 = vmatpush3.bf16.msra.mxu0 %v641_v18 }
  0x2a   : > { %582 = vmatprep.subr.bf16.mxu0 %v688_v16 }
  0x2d   : > { %583 = vmatpush3.bf16.msra.mxu0 %v642_v19 }
  0x2e   : > { %584 = vmatprep.subr.bf16.mxu0 %v688_v16 }
  0x31   : > { %585 = vmatpush3.bf16.msra.mxu0 %v643_v20 }
  0x32   : > { %586 = vmatprep.subr.bf16.mxu0 %v688_v16 }
  0x35   : > { %587 = vmatpush3.bf16.msra.mxu0 %v644_v21 }
  0x36   : > { %588 = vmatprep.subr.bf16.mxu0 %v688_v16 }
  0x39   : > { %589 = vmatpush3.bf16.msra.mxu0 %v645_v22 }
  0x3a   : > { %590 = vmatprep.subr.bf16.mxu0 %v688_v16 }
  0x3d   : > { %591 = vmatpush3.bf16.msra.mxu0 %v646_v23 }
  0x3e   : > { %592 = vmatprep.subr.bf16.mxu0 %v688_v16 }
  0x41   : > { %593 = vmatpush3.bf16.msra.mxu0 %v647_v24 }
  0x44   : > { %595 = vmatmul.mubr.bf16.vlgmr.msra.gmra.mxu0 %v326_v25 }
 0x104   : > { %v432_v27 = vpop.f32.mrf.mxu0 }
 0x105   : > { %v433_v28 = vadd.f32 %v558_v26, %v432_v27 }
 0x106   : > { %v596_v29 = vpop.f32.mrf.mxu0 }
 0x107   : > { %v438_v30 = vpack.c.bf16 %v433_v28, %v433_v28 }
 0x108   : > { %v435_v31 = vpop.f32.mrf.mxu0 }
 0x109   : > { %439 = vst [vmem:[%s324_s12] sm:$0xf] %v438_v30 }
 0x10a   : > { %v597_v32 = vpop.f32.mrf.mxu0 }
 0x10b PF: > { %s13_s16 = sadd.s32 1, %s686_s16   ;;  %s804_s12 = smov %s674_s13 }
 0x10c   : > { %p10_p10 = scmp.ge.s32.totalorder %s13_s16, 4   ;;  %s805_s13 = smov %s745_s20 }
 0x10d   : > { %s806_s14 = smov %s682_s15  ;;  %s807_s15 = smov %s809_s17 }
 0x10e   :  { %12 = sbr.rel (!%p10_p10) target bundleno = 3 (0x3), region = 114 }

// kernel: feature_extractor_forward.102
= control target key start
LH: loop header
LB: loop body
LE: loop exit
PB: predicated region body
PF: predicated region fallthrough
CT: control target
= control target key end

     0   :  { %s796_s15 = smov 0   ;;  %s798_s16 = smov 0   ;;  %s889_s0 = inlined_call_operand.vmem [shape: bf16[8,128], index: 0, kind: input, shape index: {}]   ;;  %s890_s1 = inlined_call_operand.vmem [shape: bf16[128,256], index: 1, kind: input, shape index: {}]   ;;  %s891_s2 = inlined_call_operand.vmem [shape: f32[1,256], index: 2, kind: input, shape index: {}]   ;;  %s892_s3 = inlined_call_operand.vmem [shape: bf16[8,256], index: 3, kind: input, shape index: {}]   ;;  %s893_s4 = inlined_call_operand.vmem [shape: bf16[8,256], index: 4, kind: output, shape index: {}]  }
   0x1   :  { %s800_s17 = smov 0   ;;  %s802_s18 = smov 0  }
   0x2   :  { %s804_s19 = smov 0  }
   0x3 LB: > { %s23_s20 = sadd.s32 1, %s763_s18  ;;  %p66_p1 = scmp.ne.s32.totalorder %s755_s16, %s751_s15  ;;  %s767_s19 = sphi %s804_s19, %s14_s19   ;;  %s763_s18 = sphi %s802_s18, %s897_s18   ;;  %s759_s17 = sphi %s800_s17, %s896_s17   ;;  %s755_s16 = sphi %s798_s16, %s895_s16   ;;  %s751_s15 = sphi %s796_s15, %s894_s15  }
   0x4   : > { %p24_p0 = scmp.ge.s32.totalorder %s23_s20, 2  ;;  %p67_p2 = scmp.eq.s32.totalorder %s767_s19, 0 }
   0x5   : > { %s59_s22 = sadd.s32 1, %s755_s16  ;;  %p632_p5 = scmp.ge.s32.totalorder %s767_s19, 2 }
   0x6   : > { %s899_s20 = smov (%p24_p0, %s23_s20), 0  ;;  %p68_p3 = por %p67_p2, %p66_p1 }
   0x7   : > { %s56_s21 = ssub.s32 %s763_s18, %s899_s20  ;;  %181 = sbr.rel (%p632_p5) target bundleno = 26 (0x1a), region = 20 }
   0x8   : > { %p57_p4 = scmp.eq.s32.totalorder %s56_s21, 0 }
   0xa   : > { %s831_s23 = scalar_select %p57_p4, %s755_s16, %s59_s22  }
   0xc   : > { %184 = sbr.rel (!%p68_p3) target bundleno = 26 (0x1a), region = 24  ;;  %s186_s24 = sand.u32 (%p68_p3), 1, %s755_s16  }
   0xd   : > { %s634_s25 = sshll.u32 (%p68_p3), %s763_s18, 2  ;;  %s633_s26 = sshll.u32 (%p68_p3), %s186_s24, 6 }
   0xe   : > { %s839_s29 = scalar_lea.vmem (%p68_p3), %s890_s1, %s634_s25  ;;  %s188_s30 = scalar_lea.vmem (%p68_p3), [#allocation2], %s633_s26 }
   0xf   : > { %v207_v0 = vld [vmem:[%s839_s29] sm:$0xf] (%p68_p3)  ;;  %v209_v1 = vld [vmem:[%s839_s29 + $0x8] sm:$0xf] (%p68_p3)  ;;  %v211_v2 = vld [vmem:[%s839_s29 + $0x10] sm:$0xf] (%p68_p3) }
  0x10   : > { %208 = vst [vmem:[%s188_s30] sm:$0xf] (%p68_p3), %v207_v0  ;;  %210 = vst [vmem:[%s188_s30 + $0x4] sm:$0xf] (%p68_p3), %v209_v1  ;;  %v213_v3 = vld [vmem:[%s839_s29 + $0x18] sm:$0xf] (%p68_p3) }
  0x11   : > { %v215_v4 = vld [vmem:[%s839_s29 + $0x20] sm:$0xf]  ;;  %212 = vst [vmem:[%s188_s30 + $0x8] sm:$0xf] %v211_v2  ;;  %214 = vst [vmem:[%s188_s30 + $0xc] sm:$0xf] %v213_v3 }
  0x12   : > { %216 = vst [vmem:[%s188_s30 + $0x10] sm:$0xf] %v215_v4  ;;  %v217_v5 = vld [vmem:[%s839_s29 + $0x28] sm:$0xf]  ;;  %v219_v6 = vld [vmem:[%s839_s29 + $0x30] sm:$0xf] }
  0x13   : > { %v221_v7 = vld [vmem:[%s839_s29 + $0x38] sm:$0xf]  ;;  %218 = vst [vmem:[%s188_s30 + $0x14] sm:$0xf] %v217_v5  ;;  %220 = vst [vmem:[%s188_s30 + $0x18] sm:$0xf] %v219_v6 }
  0x14   : > { %222 = vst [vmem:[%s188_s30 + $0x1c] sm:$0xf] %v221_v7  ;;  %v223_v8 = vld [vmem:[%s839_s29 + $0x40] sm:$0xf]  ;;  %v225_v9 = vld [vmem:[%s839_s29 + $0x48] sm:$0xf] }
  0x15   : > { %v227_v10 = vld [vmem:[%s839_s29 + $0x50] sm:$0xf]  ;;  %224 = vst [vmem:[%s188_s30 + $0x20] sm:$0xf] %v223_v8  ;;  %226 = vst [vmem:[%s188_s30 + $0x24] sm:$0xf] %v225_v9 }
  0x16   : > { %228 = vst [vmem:[%s188_s30 + $0x28] sm:$0xf] %v227_v10  ;;  %v229_v11 = vld [vmem:[%s839_s29 + $0x58] sm:$0xf]  ;;  %v231_v12 = vld [vmem:[%s839_s29 + $0x60] sm:$0xf] }
  0x17   : > { %v233_v13 = vld [vmem:[%s839_s29 + $0x68] sm:$0xf]  ;;  %230 = vst [vmem:[%s188_s30 + $0x2c] sm:$0xf] %v229_v11  ;;  %232 = vst [vmem:[%s188_s30 + $0x30] sm:$0xf] %v231_v12 }
  0x18   : > { %234 = vst [vmem:[%s188_s30 + $0x34] sm:$0xf] %v233_v13  ;;  %v235_v14 = vld [vmem:[%s839_s29 + $0x70] sm:$0xf]  ;;  %v237_v15 = vld [vmem:[%s839_s29 + $0x78] sm:$0xf] }
  0x19   : > { %236 = vst [vmem:[%s188_s30 + $0x38] sm:$0xf] %v235_v14  ;;  %238 = vst [vmem:[%s188_s30 + $0x3c] sm:$0xf] %v237_v15 }
  0x1a PF: > { %p635_p6 = scmp.ge.s32.totalorder %s767_s19, 1  ;;  %p310_p7 = scmp.lt.s32.totalorder %s767_s19, 3 }
  0x1c   : > { %p311_p8 = pnand %p635_p6, %p310_p7 }
  0x1d   : > { %s317_s5 = sand.u32 (!%p311_p8), 1, %s751_s15   ;;  %p364_p9 = scmp.lt.s32.totalorder (!%p311_p8), %s759_s17, 1 }
  0x1e   : > { %314 = sbr.rel (%p311_p8) target bundleno = 270 (0x10e), region = 73  ;;  %s636_s6 = sshll.u32 (!%p311_p8), %s317_s5, 6 }
  0x1f   : > { %s319_s7 = scalar_lea.vmem (!%p311_p8), [#allocation2], %s636_s6 }
  0x23   : > { %v769_v16 = vmov 0.0   ;;  %vm770_vm0 = vmmov 0   ;;  %v721_v17 = vld [vmem:[%s319_s7 + $0x38] sm:$0xff]   ;;  %v722_v18 = vld [vmem:[%s319_s7 + $0x30] sm:$0xff]   ;;  %v723_v19 = vld [vmem:[%s319_s7 + $0x28] sm:$0xff]   ;;  %s901_s17 = smov (!%p364_p9, %s759_s17), 1 }
  0x24   : > { %659 = vmatprep.subr.bf16.mxu0 %v769_v16  ;;  %675 = vmatprep.mubr.msk.bf16.mxu0 %vm770_vm0, %v769_v16  ;;  %v724_v20 = vld [vmem:[%s319_s7 + $0x20] sm:$0xff]   ;;  %v725_v21 = vld [vmem:[%s319_s7 + $0x18] sm:$0xff]   ;;  %v726_v22 = vld [vmem:[%s319_s7 + $0x10] sm:$0xff]   ;;  %s637_s10 = sshll.u32 %s901_s17, 2  ;;  %s366_s21 = scalar_lea.vmem %s891_s2, %s901_s17 }
  0x25   : > { %660 = vmatpush3.bf16.msra.mxu0 %v721_v17  ;;  %v727_v23 = vld [vmem:[%s319_s7 + $0x8] sm:$0xff]   ;;  %v728_v24 = vld [vmem:[%s319_s7] sm:$0xff]   ;;  %s374_s13 = scalar_lea.vmem %s892_s3, %s637_s10  ;;  %s382_s25 = scalar_lea.vmem %s893_s4, %s637_s10 }
  0x26   : > { %661 = vmatprep.subr.bf16.mxu0 %v769_v16  ;;  %v384_v25 = vld [vmem:[%s889_s0] sm:$0xf] }
  0x27   : > { %v496_v26 = vld [vmem:[%s374_s13] sm:$0xf] }
  0x28   : > { %v639_v27 = vld [vmem:[%s366_s21] ss:$0 sm:$0xff]  ;;  %v497_v28 = vunpack.c.l.bf16 %v496_v26 }
  0x29   : > { %662 = vmatpush3.bf16.msra.mxu0 %v722_v18 }
  0x2a   : > { %663 = vmatprep.subr.bf16.mxu0 %v769_v16 }
  0x2d   : > { %664 = vmatpush3.bf16.msra.mxu0 %v723_v19 }
  0x2e   : > { %665 = vmatprep.subr.bf16.mxu0 %v769_v16 }
  0x31   : > { %666 = vmatpush3.bf16.msra.mxu0 %v724_v20 }
  0x32   : > { %667 = vmatprep.subr.bf16.mxu0 %v769_v16 }
  0x35   : > { %668 = vmatpush3.bf16.msra.mxu0 %v725_v21 }
  0x36   : > { %669 = vmatprep.subr.bf16.mxu0 %v769_v16 }
  0x39   : > { %670 = vmatpush3.bf16.msra.mxu0 %v726_v22 }
  0x3a   : > { %671 = vmatprep.subr.bf16.mxu0 %v769_v16 }
  0x3d   : > { %672 = vmatpush3.bf16.msra.mxu0 %v727_v23 }
  0x3e   : > { %673 = vmatprep.subr.bf16.mxu0 %v769_v16 }
  0x41   : > { %674 = vmatpush3.bf16.msra.mxu0 %v728_v24 }
  0x44   : > { %676 = vmatmul.mubr.bf16.vlgmr.msra.gmra.mxu0 %v384_v25 }
 0x104   : > { %v490_v29 = vpop.f32.mrf.mxu0 }
 0x105   : > { %v491_v30 = vadd.f32 %v639_v27, %v490_v29 }
 0x106   : > { %v677_v31 = vpop.f32.mrf.mxu0 }
 0x107   : > { %v498_v32 = vadd.f32 %v497_v28, %v491_v30 }
 0x108   : > { %v493_v33 = vpop.f32.mrf.mxu0 }
 0x109   : > { %v499_v34 = vmax.f32 %v498_v32, 0.0 }
 0x10a   : > { %v678_v35 = vpop.f32.mrf.mxu0 }
 0x10b   : > { %v500_v36 = vpack.c.bf16 %v499_v34, %v499_v34 }
 0x10d   : > { %501 = vst [vmem:[%s382_s25] sm:$0xf] %v500_v36 }
 0x10e PF: > { %s14_s19 = sadd.s32 1, %s767_s19   ;;  %s894_s15 = smov %s755_s16 }
 0x10f   : > { %p11_p10 = scmp.ge.s32.totalorder %s14_s19, 4   ;;  %s895_s16 = smov %s831_s23 }
 0x110   : > { %s896_s17 = smov %s763_s18  ;;  %s897_s18 = smov %s899_s20 }
 0x111   :  { %13 = sbr.rel (!%p11_p10) target bundleno = 3 (0x3), region = 121 }

// kernel: feature_extractor_forward.103
= control target key start
LH: loop header
LB: loop body
LE: loop exit
PB: predicated region body
PF: predicated region fallthrough
CT: control target
= control target key end

     0   :  { %s341_s1 = inlined_call_operand.vmem [shape: bf16[256,128], index: 1, kind: input, shape index: {}]   ;;  %s342_s0 = inlined_call_operand.vmem [shape: bf16[8,256], index: 0, kind: input, shape index: {}]   ;;  %s343_s2 = inlined_call_operand.vmem [shape: f32[1,128], index: 2, kind: input, shape index: {}]   ;;  %s344_s3 = inlined_call_operand.vmem [shape: bf16[8,128], index: 3, kind: output, shape index: {}]  }
   0x1   :  { %v246_v0 = vld [vmem:[%s341_s1 + $0x78] sm:$0xff]   ;;  %v248_v2 = vld [vmem:[%s341_s1 + $0x70] sm:$0xff]   ;;  %v250_v4 = vld [vmem:[%s341_s1 + $0x68] sm:$0xff]  }
   0x2   :  { %v247_v1 = vld [vmem:[%s341_s1 + $0x38] sm:$0xff]   ;;  %224 = vmatprep.subr.bf16.mxu0 %v246_v0  ;;  %v249_v3 = vld [vmem:[%s341_s1 + $0x30] sm:$0xff]   ;;  %v251_v5 = vld [vmem:[%s341_s1 + $0x28] sm:$0xff]  }
   0x3   :  { %225 = vmatpush3.bf16.msra.mxu0 %v247_v1  ;;  %v252_v6 = vld [vmem:[%s341_s1 + $0x60] sm:$0xff]   ;;  %v254_v8 = vld [vmem:[%s341_s1 + $0x58] sm:$0xff]   ;;  %v256_v10 = vld [vmem:[%s341_s1 + $0x50] sm:$0xff]  }
   0x4   :  { %226 = vmatprep.subr.bf16.mxu0 %v248_v2  ;;  %v253_v7 = vld [vmem:[%s341_s1 + $0x20] sm:$0xff]   ;;  %v255_v9 = vld [vmem:[%s341_s1 + $0x18] sm:$0xff]   ;;  %v257_v13 = vld [vmem:[%s341_s1 + $0x10] sm:$0xff]  }
   0x5   :  { %v15_v11 = vld [vmem:[%s342_s0] sm:$0xff]  ;;  %v258_v14 = vld [vmem:[%s341_s1 + $0x48] sm:$0xff]  }
   0x6   :  { %v207_v12 = vcombine.high %v15_v11, %v15_v11  ;;  %v259_v15 = vld [vmem:[%s341_s1 + $0x8] sm:$0xff]   ;;  %v260_v16 = vld [vmem:[%s341_s1 + $0x40] sm:$0xff]   ;;  %v206_v18 = vcombine.low %v15_v11, %v15_v11 }
   0x7   :  { %227 = vmatpush3.bf16.msra.mxu0 %v249_v3  ;;  %v261_v17 = vld [vmem:[%s341_s1] sm:$0xff]  }
   0x8   :  { %228 = vmatprep.subr.bf16.mxu0 %v250_v4  ;;  %190 = vmatprep.mubr.bf16.mxu0 %v207_v12  ;;  %v205_v20 = vld [vmem:[%s343_s2] ss:$0 sm:$0xff] }
   0xb   :  { %229 = vmatpush3.bf16.msra.mxu0 %v251_v5 }
   0xc   :  { %230 = vmatprep.subr.bf16.mxu0 %v252_v6 }
   0xf   :  { %231 = vmatpush3.bf16.msra.mxu0 %v253_v7 }
  0x10   :  { %232 = vmatprep.subr.bf16.mxu0 %v254_v8 }
  0x13   :  { %233 = vmatpush3.bf16.msra.mxu0 %v255_v9 }
  0x14   :  { %234 = vmatprep.subr.bf16.mxu0 %v256_v10 }
  0x17   :  { %235 = vmatpush3.bf16.msra.mxu0 %v257_v13 }
  0x18   :  { %236 = vmatprep.subr.bf16.mxu0 %v258_v14 }
  0x1b   :  { %237 = vmatpush3.bf16.msra.mxu0 %v259_v15 }
  0x1c   :  { %238 = vmatprep.subr.bf16.mxu0 %v260_v16 }
  0x1f   :  { %239 = vmatpush3.bf16.msra.mxu0 %v261_v17 }
  0x22   :  { %191 = vmatmul.mubr.bf16.vlgmr.msra.gmra.mxu0 %v206_v18 }
  0xe2   :  { %v240_v19 = vpop.f32.mrf.mxu0 }
  0xe4   :  { %v241_v21 = vpop.f32.mrf.mxu0 }
  0xe5   :  { %v242_v22 = vadd.f32 %v241_v21, %v240_v19 }
  0xe6   :  { %v243_v23 = vpop.f32.mrf.mxu0 }
  0xe7   :  { %v193_v24 = vadd.f32 %v242_v22, %v205_v20 }
  0xe8   :  { %v244_v25 = vpop.f32.mrf.mxu0 }
  0xe9   :  { %v198_v26 = vmax.f32 %v193_v24, 0.0 }
  0xeb   :  { %v199_v27 = vpack.c.bf16 %v198_v26, %v198_v26 }
  0xed   :  { %200 = vst [vmem:[%s344_s3] sm:$0xf] %v199_v27 }

// kernel: feature_extractor_forward.85
= control target key start
LH: loop header
LB: loop body
LE: loop exit
PB: predicated region body
PF: predicated region fallthrough
CT: control target
= control target key end

     0   :  { %s1843_s12 = smov 0   ;;  %s2180_s0 = inlined_call_operand.vmem [shape: bf16[8,18,128], index: 0, kind: input, shape index: {}]   ;;  %s2181_s1 = inlined_call_operand.vmem [shape: bf16[9,128,128], index: 1, kind: input, shape index: {}]   ;;  %s2182_s2 = inlined_call_operand.vmem [shape: f32[1,128], index: 2, kind: input, shape index: {}]   ;;  %s2183_s3 = inlined_call_operand.vmem [shape: bf16[8,3,128], index: 3, kind: output, shape index: {}]  }
   0x1 LB: > { %s1251_s13 = sadd.s32 4294967295, %s1819_s12   ;;  %p1255_p0 = scmp.ge.s32.totalorder %s1819_s12, 1  ;;  %s1819_s12 = sphi %s1843_s12, %s13_s12  }
   0x2   : > { %p137_p1 = scmp.lt.s32.totalorder %s1819_s12, 9 }
   0x4   : > { %p138_p2 = pnand %p1255_p0, %p137_p1 }
   0x5   : > { %p160_p3 = scmp.lt.s32.totalorder (!%p138_p2), %s1251_s13, 7 }
   0x6   : > { %141 = sbr.rel (%p138_p2) target bundleno = 375 (0x177), region = 32 }
   0xb   : > { %v1737_v0 = vld [vmem:[%s2181_s1 + $0x78] sm:$0xff]   ;;  %v1821_v1 = vmov 0.0   ;;  %v1739_v3 = vld [vmem:[%s2181_s1 + $0x70] sm:$0xff]   ;;  %vm1822_vm0 = vmmov 0   ;;  %s2185_s13 = smov (!%p160_p3, %s1251_s13), 7  ;;  %v1741_v5 = vld [vmem:[%s2181_s1 + $0x68] sm:$0xff]  }
   0xc   : > { %1546 = vmatprep.subr.bf16.mxu0 %v1821_v1  ;;  %1566 = vmatprep.subr.bf16.mxu1 %v1821_v1  ;;  %v1738_v2 = vld [vmem:[%s2181_s1 + $0x38] sm:$0xff]   ;;  %v1740_v4 = vld [vmem:[%s2181_s1 + $0x30] sm:$0xff]   ;;  %v1742_v6 = vld [vmem:[%s2181_s1 + $0x28] sm:$0xff]   ;;  %s1726_s26 = smul.u32 12, %s2185_s13  ;;  %vm1192_vm1 = vcmask 1041408  }
   0xd   : > { %1547 = vmatpush3.bf16.msra.mxu0 %v1737_v0  ;;  %1562 = vmatprep.mubr.msk.bf16.mxu0 %vm1822_vm0, %v1821_v1  ;;  %v1743_v7 = vld [vmem:[%s2181_s1 + $0x60] sm:$0xff]   ;;  %v1745_v9 = vld [vmem:[%s2181_s1 + $0x58] sm:$0xff]   ;;  %v1747_v13 = vld [vmem:[%s2181_s1 + $0x50] sm:$0xff]   ;;  %vm1193_vm2 = vsmask.f32 1280 }
   0xe   : > { %1567 = vmatpush3.bf16.msra.mxu1 %v1738_v2  ;;  %1548 = vmatprep.subr.bf16.mxu0 %v1821_v1  ;;  %v1744_v8 = vld [vmem:[%s2181_s1 + $0x20] sm:$0xff]   ;;  %s1893_s6 = scalar_lea.vmem %s2180_s0, %s1726_s26  ;;  %v1746_v10 = vld [vmem:[%s2181_s1 + $0x18] sm:$0xff]   ;;  %v1748_v14 = vld [vmem:[%s2181_s1 + $0x10] sm:$0xff]  }
   0xf   : > { %1568 = vmatprep.subr.bf16.mxu1 %v1821_v1  ;;  %1582 = vmatprep.mubr.msk.bf16.mxu1 %vm1822_vm0, %v1821_v1  ;;  %v170_v11 = vld [vmem:[%s1893_s6] sm:$0x3]  ;;  %v1749_v16 = vld [vmem:[%s2181_s1 + $0x48] sm:$0xff]   ;;  %v1754_v23 = vld [vmem:[%s2181_s1 + $0xb8] sm:$0xff]  }
  0x10   : > { %v1274_v12 = vcombine.low %v170_v11, %v170_v11  ;;  %v1750_v17 = vld [vmem:[%s2181_s1 + $0x8] sm:$0xff]   ;;  %v1751_v20 = vld [vmem:[%s2181_s1 + $0x40] sm:$0xff]   ;;  %v1755_v24 = vld [vmem:[%s2181_s1 + $0xf8] sm:$0xff]  }
  0x11   : > { %1549 = vmatpush3.bf16.msra.mxu0 %v1739_v3  ;;  %v1752_v21 = vld [vmem:[%s2181_s1] sm:$0xff]   ;;  %v1756_v25 = vld [vmem:[%s2181_s1 + $0xb0] sm:$0xff]   ;;  %v1758_v27 = vld [vmem:[%s2181_s1 + $0xa8] sm:$0xff]  }
  0x12   : > { %1569 = vmatpush3.bf16.msra.mxu1 %v1740_v4  ;;  %1550 = vmatprep.subr.bf16.mxu0 %v1821_v1  ;;  %v210_v15 = vshll.u32 %v1274_v12, 16  ;;  %v208_v18 = vshrl.u32 %v1274_v12, 16  ;;  %v1757_v26 = vld [vmem:[%s2181_s1 + $0xf0] sm:$0xff]   ;;  %v1759_v28 = vld [vmem:[%s2181_s1 + $0xe8] sm:$0xff]   ;;  %v1760_v29 = vld [vmem:[%s2181_s1 + $0xa0] sm:$0xff]  }
  0x13   : > { %1570 = vmatprep.subr.bf16.mxu1 %v1821_v1  ;;  %v1761_v30 = vld [vmem:[%s2181_s1 + $0xe0] sm:$0xff]   ;;  %v1762_v31 = vld [vmem:[%s2181_s1 + $0x98] sm:$0xff]   ;;  %v1764_v34 = vld [vmem:[%s2181_s1 + $0x90] sm:$0xff]  }
  0x14   : > { %v212_v19 = vrot.slane %v210_v15, 1  ;;  %v1763_v32 = vld [vmem:[%s2181_s1 + $0xd8] sm:$0xff]   ;;  %v1770_v33 = vld [vmem:[%s1893_s6] ss:$0 sps:$4 sm:$0x66]   ;;  %v1765_v35 = vld [vmem:[%s2181_s1 + $0xd0] sm:$0xff]  }
  0x15   : > { %1551 = vmatpush3.bf16.msra.mxu0 %v1741_v5  ;;  %v1766_v36 = vld [vmem:[%s2181_s1 + $0x88] sm:$0xff]   ;;  %v521_v37 = vshrl.u32 %v1770_v33, 16  ;;  %v524_v38 = vshll.u32 %v1770_v33, 16  ;;  %v1768_v40 = vld [vmem:[%s2181_s1 + $0x80] sm:$0xff]   ;;  %v412_v44 = vrot.slane %v1770_v33, 1  ;;  %v1771_v45 = vld [vmem:[%s2181_s1 + $0x138] sm:$0xff]  }
  0x16   : > { %1571 = vmatpush3.bf16.msra.mxu1 %v1742_v6  ;;  %1552 = vmatprep.subr.bf16.mxu0 %v1821_v1  ;;  %v213_v22 = vor.u32 %v212_v19, %v208_v18  ;;  %v1767_v39 = vld [vmem:[%s2181_s1 + $0xc8] sm:$0xff]   ;;  %v1769_v43 = vld [vmem:[%s2181_s1 + $0xc0] sm:$0xff]   ;;  %v1772_v47 = vld [vmem:[%s2181_s1 + $0x178] sm:$0xff]  }
  0x17   : > { %1572 = vmatprep.subr.bf16.mxu1 %v1821_v1  ;;  %v523_v41 = vrot.slane %v521_v37, 1  ;;  %v526_v42 = vrot.slane %v524_v38, 2  ;;  %v1773_v48 = vld [vmem:[%s2181_s1 + $0x130] sm:$0xff]   ;;  %v1775_v50 = vld [vmem:[%s2181_s1 + $0x128] sm:$0xff]   ;;  %v1777_v52 = vld [vmem:[%s2181_s1 + $0x120] sm:$0xff]  }
  0x18   : > { %v1774_v49 = vld [vmem:[%s2181_s1 + $0x170] sm:$0xff]   ;;  %v1776_v51 = vld [vmem:[%s2181_s1 + $0x168] sm:$0xff]   ;;  %v1778_v53 = vld [vmem:[%s2181_s1 + $0x160] sm:$0xff]  }
  0x19   : > { %1553 = vmatpush3.bf16.msra.mxu0 %v1743_v7  ;;  %v527_v46 = vor.u32 %v526_v42, %v523_v41  ;;  %v1779_v54 = vld [vmem:[%s2181_s1 + $0x118] sm:$0xff]   ;;  %v1781_v56 = vld [vmem:[%s2181_s1 + $0x110] sm:$0xff]   ;;  %v1787_v57 = vld [vmem:[%s1893_s6] ss:$0 sps:$4 sm:$0xcc]  }
  0x1a   : > { %1573 = vmatpush3.bf16.msra.mxu1 %v1744_v8  ;;  %1554 = vmatprep.subr.bf16.mxu0 %v1821_v1  ;;  %v1780_v55 = vld [vmem:[%s2181_s1 + $0x158] sm:$0xff]   ;;  %v1782_v58 = vld [vmem:[%s2181_s1 + $0x150] sm:$0xff]   ;;  %v1783_v59 = vld [vmem:[%s2181_s1 + $0x108] sm:$0xff]   ;;  %v748_v60 = vshrl.u32 %v1787_v57, 16  ;;  %v751_v61 = vshll.u32 %v1787_v57, 16  ;;  %v639_v4 = vrot.slane %v1787_v57, 2 }
  0x1b   : > { %1574 = vmatprep.subr.bf16.mxu1 %v1821_v1  ;;  %v1784_v62 = vld [vmem:[%s2181_s1 + $0x148] sm:$0xff]   ;;  %v1785_v63 = vld [vmem:[%s2181_s1 + $0x100] sm:$0xff]   ;;  %v1788_v5 = vld [vmem:[%s2181_s1 + $0x1b8] sm:$0xff]  }
  0x1c   : > { %v750_v0 = vrot.slane %v748_v60, 2  ;;  %v753_v2 = vrot.slane %v751_v61, 3  ;;  %v1786_v3 = vld [vmem:[%s2181_s1 + $0x140] sm:$0xff]   ;;  %v1789_v7 = vld [vmem:[%s2181_s1 + $0x1f8] sm:$0xff]   ;;  %v1790_v8 = vld [vmem:[%s2181_s1 + $0x1b0] sm:$0xff]  }
  0x1d   : > { %1555 = vmatpush3.bf16.msra.mxu0 %v1745_v9  ;;  %v1791_v9 = vld [vmem:[%s2181_s1 + $0x1f0] sm:$0xff]   ;;  %v1794_v12 = vld [vmem:[%s2181_s1 + $0x1a0] sm:$0xff]   ;;  %v1797_v15 = vld [vmem:[%s2181_s1 + $0x1d8] sm:$0xff]  }
  0x1e   : > { %1575 = vmatpush3.bf16.msra.mxu1 %v1746_v10  ;;  %1556 = vmatprep.subr.bf16.mxu0 %v1821_v1  ;;  %v754_v6 = vor.u32 %v753_v2, %v750_v0  ;;  %v1792_v10 = vld [vmem:[%s2181_s1 + $0x1a8] sm:$0xff]   ;;  %v1799_v18 = vld [vmem:[%s2181_s1 + $0x1d0] sm:$0xff]   ;;  %v1809_v33 = vld [vmem:[%s2181_s1 + $0x218] sm:$0xff]  }
  0x1f   : > { %1576 = vmatprep.subr.bf16.mxu1 %v1821_v1  ;;  %v1800_v19 = vld [vmem:[%s2181_s1 + $0x188] sm:$0xff]   ;;  %v1075_v37 = vld [vmem:[%s1893_s6 + $0x4] sm:$0x3]  ;;  %vm1194_vm3 = vmand %vm1192_vm1, %vm1193_vm2 }
  0x21   : > { %1557 = vmatpush3.bf16.msra.mxu0 %v1747_v13  ;;  %v1795_v13 = vld [vmem:[%s2181_s1 + $0x1e0] sm:$0xff]  }
  0x22   : > { %1577 = vmatpush3.bf16.msra.mxu1 %v1748_v14  ;;  %1558 = vmatprep.subr.bf16.mxu0 %v1821_v1  ;;  %v1796_v14 = vld [vmem:[%s2181_s1 + $0x198] sm:$0xff]  }
  0x23   : > { %1578 = vmatprep.subr.bf16.mxu1 %v1821_v1 }
  0x25   : > { %1559 = vmatpush3.bf16.msra.mxu0 %v1749_v16  ;;  %v1798_v16 = vld [vmem:[%s2181_s1 + $0x190] sm:$0xff]  }
  0x26   : > { %1579 = vmatpush3.bf16.msra.mxu1 %v1750_v17  ;;  %1560 = vmatprep.subr.bf16.mxu0 %v1821_v1  ;;  %v1804_v17 = vld [vmem:[%s1893_s6] sm:$0x18]   ;;  %s1257_s6 = sshll.u32 %s2185_s13, 1 }
  0x27   : > { %1580 = vmatprep.subr.bf16.mxu1 %v1821_v1  ;;  %s168_s21 = scalar_lea.vmem %s2183_s3, %s1257_s6 }
  0x29   : > { %1561 = vmatpush3.bf16.msra.mxu0 %v1751_v20  ;;  %v978_v20 = vshrl.u32 %v1804_v17, 16 }
  0x2a   : > { %1581 = vmatpush3.bf16.msra.mxu1 %v1752_v21  ;;  %1586 = vmatprep.subr.bf16.mxu0 %v1821_v1  ;;  %v981_v21 = vshll.u32 %v1804_v17, 16 }
  0x2b   : > { %1606 = vmatprep.subr.bf16.mxu1 %v1821_v1 }
  0x2c   : > { %1563 = vmatmul.mubr.bf16.vlgmr.msra.gmra.mxu0 %v213_v22  ;;  %v1801_v22 = vld [vmem:[%s2181_s1 + $0x1c8] sm:$0xff]  }
  0x2d   : > { %1583 = vmatmul.mubr.bf16.vlgmr.msra.gmra.mxu1 %v170_v11  ;;  %1587 = vmatpush3.bf16.msra.mxu0 %v1754_v23  ;;  %v1793_v11 = vld [vmem:[%s2181_s1 + $0x1e8] sm:$0xff]   ;;  %v1802_v23 = vld [vmem:[%s2181_s1 + $0x180] sm:$0xff]  }
  0x2e   : > { %1607 = vmatpush3.bf16.msra.mxu1 %v1755_v24  ;;  %1588 = vmatprep.subr.bf16.mxu0 %v1821_v1  ;;  %v980_v24 = vrot.slane %v978_v20, 3  ;;  %v1195_v20 = vld [vmem:[%s168_s21] sm:$0x3] }
  0x2f   : > { %1608 = vmatprep.subr.bf16.mxu1 %v1821_v1  ;;  %1602 = vmatprep.mubr.msk.bf16.mxu0 %vm1822_vm0, %v1821_v1 }
  0x30   : > { %1622 = vmatprep.mubr.msk.bf16.mxu1 %vm1822_vm0, %v1821_v1 }
  0x31   : > { %1589 = vmatpush3.bf16.msra.mxu0 %v1756_v25  ;;  %v983_v25 = vrot.slane %v981_v21, 4 }
  0x32   : > { %1609 = vmatpush3.bf16.msra.mxu1 %v1757_v26  ;;  %1590 = vmatprep.subr.bf16.mxu0 %v1821_v1  ;;  %v1803_v26 = vld [vmem:[%s2181_s1 + $0x1c0] sm:$0xff]  }
  0x33   : > { %1610 = vmatprep.subr.bf16.mxu1 %v1821_v1 }
  0x35   : > { %1591 = vmatpush3.bf16.msra.mxu0 %v1758_v27  ;;  %v869_v27 = vrot.slane %v1804_v17, 3 }
  0x36   : > { %1611 = vmatpush3.bf16.msra.mxu1 %v1759_v28  ;;  %1592 = vmatprep.subr.bf16.mxu0 %v1821_v1  ;;  %v1805_v28 = vld [vmem:[%s2181_s1 + $0x238] sm:$0xff]  }
  0x37   : > { %1612 = vmatprep.subr.bf16.mxu1 %v1821_v1 }
  0x39   : > { %1593 = vmatpush3.bf16.msra.mxu0 %v1760_v29  ;;  %v984_v29 = vor.u32 %v983_v25, %v980_v24 }
  0x3a   : > { %1613 = vmatpush3.bf16.msra.mxu1 %v1761_v30  ;;  %1594 = vmatprep.subr.bf16.mxu0 %v1821_v1  ;;  %v1806_v30 = vld [vmem:[%s2181_s1 + $0x230] sm:$0xff]  }
  0x3b   : > { %1614 = vmatprep.subr.bf16.mxu1 %v1821_v1 }
  0x3d   : > { %1595 = vmatpush3.bf16.msra.mxu0 %v1762_v31  ;;  %v1807_v31 = vld [vmem:[%s2181_s1 + $0x228] sm:$0xff]  }
  0x3e   : > { %1615 = vmatpush3.bf16.msra.mxu1 %v1763_v32  ;;  %1596 = vmatprep.subr.bf16.mxu0 %v1821_v1  ;;  %v1808_v32 = vld [vmem:[%s2181_s1 + $0x220] sm:$0xff]  }
  0x3f   : > { %1616 = vmatprep.subr.bf16.mxu1 %v1821_v1 }
  0x41   : > { %1597 = vmatpush3.bf16.msra.mxu0 %v1764_v34  ;;  %v1810_v34 = vld [vmem:[%s2181_s1 + $0x210] sm:$0xff]  }
  0x42   : > { %1617 = vmatpush3.bf16.msra.mxu1 %v1765_v35  ;;  %1598 = vmatprep.subr.bf16.mxu0 %v1821_v1  ;;  %v1811_v35 = vld [vmem:[%s2181_s1 + $0x208] sm:$0xff]  }
  0x43   : > { %1618 = vmatprep.subr.bf16.mxu1 %v1821_v1 }
  0x45   : > { %1599 = vmatpush3.bf16.msra.mxu0 %v1766_v36  ;;  %v1812_v36 = vld [vmem:[%s2181_s1 + $0x200] sm:$0xff]  }
  0x46   : > { %1619 = vmatpush3.bf16.msra.mxu1 %v1767_v39  ;;  %1600 = vmatprep.subr.bf16.mxu0 %v1821_v1 }
  0x47   : > { %1620 = vmatprep.subr.bf16.mxu1 %v1821_v1 }
  0x49   : > { %1601 = vmatpush3.bf16.msra.mxu0 %v1768_v40 }
  0x4a   : > { %1621 = vmatpush3.bf16.msra.mxu1 %v1769_v43  ;;  %1626 = vmatprep.subr.bf16.mxu0 %v1821_v1 }
  0x4b   : > { %1646 = vmatprep.subr.bf16.mxu1 %v1821_v1 }
  0x4c   : > { %1603 = vmatmul.mubr.bf16.vlgmr.msra.gmra.mxu0 %v412_v44 }
  0x4d   : > { %1627 = vmatpush3.bf16.msra.mxu0 %v1771_v45  ;;  %1623 = vmatmul.mubr.bf16.vlgmr.msra.gmra.mxu1 %v527_v46 }
  0x4e   : > { %1647 = vmatpush3.bf16.msra.mxu1 %v1772_v47  ;;  %1628 = vmatprep.subr.bf16.mxu0 %v1821_v1 }
  0x4f   : > { %1648 = vmatprep.subr.bf16.mxu1 %v1821_v1  ;;  %1642 = vmatprep.mubr.msk.bf16.mxu0 %vm1822_vm0, %v1821_v1 }
  0x50   : > { %1662 = vmatprep.mubr.msk.bf16.mxu1 %vm1822_vm0, %v1821_v1 }
  0x51   : > { %1629 = vmatpush3.bf16.msra.mxu0 %v1773_v48 }
  0x52   : > { %1649 = vmatpush3.bf16.msra.mxu1 %v1774_v49  ;;  %1630 = vmatprep.subr.bf16.mxu0 %v1821_v1 }
  0x53   : > { %1650 = vmatprep.subr.bf16.mxu1 %v1821_v1 }
  0x55   : > { %1631 = vmatpush3.bf16.msra.mxu0 %v1775_v50 }
  0x56   : > { %1651 = vmatpush3.bf16.msra.mxu1 %v1776_v51  ;;  %1632 = vmatprep.subr.bf16.mxu0 %v1821_v1 }
  0x57   : > { %1652 = vmatprep.subr.bf16.mxu1 %v1821_v1 }
  0x59   : > { %1633 = vmatpush3.bf16.msra.mxu0 %v1777_v52 }
  0x5a   : > { %1653 = vmatpush3.bf16.msra.mxu1 %v1778_v53  ;;  %1634 = vmatprep.subr.bf16.mxu0 %v1821_v1 }
  0x5b   : > { %1654 = vmatprep.subr.bf16.mxu1 %v1821_v1 }
  0x5d   : > { %1635 = vmatpush3.bf16.msra.mxu0 %v1779_v54 }
  0x5e   : > { %1655 = vmatpush3.bf16.msra.mxu1 %v1780_v55  ;;  %1636 = vmatprep.subr.bf16.mxu0 %v1821_v1 }
  0x5f   : > { %1656 = vmatprep.subr.bf16.mxu1 %v1821_v1 }
  0x61   : > { %1637 = vmatpush3.bf16.msra.mxu0 %v1781_v56 }
  0x62   : > { %1657 = vmatpush3.bf16.msra.mxu1 %v1782_v58  ;;  %1638 = vmatprep.subr.bf16.mxu0 %v1821_v1 }
  0x63   : > { %1658 = vmatprep.subr.bf16.mxu1 %v1821_v1 }
  0x65   : > { %1639 = vmatpush3.bf16.msra.mxu0 %v1783_v59 }
  0x66   : > { %1659 = vmatpush3.bf16.msra.mxu1 %v1784_v62  ;;  %1640 = vmatprep.subr.bf16.mxu0 %v1821_v1 }
  0x67   : > { %1660 = vmatprep.subr.bf16.mxu1 %v1821_v1 }
  0x69   : > { %1641 = vmatpush3.bf16.msra.mxu0 %v1785_v63 }
  0x6a   : > { %1661 = vmatpush3.bf16.msra.mxu1 %v1786_v3  ;;  %1666 = vmatprep.subr.bf16.mxu0 %v1821_v1 }
  0x6b   : > { %1686 = vmatprep.subr.bf16.mxu1 %v1821_v1 }
  0x6c   : > { %1643 = vmatmul.mubr.bf16.vlgmr.msra.gmra.mxu0 %v639_v4 }
  0x6d   : > { %1667 = vmatpush3.bf16.msra.mxu0 %v1788_v5  ;;  %1663 = vmatmul.mubr.bf16.vlgmr.msra.gmra.mxu1 %v754_v6 }
  0x6e   : > { %1687 = vmatpush3.bf16.msra.mxu1 %v1789_v7  ;;  %1668 = vmatprep.subr.bf16.mxu0 %v1821_v1 }
  0x6f   : > { %1688 = vmatprep.subr.bf16.mxu1 %v1821_v1  ;;  %1682 = vmatprep.mubr.msk.bf16.mxu0 %vm1822_vm0, %v1821_v1 }
  0x70   : > { %1702 = vmatprep.mubr.msk.bf16.mxu1 %vm1822_vm0, %v1821_v1 }
  0x71   : > { %1669 = vmatpush3.bf16.msra.mxu0 %v1790_v8 }
  0x72   : > { %1689 = vmatpush3.bf16.msra.mxu1 %v1791_v9  ;;  %1670 = vmatprep.subr.bf16.mxu0 %v1821_v1 }
  0x73   : > { %1690 = vmatprep.subr.bf16.mxu1 %v1821_v1 }
  0x75   : > { %1671 = vmatpush3.bf16.msra.mxu0 %v1792_v10 }
  0x76   : > { %1691 = vmatpush3.bf16.msra.mxu1 %v1793_v11  ;;  %1672 = vmatprep.subr.bf16.mxu0 %v1821_v1 }
  0x77   : > { %1692 = vmatprep.subr.bf16.mxu1 %v1821_v1 }
  0x79   : > { %1673 = vmatpush3.bf16.msra.mxu0 %v1794_v12 }
  0x7a   : > { %1693 = vmatpush3.bf16.msra.mxu1 %v1795_v13  ;;  %1674 = vmatprep.subr.bf16.mxu0 %v1821_v1 }
  0x7b   : > { %1694 = vmatprep.subr.bf16.mxu1 %v1821_v1 }
  0x7d   : > { %1675 = vmatpush3.bf16.msra.mxu0 %v1796_v14  ;;  %v1462_v14 = vld [vmem:[%s2182_s2] ss:$0 sm:$0xff] }
  0x7e   : > { %1695 = vmatpush3.bf16.msra.mxu1 %v1797_v15  ;;  %1676 = vmatprep.subr.bf16.mxu0 %v1821_v1 }
  0x7f   : > { %1696 = vmatprep.subr.bf16.mxu1 %v1821_v1 }
  0x81   : > { %1677 = vmatpush3.bf16.msra.mxu0 %v1798_v16 }
  0x82   : > { %1697 = vmatpush3.bf16.msra.mxu1 %v1799_v18  ;;  %1678 = vmatprep.subr.bf16.mxu0 %v1821_v1 }
  0x83   : > { %1698 = vmatprep.subr.bf16.mxu1 %v1821_v1 }
  0x85   : > { %1679 = vmatpush3.bf16.msra.mxu0 %v1800_v19 }
  0x86   : > { %1699 = vmatpush3.bf16.msra.mxu1 %v1801_v22  ;;  %1680 = vmatprep.subr.bf16.mxu0 %v1821_v1 }
  0x87   : > { %1700 = vmatprep.subr.bf16.mxu1 %v1821_v1 }
  0x89   : > { %1681 = vmatpush3.bf16.msra.mxu0 %v1802_v23 }
  0x8a   : > { %1701 = vmatpush3.bf16.msra.mxu1 %v1803_v26  ;;  %1706 = vmatprep.subr.bf16.mxu0 %v1821_v1 }
  0x8c   : > { %1683 = vmatmul.mubr.bf16.vlgmr.msra.gmra.mxu0 %v869_v27 }
  0x8d   : > { %1707 = vmatpush3.bf16.msra.mxu0 %v1805_v28  ;;  %1703 = vmatmul.mubr.bf16.vlgmr.msra.gmra.mxu1 %v984_v29 }
  0x8e   : > { %1708 = vmatprep.subr.bf16.mxu0 %v1821_v1  ;;  %1722 = vmatprep.mubr.msk.bf16.mxu0 %vm1822_vm0, %v1821_v1 }
  0x91   : > { %1709 = vmatpush3.bf16.msra.mxu0 %v1806_v30 }
  0x92   : > { %1710 = vmatprep.subr.bf16.mxu0 %v1821_v1 }
  0x95   : > { %1711 = vmatpush3.bf16.msra.mxu0 %v1807_v31 }
  0x96   : > { %1712 = vmatprep.subr.bf16.mxu0 %v1821_v1 }
  0x99   : > { %1713 = vmatpush3.bf16.msra.mxu0 %v1808_v32 }
  0x9a   : > { %1714 = vmatprep.subr.bf16.mxu0 %v1821_v1 }
  0x9d   : > { %1715 = vmatpush3.bf16.msra.mxu0 %v1809_v33 }
  0x9e   : > { %1716 = vmatprep.subr.bf16.mxu0 %v1821_v1 }
  0xa1   : > { %1717 = vmatpush3.bf16.msra.mxu0 %v1810_v34 }
  0xa2   : > { %1718 = vmatprep.subr.bf16.mxu0 %v1821_v1 }
  0xa5   : > { %1719 = vmatpush3.bf16.msra.mxu0 %v1811_v35 }
  0xa6   : > { %1720 = vmatprep.subr.bf16.mxu0 %v1821_v1 }
  0xa9   : > { %1721 = vmatpush3.bf16.msra.mxu0 %v1812_v36 }
  0xac   : > { %1723 = vmatmul.mubr.bf16.vlgmr.msra.gmra.mxu0 %v1075_v37 }
  0xec   : > { %v297_v38 = vpop.f32.mrf.mxu0 }
  0xed   : > { %v385_v39 = vpop.f32.mrf.mxu1 }
  0xee   : > { %v386_v40 = vadd.f32 %v385_v39, %v297_v38  ;;  %v1564_v41 = vpop.f32.mrf.mxu0 }
  0xef   : > { %v1584_v42 = vpop.f32.mrf.mxu1 }
  0xf0   : > { %v300_v43 = vpop.f32.mrf.mxu0 }
  0xf1   : > { %v388_v44 = vpop.f32.mrf.mxu1 }
  0xf2   : > { %v1565_v45 = vpop.f32.mrf.mxu0 }
  0xf3   : > { %v1585_v46 = vpop.f32.mrf.mxu1 }
 0x10c   : > { %v496_v47 = vpop.f32.mrf.mxu0 }
 0x10d   : > { %v502_v48 = vadd.f32 %v496_v47, %v386_v40  ;;  %v611_v49 = vpop.f32.mrf.mxu1 }
 0x10e   : > { %v1604_v50 = vpop.f32.mrf.mxu0 }
 0x10f   : > { %v617_v51 = vadd.f32 %v611_v49, %v502_v48  ;;  %v1624_v52 = vpop.f32.mrf.mxu1 }
 0x110   : > { %v499_v53 = vpop.f32.mrf.mxu0 }
 0x111   : > { %v614_v1 = vpop.f32.mrf.mxu1 }
 0x112   : > { %v1605_v54 = vpop.f32.mrf.mxu0 }
 0x113   : > { %v1625_v55 = vpop.f32.mrf.mxu1 }
 0x12c   : > { %v723_v56 = vpop.f32.mrf.mxu0 }
 0x12d   : > { %v838_v57 = vpop.f32.mrf.mxu1  ;;  %v729_v9 = vadd.f32 %v723_v56, %v617_v51 }
 0x12e   : > { %v1644_v58 = vpop.f32.mrf.mxu0 }
 0x12f   : > { %v1664_v59 = vpop.f32.mrf.mxu1  ;;  %v844_v10 = vadd.f32 %v838_v57, %v729_v9 }
 0x130   : > { %v726_v60 = vpop.f32.mrf.mxu0 }
 0x131   : > { %v841_v61 = vpop.f32.mrf.mxu1 }
 0x132   : > { %v1645_v62 = vpop.f32.mrf.mxu0 }
 0x133   : > { %v1665_v63 = vpop.f32.mrf.mxu1 }
 0x14c   : > { %v953_v0 = vpop.f32.mrf.mxu0 }
 0x14d   : > { %v1068_v2 = vpop.f32.mrf.mxu1  ;;  %v959_v11 = vadd.f32 %v953_v0, %v844_v10 }
 0x14e   : > { %v1684_v3 = vpop.f32.mrf.mxu0 }
 0x14f   : > { %v1704_v4 = vpop.f32.mrf.mxu1  ;;  %v1074_v12 = vadd.f32 %v1068_v2, %v959_v11 }
 0x150   : > { %v956_v5 = vpop.f32.mrf.mxu0 }
 0x151   : > { %v1071_v6 = vpop.f32.mrf.mxu1 }
 0x152   : > { %v1685_v7 = vpop.f32.mrf.mxu0 }
 0x153   : > { %v1705_v8 = vpop.f32.mrf.mxu1 }
 0x16c   : > { %v1175_v13 = vpop.f32.mrf.mxu0 }
 0x16d   : > { %v1181_v15 = vadd.f32 %v1175_v13, %v1074_v12 }
 0x16e   : > { %v1724_v16 = vpop.f32.mrf.mxu0 }
 0x16f   : > { %v1189_v17 = vadd.f32 %v1462_v14, %v1181_v15 }
 0x170   : > { %v1178_v18 = vpop.f32.mrf.mxu0 }
 0x171   : > { %v1190_v19 = vmax.f32 %v1189_v17, 0.0 }
 0x172   : > { %v1725_v21 = vpop.f32.mrf.mxu0 }
 0x173   : > { %v1191_v22 = vpack.c.bf16 %v1190_v19, %v1190_v19 }
 0x175   : > { %v1196_v23 = vsel %vm1194_vm3, %v1191_v22, %v1195_v20 }
 0x176   : > { %1197 = vst [vmem:[%s168_s21] sm:$0x3] %v1196_v23 }
 0x177 PF: > { %s13_s12 = sadd.s32 1, %s1819_s12  }
 0x178   : > { %p10_p4 = scmp.ge.s32.totalorder %s13_s12, 10  }
 0x17a   :  { %12 = sbr.rel (!%p10_p4) target bundleno = 1 (0x1), region = 70 }

// kernel: feature_extractor_forward.109
= control target key start
LH: loop header
LB: loop body
LE: loop exit
PB: predicated region body
PF: predicated region fallthrough
CT: control target
= control target key end

     0   :  { %s310_s6 = smov 0   ;;  %s312_s7 = smov 0   ;;  %s331_s0 = inlined_call_operand.vmem [shape: bf16[2,8,256], index: 0, kind: input, shape index: {}]   ;;  %s332_s1 = inlined_call_operand.vmem [shape: f32[2,8,256], index: 1, kind: output, shape index: {}]  }
   0x1   :  { %s314_s8 = smov 0  }
   0x2 LB: > { %s23_s9 = sadd.s32 1, %s294_s7  ;;  %p243_p0 = scmp.ge.s32.totalorder %s298_s8, 1  ;;  %s298_s8 = sphi %s314_s8, %s11_s8   ;;  %s294_s7 = sphi %s312_s7, %s334_s7   ;;  %s290_s6 = sphi %s310_s6, %s333_s6  }
   0x3   : > { %p25_p1 = scmp.ge.s32.totalorder %s23_s9, 2  ;;  %p105_p2 = scmp.lt.s32.totalorder %s298_s8, 3 }
   0x5   : > { %s336_s9 = smov (%p25_p1, %s23_s9), 0  ;;  %p106_p3 = pnand %p243_p0, %p105_p2 }
   0x6   : > { %p129_p4 = scmp.lt.s32.totalorder (!%p106_p3), %s290_s6, 1 }
   0x7   : > { %109 = sbr.rel (%p106_p3) target bundleno = 21 (0x15), region = 24 }
   0xc   : > { %s338_s6 = smov (!%p129_p4, %s290_s6), 1 }
   0xd   : > { %s250_s10 = sshll.u32 %s338_s6, 3  ;;  %s251_s14 = sshll.u32 %s338_s6, 4 }
   0xe   : > { %s137_s13 = scalar_lea.vmem %s331_s0, %s250_s10  ;;  %s142_s17 = scalar_lea.vmem %s332_s1, %s251_s14 }
   0xf   : > { %v149_v0 = vld [vmem:[%s137_s13] sm:$0xff] }
  0x10   : > { %v150_v1 = vunpack.c.l.bf16 %v149_v0  ;;  %v151_v2 = vunpack.c.h.bf16 %v149_v0 }
  0x12   : > { %v163_v3 = vmul.f32 0.25, %v150_v1  ;;  %v164_v4 = vmul.f32 0.25, %v151_v2 }
  0x14   : > { %165 = vst [vmem:[%s142_s17] sm:$0xff] %v163_v3  ;;  %166 = vst [vmem:[%s142_s17 + $0x8] sm:$0xff] %v164_v4 }
  0x15 PF: > { %s11_s8 = sadd.s32 1, %s298_s8   ;;  %s333_s6 = smov %s294_s7 }
  0x16   : > { %p8_p5 = scmp.ge.s32.totalorder %s11_s8, 4   ;;  %s334_s7 = smov %s336_s9 }
  0x18   :  { %10 = sbr.rel (!%p8_p5) target bundleno = 2 (0x2), region = 62 }

</bundles_post_ra>
